<compile_context>
chip_gen: v7x
topology: tpu7x:2x2x1
jax: 0.10.0
libtpu: 0.0.40
codegen_flags: <defaults>
</compile_context>

<pallas_src>
import functools

import jax
import jax.numpy as jnp
from jax import lax
from jax.experimental import pallas as pl
from jax.experimental.pallas import tpu as pltpu

EPS = 1e-5
EXPANSION = 4
LANE = 128                      # lane-dense channel padding (multiples of 128)
TILE_M = 512                    # row tile for the 1x1 matmuls / elementwise pass
BAND_CAP = 16                   # max output rows per 3x3-conv grid step
VMEM_LIMIT = 50 * 1024 * 1024   # <= ~52 MiB: leaves headroom on v7x (64 MiB)


# ---------------------------------------------------------------------------
# small helpers
# ---------------------------------------------------------------------------
def _round_up(v, m):
    return ((v + m - 1) // m) * m


def _pick_tile(total, cap, mult):
    """Largest multiple of `mult` <= cap that divides `total`."""
    best = mult
    t = mult
    while t <= min(cap, total):
        if total % t == 0:
            best = t
        t += mult
    return best


def _pick_row_tile(m8):
    """Row tile for the flattened (M, C) passes: as large as possible, but keep
    >= 2 grid steps when M allows so both v7x TensorCores are fed."""
    tm = _pick_tile(m8, TILE_M, 8)
    if m8 // tm < 2 and m8 >= 16:
        tm = _pick_tile(m8, max(8, m8 // 2), 8)
    return tm


def _pick_band(h):
    """Largest divisor of `h` that is <= BAND_CAP (output rows per 3x3 step)."""
    best = 1
    for cand in range(1, min(BAND_CAP, h) + 1):
        if h % cand == 0:
            best = cand
    return best


def _pad_axis(x, axis, target):
    if x.shape[axis] == target:
        return x
    cfg = [(0, 0)] * x.ndim
    cfg[axis] = (0, target - x.shape[axis])
    return jnp.pad(x, cfg)


# ---------------------------------------------------------------------------
# kernel 1: 1x1-conv matmul, resident weight, fused BN+ReLU prologue and
#           BN-batch-stats epilogue (column sum / sum of squares)
# ---------------------------------------------------------------------------
def _mm_kernel(*refs, apply_prologue, m_real, m_padded, tm):
    """One (tm, Np) tile of Y = act(A) @ W plus column sum / sum-sq of Y.

    act(A) = relu(A * scale + shift) (previous stage's BN+ReLU applied to the
    input tile) when apply_prologue, else A unchanged.  W is VMEM-resident and
    K is not tiled, so there is no accumulator scratch and no init/finalize
    branching.
    """
    if apply_prologue:
        a_ref, w_ref, scale_ref, shift_ref, y_ref, stats_ref = refs
    else:
        a_ref, w_ref, y_ref, stats_ref = refs

    a = a_ref[...]
    if apply_prologue:
        a = a.astype(jnp.float32)                       # BN math in f32 (v5e VPU)
        a = jnp.maximum(a * scale_ref[...] + shift_ref[...], 0.0)
        a = a.astype(jnp.bfloat16)                      # bf16 operand for the MXU
    y = jnp.dot(a, w_ref[...], preferred_element_type=jnp.float32)
    y_ref[...] = y.astype(y_ref.dtype)

    if m_padded != m_real:                              # static: mask pad rows
        rows = (pl.program_id(0) * tm
                + lax.broadcasted_iota(jnp.int32, (tm, 1), 0))
        y = jnp.where(rows < m_real, y, 0.0)
    s = jnp.sum(y, axis=0, keepdims=True)
    ss = jnp.sum(y * y, axis=0, keepdims=True)
    pad = jnp.zeros((6, y.shape[1]), jnp.float32)
    stats_ref[0] = jnp.concatenate([s, ss, pad], axis=0)   # lane-dense 8-row block


def _conv1x1_bn(a, w, scale_in=None, shift_in=None):
    """a: (M, Kp) bf16, w: (Kp, Np) bf16 -> y (Mpad, Np) bf16, stats (n_m, 8, Np)."""
    apply_prologue = scale_in is not None
    m_real, kp = a.shape
    np_ = w.shape[1]
    m_padded = _round_up(m_real, 8)
    tm = _pick_row_tile(m_padded)
    if m_padded != m_real:
        a = jnp.pad(a, ((0, m_padded - m_real), (0, 0)))
    n_m = m_padded // tm

    in_specs = [pl.BlockSpec((tm, kp), lambda i: (i, 0)),
                pl.BlockSpec((kp, np_), lambda i: (0, 0))]        # resident weight
    args = [a, w]
    if apply_prologue:
        in_specs += [pl.BlockSpec((1, kp), lambda i: (0, 0)),     # resident scale
                     pl.BlockSpec((1, kp), lambda i: (0, 0))]     # resident shift
        args += [scale_in, shift_in]

    kernel = functools.partial(_mm_kernel, apply_prologue=apply_prologue,
                               m_real=m_real, m_padded=m_padded, tm=tm)
    y, stats = pl.pallas_call(
        kernel,
        out_shape=(jax.ShapeDtypeStruct((m_padded, np_), jnp.bfloat16),
                   jax.ShapeDtypeStruct((n_m, 8, np_), jnp.float32)),
        grid=(n_m,),
        in_specs=in_specs,
        out_specs=(pl.BlockSpec((tm, np_), lambda i: (i, 0)),
                   pl.BlockSpec((1, 8, np_), lambda i: (i, 0, 0))),
        compiler_params=pltpu.CompilerParams(
            dimension_semantics=("parallel",),
            vmem_limit_bytes=VMEM_LIMIT),
    )(*args)
    return y, stats


# ---------------------------------------------------------------------------
# kernel 2: banded 3x3 conv (pad=1, stride=1), fused BN1+ReLU prologue and
#           BN2 stats epilogue.  No im2col, no host-side spatial padding.
# ---------------------------------------------------------------------------
def _conv3x3_kernel(x_ref, w_ref, scale_ref, shift_ref, y_ref, st_ref, p_buf,
                    *, h, w, cp, co, R, S, p_rows):
    """One band of R output rows.  The whole (h, w, cp) image of this batch
    element is VMEM-resident.  The band's activated input is written into
    `p_buf` with layout P[i*S + j] = act(x[r0-1+i, j-1]) (zeros at the H/W
    halo), so every (dy, dx) tap of every output position is one flat sublane
    offset away; the 9 taps become 9 band-wide MXU matmuls."""
    r0 = pl.program_id(1) * R
    scale = scale_ref[...]                              # (1, cp) f32
    shift = shift_ref[...]
    z_lead = jnp.zeros((1, cp), jnp.float32)
    z_tail = jnp.zeros((S - w - 1, cp), jnp.float32)

    # ---- build the activated, zero-padded band (image rows r0-1 .. r0+R) ----
    for i in range(R + 2):
        src = r0 + (i - 1)
        valid = jnp.logical_and(src >= 0, src < h)
        src_c = jnp.clip(src, 0, h - 1)
        row = x_ref[0, pl.ds(src_c, 1), :, :].reshape(w, cp).astype(jnp.float32)
        act = jnp.maximum(row * scale + shift, 0.0)
        act = jnp.where(valid, act, 0.0)
        p_buf[pl.ds(i * S, S), :] = jnp.concatenate([z_lead, act, z_tail], axis=0)
    p_buf[pl.ds((R + 2) * S, p_rows - (R + 2) * S), :] = jnp.zeros(
        (p_rows - (R + 2) * S, cp), jnp.float32)

    # ---- 9-tap accumulation: one MXU matmul per tap over the whole band -----
    acc = jnp.zeros((R * S, co), jnp.float32)
    for dy in range(3):
        band = p_buf[pl.ds(dy * S, R * S + 8), :]        # sublane-aligned read
        for dx in range(3):
            a_tap = band[dx:dx + R * S, :].astype(jnp.bfloat16)
            acc = acc + jnp.dot(a_tap, w_ref[dy, dx],
                                preferred_element_type=jnp.float32)

    y_band = acc.reshape(R, S, co)[:, :w, :]             # drop the halo columns
    y_ref[0] = y_band.astype(y_ref.dtype)
    s = jnp.sum(y_band, axis=(0, 1)).reshape(1, co)
    ss = jnp.sum(y_band * y_band, axis=(0, 1)).reshape(1, co)
    st_ref[0, 0] = jnp.concatenate([s, ss, jnp.zeros((6, co), jnp.float32)], axis=0)


def _conv3x3_bn(x, w2, scale_in, shift_in):
    """x: (n, h, w, cp) bf16 (unpadded spatially), w2: (3, 3, cp, co) bf16."""
    n, h, w, cp = x.shape
    co = w2.shape[-1]
    R = _pick_band(h)                                    # output rows per step
    S = _round_up(w + 2, 8)                              # padded row stride
    n_bands = h // R
    p_rows = (R + 2) * S + 8
    kernel = functools.partial(_conv3x3_kernel, h=h, w=w, cp=cp, co=co,
                               R=R, S=S, p_rows=p_rows)
    y, stats = pl.pallas_call(
        kernel,
        out_shape=(jax.ShapeDtypeStruct((n, h, w, co), jnp.bfloat16),
                   jax.ShapeDtypeStruct((n, n_bands, 8, co), jnp.float32)),
        grid=(n, n_bands),
        in_specs=[
            pl.BlockSpec((1, h, w, cp), lambda ni, bi: (ni, 0, 0, 0)),   # image, resident per n
            pl.BlockSpec((3, 3, cp, co), lambda ni, bi: (0, 0, 0, 0)),   # weights, resident
            pl.BlockSpec((1, cp), lambda ni, bi: (0, 0)),                # scale, resident
            pl.BlockSpec((1, cp), lambda ni, bi: (0, 0)),                # shift, resident
        ],
        out_specs=(
            pl.BlockSpec((1, R, w, co), lambda ni, bi: (ni, bi, 0, 0)),
            pl.BlockSpec((1, 1, 8, co), lambda ni, bi: (ni, bi, 0, 0)),
        ),
        scratch_shapes=[pltpu.VMEM((p_rows, cp), jnp.float32)],
        compiler_params=pltpu.CompilerParams(
            dimension_semantics=("parallel", "parallel"),
            vmem_limit_bytes=VMEM_LIMIT),
    )(x, w2, scale_in, shift_in)
    return y, stats


# ---------------------------------------------------------------------------
# kernel 3: BN3 + ReLU + residual add + ReLU (module's forward order), one pass
# ---------------------------------------------------------------------------
def _bn_add_relu_kernel(y_ref, r_ref, scale_ref, shift_ref, o_ref):
    y = y_ref[...].astype(jnp.float32)
    r = r_ref[...].astype(jnp.float32)
    pre = jnp.maximum(y * scale_ref[...] + shift_ref[...], 0.0)   # bn3 -> relu
    o_ref[...] = jnp.maximum(pre + r, 0.0).astype(o_ref.dtype)    # + identity -> relu


def _bn_add_relu(y, res, scale, shift):
    m_real, c = y.shape
    m_padded = _round_up(m_real, 8)
    tm = _pick_row_tile(m_padded)
    if m_padded != m_real:
        y = jnp.pad(y, ((0, m_padded - m_real), (0, 0)))
        res = jnp.pad(res, ((0, m_padded - m_real), (0, 0)))
    out = pl.pallas_call(
        _bn_add_relu_kernel,
        out_shape=jax.ShapeDtypeStruct((m_padded, c), jnp.bfloat16),
        grid=(m_padded // tm,),
        in_specs=[
            pl.BlockSpec((tm, c), lambda i: (i, 0)),
            pl.BlockSpec((tm, c), lambda i: (i, 0)),
            pl.BlockSpec((1, c), lambda i: (0, 0)),
            pl.BlockSpec((1, c), lambda i: (0, 0)),
        ],
        out_specs=pl.BlockSpec((tm, c), lambda i: (i, 0)),
        compiler_params=pltpu.CompilerParams(
            dimension_semantics=("parallel",),
            vmem_limit_bytes=VMEM_LIMIT),
    )(y, res, scale, shift)
    return out[:m_real]


# ---------------------------------------------------------------------------
# glue: BN-stat finalize (tiny (8, C) scalars) and parameter/layout prep
# ---------------------------------------------------------------------------
def _bn_affine(stats, count, gamma, beta):
    """Fold training-mode batch stats + affine into per-channel scale/shift so
    that bn(y) = y * scale + shift.  stats rows: 0 = sum(y), 1 = sum(y*y).

    NOTE: one-pass E[y^2]-E[y]^2 variance in f32 is adequate at these scales;
    a mean-subtracted / compensated accumulation would be safer for very large
    M with |mean| >> std."""
    c = stats.shape[-1]
    tot = stats.reshape(-1, stats.shape[-2], c).sum(axis=0)
    mean = tot[0] / count
    var = jnp.maximum(tot[1] / count - mean * mean, 0.0)
    scale = gamma * lax.rsqrt(var + EPS)
    shift = beta - mean * scale
    return scale.reshape(1, -1), shift.reshape(1, -1)


def init_bottleneck_params(key, inplanes, outplanes):
    k1, k2, k3 = jax.random.split(key, 3)
    cmid = outplanes
    cout = outplanes * EXPANSION
    return {
        # conv weights in PyTorch layout (Cout, Cin, KH, KW)
        "w1": 0.1 * jax.random.normal(k1, (cmid, inplanes, 1, 1), jnp.float32),
        "w2": 0.1 * jax.random.normal(k2, (cmid, cmid, 3, 3), jnp.float32),
        "w3": 0.1 * jax.random.normal(k3, (cout, cmid, 1, 1), jnp.float32),
        # BatchNorm affine params, PyTorch default init (weight=1, bias=0)
        "g1": jnp.ones((cmid,), jnp.float32), "b1": jnp.zeros((cmid,), jnp.float32),
        "g2": jnp.ones((cmid,), jnp.float32), "b2": jnp.zeros((cmid,), jnp.float32),
        "g3": jnp.ones((cout,), jnp.float32), "b3": jnp.zeros((cout,), jnp.float32),
    }


def bottleneck_forward(x_nchw, params, stride=1):
    """BottleNeck forward (downsample=None => stride==1, inplanes == 4*outplanes)."""
    x = jnp.transpose(x_nchw, (0, 2, 3, 1)).astype(jnp.float32)      # NCHW -> NHWC
    n, h, w, cin = x.shape
    cmid = params["w1"].shape[0]
    cout = params["w3"].shape[0]
    assert stride == 1 and cin == cout, \
        "downsample=None requires stride=1 and inplanes == expansion * outplanes"

    cin_p = _round_up(cin, LANE)
    cm_p = _round_up(cmid, LANE)
    co_p = _round_up(cout, LANE)
    m = n * h * w

    # lane-dense channel padding (multiples of 128) -> unmasked stores, full MXU lanes
    a1 = _pad_axis(x, 3, cin_p).reshape(m, cin_p).astype(jnp.bfloat16)
    # a1 is both the stage-1 input and the (bf16) residual stream.

    # weights -> matmul layout, zero-padded, bf16 for the MXU
    w1 = _pad_axis(_pad_axis(params["w1"].reshape(cmid, cin).T, 0, cin_p), 1, cm_p)
    w3 = _pad_axis(_pad_axis(params["w3"].reshape(cout, cmid).T, 0, cm_p), 1, co_p)
    w2 = jnp.transpose(params["w2"], (2, 3, 1, 0))                   # (kh,kw,cin,cout)
    w2 = _pad_axis(_pad_axis(w2, 2, cm_p), 3, cm_p)
    w1, w2, w3 = (t.astype(jnp.bfloat16) for t in (w1, w2, w3))

    g1, b1 = _pad_axis(params["g1"], 0, cm_p), _pad_axis(params["b1"], 0, cm_p)
    g2, b2 = _pad_axis(params["g2"], 0, cm_p), _pad_axis(params["b2"], 0, cm_p)
    g3, b3 = _pad_axis(params["g3"], 0, co_p), _pad_axis(params["b3"], 0, co_p)

    # ---- stage 1: conv1 (1x1) + BN1 batch stats (BN1+ReLU folded into stage 2) ----
    y1, st1 = _conv1x1_bn(a1, w1)
    scale1, shift1 = _bn_affine(st1, m, g1, b1)

    # ---- stage 2: banded 3x3 conv, fused BN1+ReLU prologue + BN2 stats -----------
    y1_img = y1[:m].reshape(n, h, w, cm_p)
    y2, st2 = _conv3x3_bn(y1_img, w2, scale1, shift1)
    scale2, shift2 = _bn_affine(st2, m, g2, b2)

    # ---- stage 3: conv3 (1x1) with fused BN2+ReLU prologue + BN3 stats -----------
    y3, st3 = _conv1x1_bn(y2.reshape(m, cm_p), w3, scale2, shift2)
    scale3, shift3 = _bn_affine(st3, m, g3, b3)

    # ---- BN3 -> ReLU -> + identity -> ReLU: one fused bf16 pass -------------------
    out = _bn_add_relu(y3[:m], a1, scale3, shift3)
    out = out[:, :cout].astype(jnp.float32).reshape(n, h, w, cout)
    return jnp.transpose(out, (0, 3, 1, 2))                          # NHWC -> NCHW


# ---------------------------------------------------------------------------
# pure-JAX reference (same BN semantics / forward order) for a sanity check
# ---------------------------------------------------------------------------
def _reference_forward(x_nchw, params):
    x = jnp.transpose(x_nchw, (0, 2, 3, 1)).astype(jnp.float32)

    def conv(v, wt, pad):
        return lax.conv_general_dilated(
            v, jnp.transpose(wt, (2, 3, 1, 0)), window_strides=(1, 1),
            padding=[(pad, pad), (pad, pad)],
            dimension_numbers=("NHWC", "HWIO", "NHWC"))

    def bn(v, g, b):
        mean = v.mean(axis=(0, 1, 2), keepdims=True)
        var = ((v - mean) ** 2).mean(axis=(0, 1, 2), keepdims=True)
        return (v - mean) * lax.rsqrt(var + EPS) * g + b

    identity = x
    y = jnp.maximum(bn(conv(x, params["w1"], 0), params["g1"], params["b1"]), 0.0)
    y = jnp.maximum(bn(conv(y, params["w2"], 1), params["g2"], params["b2"]), 0.0)
    y = jnp.maximum(bn(conv(y, params["w3"], 0), params["g3"], params["b3"]), 0.0)
    y = jnp.maximum(y + identity, 0.0)                 # relu before AND after the add
    return jnp.transpose(y, (0, 3, 1, 2))


if __name__ == "__main__":
    key = jax.random.PRNGKey(0)
    kx, kp = jax.random.split(key)

    inplanes, outplanes = 16, 4          # expansion 4 -> residual add is shape-valid
    batch, height, width = 2, 16, 16
    x = jax.random.normal(kx, (batch, inplanes, height, width), jnp.float32)
    params = init_bottleneck_params(kp, inplanes, outplanes)

    fwd = jax.jit(functools.partial(bottleneck_forward, stride=1))
    out = jax.block_until_ready(fwd(x, params))
    assert out.shape == (batch, inplanes, height, width)
    assert bool(jnp.all(jnp.isfinite(out)))

    # sanity check against the pure-JAX reference (bf16 MXU operands -> loose tol)
    ref = _reference_forward(x, params)
    err = float(jnp.max(jnp.abs(out - ref)))
    assert err < 1e-1, f"max abs error vs reference: {err}"
    print("KERNEL_OK")
</pallas_src>

<mosaic_0001>
module attributes {stable_mosaic.version = 11 : i64} {
  func.func @_mm_kernel(%arg0: i32, %arg1: memref<256x128xbf16, #tpu.memory_space<vmem>>, %arg2: memref<128x128xbf16, #tpu.memory_space<vmem>>, %arg3: memref<256x128xbf16, #tpu.memory_space<vmem>>, %arg4: memref<1x8x128xf32, #tpu.memory_space<vmem>>) attributes {dimension_semantics = [#tpu.dimension_semantics<parallel>], iteration_bounds = array<i64: 2>, scalar_prefetch = 0 : i64, scratch_operands = 0 : i64, tpu.core_type = #tpu.core_type<tc>, window_params = [{transform_indices = @transform_0, window_bounds = array<i64: 256, 128>}, {pipeline_mode = #tpu.pipeline_mode<synchronous>, transform_indices = @transform_1, window_bounds = array<i64: 128, 128>}, {transform_indices = @transform_2, window_bounds = array<i64: 256, 128>}, {transform_indices = @transform_3, window_bounds = array<i64: 1, 8, 128>}]} {
    %c0 = arith.constant 0 : index
    %c0_0 = arith.constant 0 : index
    %0 = vector.load %arg1[%c0, %c0_0] : memref<256x128xbf16, #tpu.memory_space<vmem>>, vector<256x128xbf16>
    %c0_1 = arith.constant 0 : index
    %c0_2 = arith.constant 0 : index
    %1 = vector.load %arg2[%c0_1, %c0_2] : memref<128x128xbf16, #tpu.memory_space<vmem>>, vector<128x128xbf16>
    %cst = arith.constant dense<0.000000e+00> : vector<256x128xf32>
    %2 = tpu.matmul %0, %1, %cst {dimension_numbers = #tpu.dot_dimension_numbers<[1], [0], [0], [1], [0, 0, 1, 1], [], []>} : vector<256x128xbf16>, vector<128x128xbf16>, vector<256x128xf32> -> vector<256x128xf32>
    %3 = arith.truncf %2 : vector<256x128xf32> to vector<256x128xbf16>
    %c0_3 = arith.constant 0 : index
    %c0_4 = arith.constant 0 : index
    %4 = vector.load %arg3[%c0_3, %c0_4] : memref<256x128xbf16, #tpu.memory_space<vmem>>, vector<256x128xbf16>
    tpu.vector_store %arg3[%c0_3, %c0_4], %3 {strides = array<i32>} : memref<256x128xbf16, #tpu.memory_space<vmem>>, vector<256x128xbf16>,
    %cst_5 = arith.constant dense<0.000000e+00> : vector<128xf32>
    %5 = vector.multi_reduction <add>, %2, %cst_5 [0] : vector<256x128xf32> to vector<128xf32>
    %6 = vector.shape_cast %5 : vector<128xf32> to vector<1x128xf32>
    %7 = arith.mulf %2, %2 : vector<256x128xf32>
    %cst_6 = arith.constant dense<0.000000e+00> : vector<128xf32>
    %8 = vector.multi_reduction <add>, %7, %cst_6 [0] : vector<256x128xf32> to vector<128xf32>
    %9 = vector.shape_cast %8 : vector<128xf32> to vector<1x128xf32>
    %cst_7 = arith.constant 0.000000e+00 : f32
    %10 = vector.broadcast %cst_7 : f32 to vector<6x128xf32>
    %11 = tpu.concatenate %6, %9, %10 in 0 : vector<1x128xf32>, vector<1x128xf32>, vector<6x128xf32> -> vector<8x128xf32>
    %c0_8 = arith.constant 0 : index
    %c0_9 = arith.constant 0 : index
    %c0_10 = arith.constant 0 : index
    %12 = vector.load %arg4[%c0_8, %c0_9, %c0_10] : memref<1x8x128xf32, #tpu.memory_space<vmem>>, vector<1x8x128xf32>
    %13 = vector.shape_cast %12 : vector<1x8x128xf32> to vector<8x128xf32>
    %14 = vector.shape_cast %11 : vector<8x128xf32> to vector<1x8x128xf32>
    tpu.vector_store %arg4[%c0_8, %c0_9, %c0_10], %14 {strides = array<i32>} : memref<1x8x128xf32, #tpu.memory_space<vmem>>, vector<1x8x128xf32>,
    return
  }
  func.func @transform_0(%arg0: i32) -> (i32, i32) {
    %c0_i32 = arith.constant 0 : i32
    %c0_i32_0 = arith.constant 0 : i32
    return %arg0, %c0_i32 : i32, i32
  }
  func.func @transform_1(%arg0: i32) -> (i32, i32) {
    %c0_i32 = arith.constant 0 : i32
    %c0_i32_0 = arith.constant 0 : i32
    %c0_i32_1 = arith.constant 0 : i32
    return %c0_i32, %c0_i32_0 : i32, i32
  }
  func.func @transform_2(%arg0: i32) -> (i32, i32) {
    %c0_i32 = arith.constant 0 : i32
    %c0_i32_0 = arith.constant 0 : i32
    return %arg0, %c0_i32 : i32, i32
  }
  func.func @transform_3(%arg0: i32) -> (i32, i32, i32) {
    %c0_i32 = arith.constant 0 : i32
    %c0_i32_0 = arith.constant 0 : i32
    %c0_i32_1 = arith.constant 0 : i32
    return %arg0, %c0_i32, %c0_i32_0 : i32, i32, i32
  }
}

module attributes {stable_mosaic.version = 11 : i64} {
  func.func @_conv3x3_kernel(%arg0: i32, %arg1: i32, %arg2: memref<1x16x16x128xbf16, #tpu.memory_space<vmem>>, %arg3: memref<3x3x128x128xbf16, #tpu.memory_space<vmem>>, %arg4: memref<1x128xf32, #tpu.memory_space<vmem>>, %arg5: memref<1x128xf32, #tpu.memory_space<vmem>>, %arg6: memref<1x16x16x128xbf16, #tpu.memory_space<vmem>>, %arg7: memref<1x1x8x128xf32, #tpu.memory_space<vmem>>, %arg8: memref<440x128xf32, #tpu.memory_space<vmem>>) attributes {dimension_semantics = [#tpu.dimension_semantics<parallel>, #tpu.dimension_semantics<parallel>], iteration_bounds = array<i64: 2, 1>, scalar_prefetch = 0 : i64, scratch_operands = 1 : i64, tpu.core_type = #tpu.core_type<tc>, window_params = [{transform_indices = @transform_0, window_bounds = array<i64: 1, 16, 16, 128>}, {pipeline_mode = #tpu.pipeline_mode<synchronous>, transform_indices = @transform_1, window_bounds = array<i64: 3, 3, 128, 128>}, {pipeline_mode = #tpu.pipeline_mode<synchronous>, transform_indices = @transform_2, window_bounds = array<i64: 1, 128>}, {pipeline_mode = #tpu.pipeline_mode<synchronous>, transform_indices = @transform_3, window_bounds = array<i64: 1, 128>}, {transform_indices = @transform_4, window_bounds = array<i64: 1, 16, 16, 128>}, {transform_indices = @transform_5, window_bounds = array<i64: 1, 1, 8, 128>}]} {
    %c16_i32 = arith.constant 16 : i32
    %0 = arith.muli %arg1, %c16_i32 : i32
    %c0 = arith.constant 0 : index
    %c0_0 = arith.constant 0 : index
    %1 = vector.load %arg4[%c0, %c0_0] : memref<1x128xf32, #tpu.memory_space<vmem>>, vector<1x128xf32>
    %c0_1 = arith.constant 0 : index
    %c0_2 = arith.constant 0 : index
    %2 = vector.load %arg5[%c0_1, %c0_2] : memref<1x128xf32, #tpu.memory_space<vmem>>, vector<1x128xf32>
    %cst = arith.constant 0.000000e+00 : f32
    %3 = vector.broadcast %cst : f32 to vector<1x128xf32>
    %cst_3 = arith.constant 0.000000e+00 : f32
    %4 = vector.broadcast %cst_3 : f32 to vector<7x128xf32>
    %c-1_i32 = arith.constant -1 : i32
    %5 = arith.addi %0, %c-1_i32 : i32
    %c0_i32 = arith.constant 0 : i32
    %6 = arith.cmpi sge, %5, %c0_i32 : i32
    %c16_i32_4 = arith.constant 16 : i32
    %7 = arith.cmpi slt, %5, %c16_i32_4 : i32
    %8 = arith.andi %6, %7 : i1
    %c0_i32_5 = arith.constant 0 : i32
    %c15_i32 = arith.constant 15 : i32
    %9 = arith.maxsi %c0_i32_5, %5 : i32
    %10 = arith.minsi %c15_i32, %9 : i32
    %c0_6 = arith.constant 0 : index
    %11 = arith.index_cast %10 : i32 to index
    %c0_7 = arith.constant 0 : index
    %c0_8 = arith.constant 0 : index
    %12 = vector.load %arg2[%c0_6, %11, %c0_7, %c0_8] : memref<1x16x16x128xbf16, #tpu.memory_space<vmem>>, vector<1x1x16x128xbf16>
    %13 = vector.shape_cast %12 : vector<1x1x16x128xbf16> to vector<1x16x128xbf16>
    %14 = vector.shape_cast %13 : vector<1x16x128xbf16> to vector<16x128xbf16>
    %15 = arith.extf %14 : vector<16x128xbf16> to vector<16x128xf32>
    %16 = vector.broadcast %1 : vector<1x128xf32> to vector<16x128xf32>
    %17 = arith.mulf %15, %16 : vector<16x128xf32>
    %18 = vector.broadcast %2 : vector<1x128xf32> to vector<16x128xf32>
    %19 = arith.addf %17, %18 : vector<16x128xf32>
    %cst_9 = arith.constant 0.000000e+00 : f32
    %20 = vector.broadcast %cst_9 : f32 to vector<16x128xf32>
    %21 = arith.maximumf %19, %20 : vector<16x128xf32>
    %cst_10 = arith.constant 0.000000e+00 : f32
    %22 = vector.broadcast %cst_10 : f32 to vector<16x128xf32>
    %23 = arith.select %8, %21, %22 : vector<16x128xf32>
    %24 = tpu.concatenate %3, %23, %4 in 0 : vector<1x128xf32>, vector<16x128xf32>, vector<7x128xf32> -> vector<24x128xf32>
    %c0_11 = arith.constant 0 : index
    %c0_12 = arith.constant 0 : index
    %25 = vector.load %arg8[%c0_11, %c0_12] : memref<440x128xf32, #tpu.memory_space<vmem>>, vector<24x128xf32>
    tpu.vector_store %arg8[%c0_11, %c0_12], %24 {strides = array<i32>} : memref<440x128xf32, #tpu.memory_space<vmem>>, vector<24x128xf32>,
    %c0_i32_13 = arith.constant 0 : i32
    %26 = arith.addi %0, %c0_i32_13 : i32
    %c0_i32_14 = arith.constant 0 : i32
    %27 = arith.cmpi sge, %26, %c0_i32_14 : i32
    %c16_i32_15 = arith.constant 16 : i32
    %28 = arith.cmpi slt, %26, %c16_i32_15 : i32
    %29 = arith.andi %27, %28 : i1
    %c0_i32_16 = arith.constant 0 : i32
    %c15_i32_17 = arith.constant 15 : i32
    %30 = arith.maxsi %c0_i32_16, %26 : i32
    %31 = arith.minsi %c15_i32_17, %30 : i32
    %c0_18 = arith.constant 0 : index
    %32 = arith.index_cast %31 : i32 to index
    %c0_19 = arith.constant 0 : index
    %c0_20 = arith.constant 0 : index
    %33 = vector.load %arg2[%c0_18, %32, %c0_19, %c0_20] : memref<1x16x16x128xbf16, #tpu.memory_space<vmem>>, vector<1x1x16x128xbf16>
    %34 = vector.shape_cast %33 : vector<1x1x16x128xbf16> to vector<1x16x128xbf16>
    %35 = vector.shape_cast %34 : vector<1x16x128xbf16> to vector<16x128xbf16>
    %36 = arith.extf %35 : vector<16x128xbf16> to vector<16x128xf32>
    %37 = vector.broadcast %1 : vector<1x128xf32> to vector<16x128xf32>
    %38 = arith.mulf %36, %37 : vector<16x128xf32>
    %39 = vector.broadcast %2 : vector<1x128xf32> to vector<16x128xf32>
    %40 = arith.addf %38, %39 : vector<16x128xf32>
    %cst_21 = arith.constant 0.000000e+00 : f32
    %41 = vector.broadcast %cst_21 : f32 to vector<16x128xf32>
    %42 = arith.maximumf %40, %41 : vector<16x128xf32>
    %cst_22 = arith.constant 0.000000e+00 : f32
    %43 = vector.broadcast %cst_22 : f32 to vector<16x128xf32>
    %44 = arith.select %29, %42, %43 : vector<16x128xf32>
    %45 = tpu.concatenate %3, %44, %4 in 0 : vector<1x128xf32>, vector<16x128xf32>, vector<7x128xf32> -> vector<24x128xf32>
    %c24 = arith.constant 24 : index
    %c0_23 = arith.constant 0 : index
    %46 = vector.load %arg8[%c24, %c0_23] : memref<440x128xf32, #tpu.memory_space<vmem>>, vector<24x128xf32>
    tpu.vector_store %arg8[%c24, %c0_23], %45 {strides = array<i32>} : memref<440x128xf32, #tpu.memory_space<vmem>>, vector<24x128xf32>,
    %c1_i32 = arith.constant 1 : i32
    %47 = arith.addi %0, %c1_i32 : i32
    %c0_i32_24 = arith.constant 0 : i32
    %48 = arith.cmpi sge, %47, %c0_i32_24 : i32
    %c16_i32_25 = arith.constant 16 : i32
    %49 = arith.cmpi slt, %47, %c16_i32_25 : i32
    %50 = arith.andi %48, %49 : i1
    %c0_i32_26 = arith.constant 0 : i32
    %c15_i32_27 = arith.constant 15 : i32
    %51 = arith.maxsi %c0_i32_26, %47 : i32
    %52 = arith.minsi %c15_i32_27, %51 : i32
    %c0_28 = arith.constant 0 : index
    %53 = arith.index_cast %52 : i32 to index
    %c0_29 = arith.constant 0 : index
    %c0_30 = arith.constant 0 : index
    %54 = vector.load %arg2[%c0_28, %53, %c0_29, %c0_30] : memref<1x16x16x128xbf16, #tpu.memory_space<vmem>>, vector<1x1x16x128xbf16>
    %55 = vector.shape_cast %54 : vector<1x1x16x128xbf16> to vector<1x16x128xbf16>
    %56 = vector.shape_cast %55 : vector<1x16x128xbf16> to vector<16x128xbf16>
    %57 = arith.extf %56 : vector<16x128xbf16> to vector<16x128xf32>
    %58 = vector.broadcast %1 : vector<1x128xf32> to vector<16x128xf32>
    %59 = arith.mulf %57, %58 : vector<16x128xf32>
    %60 = vector.broadcast %2 : vector<1x128xf32> to vector<16x128xf32>
    %61 = arith.addf %59, %60 : vector<16x128xf32>
    %cst_31 = arith.constant 0.000000e+00 : f32
    %62 = vector.broadcast %cst_31 : f32 to vector<16x128xf32>
    %63 = arith.maximumf %61, %62 : vector<16x128xf32>
    %cst_32 = arith.constant 0.000000e+00 : f32
    %64 = vector.broadcast %cst_32 : f32 to vector<16x128xf32>
    %65 = arith.select %50, %63, %64 : vector<16x128xf32>
    %66 = tpu.concatenate %3, %65, %4 in 0 : vector<1x128xf32>, vector<16x128xf32>, vector<7x128xf32> -> vector<24x128xf32>
    %c48 = arith.constant 48 : index
    %c0_33 = arith.constant 0 : index
    %67 = vector.load %arg8[%c48, %c0_33] : memref<440x128xf32, #tpu.memory_space<vmem>>, vector<24x128xf32>
    tpu.vector_store %arg8[%c48, %c0_33], %66 {strides = array<i32>} : memref<440x128xf32, #tpu.memory_space<vmem>>, vector<24x128xf32>,
    %c2_i32 = arith.constant 2 : i32
    %68 = arith.addi %0, %c2_i32 : i32
    %c0_i32_34 = arith.constant 0 : i32
    %69 = arith.cmpi sge, %68, %c0_i32_34 : i32
    %c16_i32_35 = arith.constant 16 : i32
    %70 = arith.cmpi slt, %68, %c16_i32_35 : i32
    %71 = arith.andi %69, %70 : i1
    %c0_i32_36 = arith.constant 0 : i32
    %c15_i32_37 = arith.constant 15 : i32
    %72 = arith.maxsi %c0_i32_36, %68 : i32
    %73 = arith.minsi %c15_i32_37, %72 : i32
    %c0_38 = arith.constant 0 : index
    %74 = arith.index_cast %73 : i32 to index
    %c0_39 = arith.constant 0 : index
    %c0_40 = arith.constant 0 : index
    %75 = vector.load %arg2[%c0_38, %74, %c0_39, %c0_40] : memref<1x16x16x128xbf16, #tpu.memory_space<vmem>>, vector<1x1x16x128xbf16>
    %76 = vector.shape_cast %75 : vector<1x1x16x128xbf16> to vector<1x16x128xbf16>
    %77 = vector.shape_cast %76 : vector<1x16x128xbf16> to vector<16x128xbf16>
    %78 = arith.extf %77 : vector<16x128xbf16> to vector<16x128xf32>
    %79 = vector.broadcast %1 : vector<1x128xf32> to vector<16x128xf32>
    %80 = arith.mulf %78, %79 : vector<16x128xf32>
    %81 = vector.broadcast %2 : vector<1x128xf32> to vector<16x128xf32>
    %82 = arith.addf %80, %81 : vector<16x128xf32>
    %cst_41 = arith.constant 0.000000e+00 : f32
    %83 = vector.broadcast %cst_41 : f32 to vector<16x128xf32>
    %84 = arith.maximumf %82, %83 : vector<16x128xf32>
    %cst_42 = arith.constant 0.000000e+00 : f32
    %85 = vector.broadcast %cst_42 : f32 to vector<16x128xf32>
    %86 = arith.select %71, %84, %85 : vector<16x128xf32>
    %87 = tpu.concatenate %3, %86, %4 in 0 : vector<1x128xf32>, vector<16x128xf32>, vector<7x128xf32> -> vector<24x128xf32>
    %c72 = arith.constant 72 : index
    %c0_43 = arith.constant 0 : index
    %88 = vector.load %arg8[%c72, %c0_43] : memref<440x128xf32, #tpu.memory_space<vmem>>, vector<24x128xf32>
    tpu.vector_store %arg8[%c72, %c0_43], %87 {strides = array<i32>} : memref<440x128xf32, #tpu.memory_space<vmem>>, vector<24x128xf32>,
    %c3_i32 = arith.constant 3 : i32
    %89 = arith.addi %0, %c3_i32 : i32
    %c0_i32_44 = arith.constant 0 : i32
    %90 = arith.cmpi sge, %89, %c0_i32_44 : i32
    %c16_i32_45 = arith.constant 16 : i32
    %91 = arith.cmpi slt, %89, %c16_i32_45 : i32
    %92 = arith.andi %90, %91 : i1
    %c0_i32_46 = arith.constant 0 : i32
    %c15_i32_47 = arith.constant 15 : i32
    %93 = arith.maxsi %c0_i32_46, %89 : i32
    %94 = arith.minsi %c15_i32_47, %93 : i32
    %c0_48 = arith.constant 0 : index
    %95 = arith.index_cast %94 : i32 to index
    %c0_49 = arith.constant 0 : index
    %c0_50 = arith.constant 0 : index
    %96 = vector.load %arg2[%c0_48, %95, %c0_49, %c0_50] : memref<1x16x16x128xbf16, #tpu.memory_space<vmem>>, vector<1x1x16x128xbf16>
    %97 = vector.shape_cast %96 : vector<1x1x16x128xbf16> to vector<1x16x128xbf16>
    %98 = vector.shape_cast %97 : vector<1x16x128xbf16> to vector<16x128xbf16>
    %99 = arith.extf %98 : vector<16x128xbf16> to vector<16x128xf32>
    %100 = vector.broadcast %1 : vector<1x128xf32> to vector<16x128xf32>
    %101 = arith.mulf %99, %100 : vector<16x128xf32>
    %102 = vector.broadcast %2 : vector<1x128xf32> to vector<16x128xf32>
    %103 = arith.addf %101, %102 : vector<16x128xf32>
    %cst_51 = arith.constant 0.000000e+00 : f32
    %104 = vector.broadcast %cst_51 : f32 to vector<16x128xf32>
    %105 = arith.maximumf %103, %104 : vector<16x128xf32>
    %cst_52 = arith.constant 0.000000e+00 : f32
    %106 = vector.broadcast %cst_52 : f32 to vector<16x128xf32>
    %107 = arith.select %92, %105, %106 : vector<16x128xf32>
    %108 = tpu.concatenate %3, %107, %4 in 0 : vector<1x128xf32>, vector<16x128xf32>, vector<7x128xf32> -> vector<24x128xf32>
    %c96 = arith.constant 96 : index
    %c0_53 = arith.constant 0 : index
    %109 = vector.load %arg8[%c96, %c0_53] : memref<440x128xf32, #tpu.memory_space<vmem>>, vector<24x128xf32>
    tpu.vector_store %arg8[%c96, %c0_53], %108 {strides = array<i32>} : memref<440x128xf32, #tpu.memory_space<vmem>>, vector<24x128xf32>,
    %c4_i32 = arith.constant 4 : i32
    %110 = arith.addi %0, %c4_i32 : i32
    %c0_i32_54 = arith.constant 0 : i32
    %111 = arith.cmpi sge, %110, %c0_i32_54 : i32
    %c16_i32_55 = arith.constant 16 : i32
    %112 = arith.cmpi slt, %110, %c16_i32_55 : i32
    %113 = arith.andi %111, %112 : i1
    %c0_i32_56 = arith.constant 0 : i32
    %c15_i32_57 = arith.constant 15 : i32
    %114 = arith.maxsi %c0_i32_56, %110 : i32
    %115 = arith.minsi %c15_i32_57, %114 : i32
    %c0_58 = arith.constant 0 : index
    %116 = arith.index_cast %115 : i32 to index
    %c0_59 = arith.constant 0 : index
    %c0_60 = arith.constant 0 : index
    %117 = vector.load %arg2[%c0_58, %116, %c0_59, %c0_60] : memref<1x16x16x128xbf16, #tpu.memory_space<vmem>>, vector<1x1x16x128xbf16>
    %118 = vector.shape_cast %117 : vector<1x1x16x128xbf16> to vector<1x16x128xbf16>
    %119 = vector.shape_cast %118 : vector<1x16x128xbf16> to vector<16x128xbf16>
    %120 = arith.extf %119 : vector<16x128xbf16> to vector<16x128xf32>
    %121 = vector.broadcast %1 : vector<1x128xf32> to vector<16x128xf32>
    %122 = arith.mulf %120, %121 : vector<16x128xf32>
    %123 = vector.broadcast %2 : vector<1x128xf32> to vector<16x128xf32>
    %124 = arith.addf %122, %123 : vector<16x128xf32>
    %cst_61 = arith.constant 0.000000e+00 : f32
    %125 = vector.broadcast %cst_61 : f32 to vector<16x128xf32>
    %126 = arith.maximumf %124, %125 : vector<16x128xf32>
    %cst_62 = arith.constant 0.000000e+00 : f32
    %127 = vector.broadcast %cst_62 : f32 to vector<16x128xf32>
    %128 = arith.select %113, %126, %127 : vector<16x128xf32>
    %129 = tpu.concatenate %3, %128, %4 in 0 : vector<1x128xf32>, vector<16x128xf32>, vector<7x128xf32> -> vector<24x128xf32>
    %c120 = arith.constant 120 : index
    %c0_63 = arith.constant 0 : index
    %130 = vector.load %arg8[%c120, %c0_63] : memref<440x128xf32, #tpu.memory_space<vmem>>, vector<24x128xf32>
    tpu.vector_store %arg8[%c120, %c0_63], %129 {strides = array<i32>} : memref<440x128xf32, #tpu.memory_space<vmem>>, vector<24x128xf32>,
    %c5_i32 = arith.constant 5 : i32
    %131 = arith.addi %0, %c5_i32 : i32
    %c0_i32_64 = arith.constant 0 : i32
    %132 = arith.cmpi sge, %131, %c0_i32_64 : i32
    %c16_i32_65 = arith.constant 16 : i32
    %133 = arith.cmpi slt, %131, %c16_i32_65 : i32
    %134 = arith.andi %132, %133 : i1
    %c0_i32_66 = arith.constant 0 : i32
    %c15_i32_67 = arith.constant 15 : i32
    %135 = arith.maxsi %c0_i32_66, %131 : i32
    %136 = arith.minsi %c15_i32_67, %135 : i32
    %c0_68 = arith.constant 0 : index
    %137 = arith.index_cast %136 : i32 to index
    %c0_69 = arith.constant 0 : index
    %c0_70 = arith.constant 0 : index
    %138 = vector.load %arg2[%c0_68, %137, %c0_69, %c0_70] : memref<1x16x16x128xbf16, #tpu.memory_space<vmem>>, vector<1x1x16x128xbf16>
    %139 = vector.shape_cast %138 : vector<1x1x16x128xbf16> to vector<1x16x128xbf16>
    %140 = vector.shape_cast %139 : vector<1x16x128xbf16> to vector<16x128xbf16>
    %141 = arith.extf %140 : vector<16x128xbf16> to vector<16x128xf32>
    %142 = vector.broadcast %1 : vector<1x128xf32> to vector<16x128xf32>
    %143 = arith.mulf %141, %142 : vector<16x128xf32>
    %144 = vector.broadcast %2 : vector<1x128xf32> to vector<16x128xf32>
    %145 = arith.addf %143, %144 : vector<16x128xf32>
    %cst_71 = arith.constant 0.000000e+00 : f32
    %146 = vector.broadcast %cst_71 : f32 to vector<16x128xf32>
    %147 = arith.maximumf %145, %146 : vector<16x128xf32>
    %cst_72 = arith.constant 0.000000e+00 : f32
    %148 = vector.broadcast %cst_72 : f32 to vector<16x128xf32>
    %149 = arith.select %134, %147, %148 : vector<16x128xf32>
    %150 = tpu.concatenate %3, %149, %4 in 0 : vector<1x128xf32>, vector<16x128xf32>, vector<7x128xf32> -> vector<24x128xf32>
    %c144 = arith.constant 144 : index
    %c0_73 = arith.constant 0 : index
    %151 = vector.load %arg8[%c144, %c0_73] : memref<440x128xf32, #tpu.memory_space<vmem>>, vector<24x128xf32>
    tpu.vector_store %arg8[%c144, %c0_73], %150 {strides = array<i32>} : memref<440x128xf32, #tpu.memory_space<vmem>>, vector<24x128xf32>,
    %c6_i32 = arith.constant 6 : i32
    %152 = arith.addi %0, %c6_i32 : i32
    %c0_i32_74 = arith.constant 0 : i32
    %153 = arith.cmpi sge, %152, %c0_i32_74 : i32
    %c16_i32_75 = arith.constant 16 : i32
    %154 = arith.cmpi slt, %152, %c16_i32_75 : i32
    %155 = arith.andi %153, %154 : i1
    %c0_i32_76 = arith.constant 0 : i32
    %c15_i32_77 = arith.constant 15 : i32
    %156 = arith.maxsi %c0_i32_76, %152 : i32
    %157 = arith.minsi %c15_i32_77, %156 : i32
    %c0_78 = arith.constant 0 : index
    %158 = arith.index_cast %157 : i32 to index
    %c0_79 = arith.constant 0 : index
    %c0_80 = arith.constant 0 : index
    %159 = vector.load %arg2[%c0_78, %158, %c0_79, %c0_80] : memref<1x16x16x128xbf16, #tpu.memory_space<vmem>>, vector<1x1x16x128xbf16>
    %160 = vector.shape_cast %159 : vector<1x1x16x128xbf16> to vector<1x16x128xbf16>
    %161 = vector.shape_cast %160 : vector<1x16x128xbf16> to vector<16x128xbf16>
    %162 = arith.extf %161 : vector<16x128xbf16> to vector<16x128xf32>
    %163 = vector.broadcast %1 : vector<1x128xf32> to vector<16x128xf32>
    %164 = arith.mulf %162, %163 : vector<16x128xf32>
    %165 = vector.broadcast %2 : vector<1x128xf32> to vector<16x128xf32>
    %166 = arith.addf %164, %165 : vector<16x128xf32>
    %cst_81 = arith.constant 0.000000e+00 : f32
    %167 = vector.broadcast %cst_81 : f32 to vector<16x128xf32>
    %168 = arith.maximumf %166, %167 : vector<16x128xf32>
    %cst_82 = arith.constant 0.000000e+00 : f32
    %169 = vector.broadcast %cst_82 : f32 to vector<16x128xf32>
    %170 = arith.select %155, %168, %169 : vector<16x128xf32>
    %171 = tpu.concatenate %3, %170, %4 in 0 : vector<1x128xf32>, vector<16x128xf32>, vector<7x128xf32> -> vector<24x128xf32>
    %c168 = arith.constant 168 : index
    %c0_83 = arith.constant 0 : index
    %172 = vector.load %arg8[%c168, %c0_83] : memref<440x128xf32, #tpu.memory_space<vmem>>, vector<24x128xf32>
    tpu.vector_store %arg8[%c168, %c0_83], %171 {strides = array<i32>} : memref<440x128xf32, #tpu.memory_space<vmem>>, vector<24x128xf32>,
    %c7_i32 = arith.constant 7 : i32
    %173 = arith.addi %0, %c7_i32 : i32
    %c0_i32_84 = arith.constant 0 : i32
    %174 = arith.cmpi sge, %173, %c0_i32_84 : i32
    %c16_i32_85 = arith.constant 16 : i32
    %175 = arith.cmpi slt, %173, %c16_i32_85 : i32
    %176 = arith.andi %174, %175 : i1
    %c0_i32_86 = arith.constant 0 : i32
    %c15_i32_87 = arith.constant 15 : i32
    %177 = arith.maxsi %c0_i32_86, %173 : i32
    %178 = arith.minsi %c15_i32_87, %177 : i32
    %c0_88 = arith.constant 0 : index
    %179 = arith.index_cast %178 : i32 to index
    %c0_89 = arith.constant 0 : index
    %c0_90 = arith.constant 0 : index
    %180 = vector.load %arg2[%c0_88, %179, %c0_89, %c0_90] : memref<1x16x16x128xbf16, #tpu.memory_space<vmem>>, vector<1x1x16x128xbf16>
    %181 = vector.shape_cast %180 : vector<1x1x16x128xbf16> to vector<1x16x128xbf16>
    %182 = vector.shape_cast %181 : vector<1x16x128xbf16> to vector<16x128xbf16>
    %183 = arith.extf %182 : vector<16x128xbf16> to vector<16x128xf32>
    %184 = vector.broadcast %1 : vector<1x128xf32> to vector<16x128xf32>
    %185 = arith.mulf %183, %184 : vector<16x128xf32>
    %186 = vector.broadcast %2 : vector<1x128xf32> to vector<16x128xf32>
    %187 = arith.addf %185, %186 : vector<16x128xf32>
    %cst_91 = arith.constant 0.000000e+00 : f32
    %188 = vector.broadcast %cst_91 : f32 to vector<16x128xf32>
    %189 = arith.maximumf %187, %188 : vector<16x128xf32>
    %cst_92 = arith.constant 0.000000e+00 : f32
    %190 = vector.broadcast %cst_92 : f32 to vector<16x128xf32>
    %191 = arith.select %176, %189, %190 : vector<16x128xf32>
    %192 = tpu.concatenate %3, %191, %4 in 0 : vector<1x128xf32>, vector<16x128xf32>, vector<7x128xf32> -> vector<24x128xf32>
    %c192 = arith.constant 192 : index
    %c0_93 = arith.constant 0 : index
    %193 = vector.load %arg8[%c192, %c0_93] : memref<440x128xf32, #tpu.memory_space<vmem>>, vector<24x128xf32>
    tpu.vector_store %arg8[%c192, %c0_93], %192 {strides = array<i32>} : memref<440x128xf32, #tpu.memory_space<vmem>>, vector<24x128xf32>,
    %c8_i32 = arith.constant 8 : i32
    %194 = arith.addi %0, %c8_i32 : i32
    %c0_i32_94 = arith.constant 0 : i32
    %195 = arith.cmpi sge, %194, %c0_i32_94 : i32
    %c16_i32_95 = arith.constant 16 : i32
    %196 = arith.cmpi slt, %194, %c16_i32_95 : i32
    %197 = arith.andi %195, %196 : i1
    %c0_i32_96 = arith.constant 0 : i32
    %c15_i32_97 = arith.constant 15 : i32
    %198 = arith.maxsi %c0_i32_96, %194 : i32
    %199 = arith.minsi %c15_i32_97, %198 : i32
    %c0_98 = arith.constant 0 : index
    %200 = arith.index_cast %199 : i32 to index
    %c0_99 = arith.constant 0 : index
    %c0_100 = arith.constant 0 : index
    %201 = vector.load %arg2[%c0_98, %200, %c0_99, %c0_100] : memref<1x16x16x128xbf16, #tpu.memory_space<vmem>>, vector<1x1x16x128xbf16>
    %202 = vector.shape_cast %201 : vector<1x1x16x128xbf16> to vector<1x16x128xbf16>
    %203 = vector.shape_cast %202 : vector<1x16x128xbf16> to vector<16x128xbf16>
    %204 = arith.extf %203 : vector<16x128xbf16> to vector<16x128xf32>
    %205 = vector.broadcast %1 : vector<1x128xf32> to vector<16x128xf32>
    %206 = arith.mulf %204, %205 : vector<16x128xf32>
    %207 = vector.broadcast %2 : vector<1x128xf32> to vector<16x128xf32>
    %208 = arith.addf %206, %207 : vector<16x128xf32>
    %cst_101 = arith.constant 0.000000e+00 : f32
    %209 = vector.broadcast %cst_101 : f32 to vector<16x128xf32>
    %210 = arith.maximumf %208, %209 : vector<16x128xf32>
    %cst_102 = arith.constant 0.000000e+00 : f32
    %211 = vector.broadcast %cst_102 : f32 to vector<16x128xf32>
    %212 = arith.select %197, %210, %211 : vector<16x128xf32>
    %213 = tpu.concatenate %3, %212, %4 in 0 : vector<1x128xf32>, vector<16x128xf32>, vector<7x128xf32> -> vector<24x128xf32>
    %c216 = arith.constant 216 : index
    %c0_103 = arith.constant 0 : index
    %214 = vector.load %arg8[%c216, %c0_103] : memref<440x128xf32, #tpu.memory_space<vmem>>, vector<24x128xf32>
    tpu.vector_store %arg8[%c216, %c0_103], %213 {strides = array<i32>} : memref<440x128xf32, #tpu.memory_space<vmem>>, vector<24x128xf32>,
    %c9_i32 = arith.constant 9 : i32
    %215 = arith.addi %0, %c9_i32 : i32
    %c0_i32_104 = arith.constant 0 : i32
    %216 = arith.cmpi sge, %215, %c0_i32_104 : i32
    %c16_i32_105 = arith.constant 16 : i32
    %217 = arith.cmpi slt, %215, %c16_i32_105 : i32
    %218 = arith.andi %216, %217 : i1
    %c0_i32_106 = arith.constant 0 : i32
    %c15_i32_107 = arith.constant 15 : i32
    %219 = arith.maxsi %c0_i32_106, %215 : i32
    %220 = arith.minsi %c15_i32_107, %219 : i32
    %c0_108 = arith.constant 0 : index
    %221 = arith.index_cast %220 : i32 to index
    %c0_109 = arith.constant 0 : index
    %c0_110 = arith.constant 0 : index
    %222 = vector.load %arg2[%c0_108, %221, %c0_109, %c0_110] : memref<1x16x16x128xbf16, #tpu.memory_space<vmem>>, vector<1x1x16x128xbf16>
    %223 = vector.shape_cast %222 : vector<1x1x16x128xbf16> to vector<1x16x128xbf16>
    %224 = vector.shape_cast %223 : vector<1x16x128xbf16> to vector<16x128xbf16>
    %225 = arith.extf %224 : vector<16x128xbf16> to vector<16x128xf32>
    %226 = vector.broadcast %1 : vector<1x128xf32> to vector<16x128xf32>
    %227 = arith.mulf %225, %226 : vector<16x128xf32>
    %228 = vector.broadcast %2 : vector<1x128xf32> to vector<16x128xf32>
    %229 = arith.addf %227, %228 : vector<16x128xf32>
    %cst_111 = arith.constant 0.000000e+00 : f32
    %230 = vector.broadcast %cst_111 : f32 to vector<16x128xf32>
    %231 = arith.maximumf %229, %230 : vector<16x128xf32>
    %cst_112 = arith.constant 0.000000e+00 : f32
    %232 = vector.broadcast %cst_112 : f32 to vector<16x128xf32>
    %233 = arith.select %218, %231, %232 : vector<16x128xf32>
    %234 = tpu.concatenate %3, %233, %4 in 0 : vector<1x128xf32>, vector<16x128xf32>, vector<7x128xf32> -> vector<24x128xf32>
    %c240 = arith.constant 240 : index
    %c0_113 = arith.constant 0 : index
    %235 = vector.load %arg8[%c240, %c0_113] : memref<440x128xf32, #tpu.memory_space<vmem>>, vector<24x128xf32>
    tpu.vector_store %arg8[%c240, %c0_113], %234 {strides = array<i32>} : memref<440x128xf32, #tpu.memory_space<vmem>>, vector<24x128xf32>,
    %c10_i32 = arith.constant 10 : i32
    %236 = arith.addi %0, %c10_i32 : i32
    %c0_i32_114 = arith.constant 0 : i32
    %237 = arith.cmpi sge, %236, %c0_i32_114 : i32
    %c16_i32_115 = arith.constant 16 : i32
    %238 = arith.cmpi slt, %236, %c16_i32_115 : i32
    %239 = arith.andi %237, %238 : i1
    %c0_i32_116 = arith.constant 0 : i32
    %c15_i32_117 = arith.constant 15 : i32
    %240 = arith.maxsi %c0_i32_116, %236 : i32
    %241 = arith.minsi %c15_i32_117, %240 : i32
    %c0_118 = arith.constant 0 : index
    %242 = arith.index_cast %241 : i32 to index
    %c0_119 = arith.constant 0 : index
    %c0_120 = arith.constant 0 : index
    %243 = vector.load %arg2[%c0_118, %242, %c0_119, %c0_120] : memref<1x16x16x128xbf16, #tpu.memory_space<vmem>>, vector<1x1x16x128xbf16>
    %244 = vector.shape_cast %243 : vector<1x1x16x128xbf16> to vector<1x16x128xbf16>
    %245 = vector.shape_cast %244 : vector<1x16x128xbf16> to vector<16x128xbf16>
    %246 = arith.extf %245 : vector<16x128xbf16> to vector<16x128xf32>
    %247 = vector.broadcast %1 : vector<1x128xf32> to vector<16x128xf32>
    %248 = arith.mulf %246, %247 : vector<16x128xf32>
    %249 = vector.broadcast %2 : vector<1x128xf32> to vector<16x128xf32>
    %250 = arith.addf %248, %249 : vector<16x128xf32>
    %cst_121 = arith.constant 0.000000e+00 : f32
    %251 = vector.broadcast %cst_121 : f32 to vector<16x128xf32>
    %252 = arith.maximumf %250, %251 : vector<16x128xf32>
    %cst_122 = arith.constant 0.000000e+00 : f32
    %253 = vector.broadcast %cst_122 : f32 to vector<16x128xf32>
    %254 = arith.select %239, %252, %253 : vector<16x128xf32>
    %255 = tpu.concatenate %3, %254, %4 in 0 : vector<1x128xf32>, vector<16x128xf32>, vector<7x128xf32> -> vector<24x128xf32>
    %c264 = arith.constant 264 : index
    %c0_123 = arith.constant 0 : index
    %256 = vector.load %arg8[%c264, %c0_123] : memref<440x128xf32, #tpu.memory_space<vmem>>, vector<24x128xf32>
    tpu.vector_store %arg8[%c264, %c0_123], %255 {strides = array<i32>} : memref<440x128xf32, #tpu.memory_space<vmem>>, vector<24x128xf32>,
    %c11_i32 = arith.constant 11 : i32
    %257 = arith.addi %0, %c11_i32 : i32
    %c0_i32_124 = arith.constant 0 : i32
    %258 = arith.cmpi sge, %257, %c0_i32_124 : i32
    %c16_i32_125 = arith.constant 16 : i32
    %259 = arith.cmpi slt, %257, %c16_i32_125 : i32
    %260 = arith.andi %258, %259 : i1
    %c0_i32_126 = arith.constant 0 : i32
    %c15_i32_127 = arith.constant 15 : i32
    %261 = arith.maxsi %c0_i32_126, %257 : i32
    %262 = arith.minsi %c15_i32_127, %261 : i32
    %c0_128 = arith.constant 0 : index
    %263 = arith.index_cast %262 : i32 to index
    %c0_129 = arith.constant 0 : index
    %c0_130 = arith.constant 0 : index
    %264 = vector.load %arg2[%c0_128, %263, %c0_129, %c0_130] : memref<1x16x16x128xbf16, #tpu.memory_space<vmem>>, vector<1x1x16x128xbf16>
    %265 = vector.shape_cast %264 : vector<1x1x16x128xbf16> to vector<1x16x128xbf16>
    %266 = vector.shape_cast %265 : vector<1x16x128xbf16> to vector<16x128xbf16>
    %267 = arith.extf %266 : vector<16x128xbf16> to vector<16x128xf32>
    %268 = vector.broadcast %1 : vector<1x128xf32> to vector<16x128xf32>
    %269 = arith.mulf %267, %268 : vector<16x128xf32>
    %270 = vector.broadcast %2 : vector<1x128xf32> to vector<16x128xf32>
    %271 = arith.addf %269, %270 : vector<16x128xf32>
    %cst_131 = arith.constant 0.000000e+00 : f32
    %272 = vector.broadcast %cst_131 : f32 to vector<16x128xf32>
    %273 = arith.maximumf %271, %272 : vector<16x128xf32>
    %cst_132 = arith.constant 0.000000e+00 : f32
    %274 = vector.broadcast %cst_132 : f32 to vector<16x128xf32>
    %275 = arith.select %260, %273, %274 : vector<16x128xf32>
    %276 = tpu.concatenate %3, %275, %4 in 0 : vector<1x128xf32>, vector<16x128xf32>, vector<7x128xf32> -> vector<24x128xf32>
    %c288 = arith.constant 288 : index
    %c0_133 = arith.constant 0 : index
    %277 = vector.load %arg8[%c288, %c0_133] : memref<440x128xf32, #tpu.memory_space<vmem>>, vector<24x128xf32>
    tpu.vector_store %arg8[%c288, %c0_133], %276 {strides = array<i32>} : memref<440x128xf32, #tpu.memory_space<vmem>>, vector<24x128xf32>,
    %c12_i32 = arith.constant 12 : i32
    %278 = arith.addi %0, %c12_i32 : i32
    %c0_i32_134 = arith.constant 0 : i32
    %279 = arith.cmpi sge, %278, %c0_i32_134 : i32
    %c16_i32_135 = arith.constant 16 : i32
    %280 = arith.cmpi slt, %278, %c16_i32_135 : i32
    %281 = arith.andi %279, %280 : i1
    %c0_i32_136 = arith.constant 0 : i32
    %c15_i32_137 = arith.constant 15 : i32
    %282 = arith.maxsi %c0_i32_136, %278 : i32
    %283 = arith.minsi %c15_i32_137, %282 : i32
    %c0_138 = arith.constant 0 : index
    %284 = arith.index_cast %283 : i32 to index
    %c0_139 = arith.constant 0 : index
    %c0_140 = arith.constant 0 : index
    %285 = vector.load %arg2[%c0_138, %284, %c0_139, %c0_140] : memref<1x16x16x128xbf16, #tpu.memory_space<vmem>>, vector<1x1x16x128xbf16>
    %286 = vector.shape_cast %285 : vector<1x1x16x128xbf16> to vector<1x16x128xbf16>
    %287 = vector.shape_cast %286 : vector<1x16x128xbf16> to vector<16x128xbf16>
    %288 = arith.extf %287 : vector<16x128xbf16> to vector<16x128xf32>
    %289 = vector.broadcast %1 : vector<1x128xf32> to vector<16x128xf32>
    %290 = arith.mulf %288, %289 : vector<16x128xf32>
    %291 = vector.broadcast %2 : vector<1x128xf32> to vector<16x128xf32>
    %292 = arith.addf %290, %291 : vector<16x128xf32>
    %cst_141 = arith.constant 0.000000e+00 : f32
    %293 = vector.broadcast %cst_141 : f32 to vector<16x128xf32>
    %294 = arith.maximumf %292, %293 : vector<16x128xf32>
    %cst_142 = arith.constant 0.000000e+00 : f32
    %295 = vector.broadcast %cst_142 : f32 to vector<16x128xf32>
    %296 = arith.select %281, %294, %295 : vector<16x128xf32>
    %297 = tpu.concatenate %3, %296, %4 in 0 : vector<1x128xf32>, vector<16x128xf32>, vector<7x128xf32> -> vector<24x128xf32>
    %c312 = arith.constant 312 : index
    %c0_143 = arith.constant 0 : index
    %298 = vector.load %arg8[%c312, %c0_143] : memref<440x128xf32, #tpu.memory_space<vmem>>, vector<24x128xf32>
    tpu.vector_store %arg8[%c312, %c0_143], %297 {strides = array<i32>} : memref<440x128xf32, #tpu.memory_space<vmem>>, vector<24x128xf32>,
    %c13_i32 = arith.constant 13 : i32
    %299 = arith.addi %0, %c13_i32 : i32
    %c0_i32_144 = arith.constant 0 : i32
    %300 = arith.cmpi sge, %299, %c0_i32_144 : i32
    %c16_i32_145 = arith.constant 16 : i32
    %301 = arith.cmpi slt, %299, %c16_i32_145 : i32
    %302 = arith.andi %300, %301 : i1
    %c0_i32_146 = arith.constant 0 : i32
    %c15_i32_147 = arith.constant 15 : i32
    %303 = arith.maxsi %c0_i32_146, %299 : i32
    %304 = arith.minsi %c15_i32_147, %303 : i32
    %c0_148 = arith.constant 0 : index
    %305 = arith.index_cast %304 : i32 to index
    %c0_149 = arith.constant 0 : index
    %c0_150 = arith.constant 0 : index
    %306 = vector.load %arg2[%c0_148, %305, %c0_149, %c0_150] : memref<1x16x16x128xbf16, #tpu.memory_space<vmem>>, vector<1x1x16x128xbf16>
    %307 = vector.shape_cast %306 : vector<1x1x16x128xbf16> to vector<1x16x128xbf16>
    %308 = vector.shape_cast %307 : vector<1x16x128xbf16> to vector<16x128xbf16>
    %309 = arith.extf %308 : vector<16x128xbf16> to vector<16x128xf32>
    %310 = vector.broadcast %1 : vector<1x128xf32> to vector<16x128xf32>
    %311 = arith.mulf %309, %310 : vector<16x128xf32>
    %312 = vector.broadcast %2 : vector<1x128xf32> to vector<16x128xf32>
    %313 = arith.addf %311, %312 : vector<16x128xf32>
    %cst_151 = arith.constant 0.000000e+00 : f32
    %314 = vector.broadcast %cst_151 : f32 to vector<16x128xf32>
    %315 = arith.maximumf %313, %314 : vector<16x128xf32>
    %cst_152 = arith.constant 0.000000e+00 : f32
    %316 = vector.broadcast %cst_152 : f32 to vector<16x128xf32>
    %317 = arith.select %302, %315, %316 : vector<16x128xf32>
    %318 = tpu.concatenate %3, %317, %4 in 0 : vector<1x128xf32>, vector<16x128xf32>, vector<7x128xf32> -> vector<24x128xf32>
    %c336 = arith.constant 336 : index
    %c0_153 = arith.constant 0 : index
    %319 = vector.load %arg8[%c336, %c0_153] : memref<440x128xf32, #tpu.memory_space<vmem>>, vector<24x128xf32>
    tpu.vector_store %arg8[%c336, %c0_153], %318 {strides = array<i32>} : memref<440x128xf32, #tpu.memory_space<vmem>>, vector<24x128xf32>,
    %c14_i32 = arith.constant 14 : i32
    %320 = arith.addi %0, %c14_i32 : i32
    %c0_i32_154 = arith.constant 0 : i32
    %321 = arith.cmpi sge, %320, %c0_i32_154 : i32
    %c16_i32_155 = arith.constant 16 : i32
    %322 = arith.cmpi slt, %320, %c16_i32_155 : i32
    %323 = arith.andi %321, %322 : i1
    %c0_i32_156 = arith.constant 0 : i32
    %c15_i32_157 = arith.constant 15 : i32
    %324 = arith.maxsi %c0_i32_156, %320 : i32
    %325 = arith.minsi %c15_i32_157, %324 : i32
    %c0_158 = arith.constant 0 : index
    %326 = arith.index_cast %325 : i32 to index
    %c0_159 = arith.constant 0 : index
    %c0_160 = arith.constant 0 : index
    %327 = vector.load %arg2[%c0_158, %326, %c0_159, %c0_160] : memref<1x16x16x128xbf16, #tpu.memory_space<vmem>>, vector<1x1x16x128xbf16>
    %328 = vector.shape_cast %327 : vector<1x1x16x128xbf16> to vector<1x16x128xbf16>
    %329 = vector.shape_cast %328 : vector<1x16x128xbf16> to vector<16x128xbf16>
    %330 = arith.extf %329 : vector<16x128xbf16> to vector<16x128xf32>
    %331 = vector.broadcast %1 : vector<1x128xf32> to vector<16x128xf32>
    %332 = arith.mulf %330, %331 : vector<16x128xf32>
    %333 = vector.broadcast %2 : vector<1x128xf32> to vector<16x128xf32>
    %334 = arith.addf %332, %333 : vector<16x128xf32>
    %cst_161 = arith.constant 0.000000e+00 : f32
    %335 = vector.broadcast %cst_161 : f32 to vector<16x128xf32>
    %336 = arith.maximumf %334, %335 : vector<16x128xf32>
    %cst_162 = arith.constant 0.000000e+00 : f32
    %337 = vector.broadcast %cst_162 : f32 to vector<16x128xf32>
    %338 = arith.select %323, %336, %337 : vector<16x128xf32>
    %339 = tpu.concatenate %3, %338, %4 in 0 : vector<1x128xf32>, vector<16x128xf32>, vector<7x128xf32> -> vector<24x128xf32>
    %c360 = arith.constant 360 : index
    %c0_163 = arith.constant 0 : index
    %340 = vector.load %arg8[%c360, %c0_163] : memref<440x128xf32, #tpu.memory_space<vmem>>, vector<24x128xf32>
    tpu.vector_store %arg8[%c360, %c0_163], %339 {strides = array<i32>} : memref<440x128xf32, #tpu.memory_space<vmem>>, vector<24x128xf32>,
    %c15_i32_164 = arith.constant 15 : i32
    %341 = arith.addi %0, %c15_i32_164 : i32
    %c0_i32_165 = arith.constant 0 : i32
    %342 = arith.cmpi sge, %341, %c0_i32_165 : i32
    %c16_i32_166 = arith.constant 16 : i32
    %343 = arith.cmpi slt, %341, %c16_i32_166 : i32
    %344 = arith.andi %342, %343 : i1
    %c0_i32_167 = arith.constant 0 : i32
    %c15_i32_168 = arith.constant 15 : i32
    %345 = arith.maxsi %c0_i32_167, %341 : i32
    %346 = arith.minsi %c15_i32_168, %345 : i32
    %c0_169 = arith.constant 0 : index
    %347 = arith.index_cast %346 : i32 to index
    %c0_170 = arith.constant 0 : index
    %c0_171 = arith.constant 0 : index
    %348 = vector.load %arg2[%c0_169, %347, %c0_170, %c0_171] : memref<1x16x16x128xbf16, #tpu.memory_space<vmem>>, vector<1x1x16x128xbf16>
    %349 = vector.shape_cast %348 : vector<1x1x16x128xbf16> to vector<1x16x128xbf16>
    %350 = vector.shape_cast %349 : vector<1x16x128xbf16> to vector<16x128xbf16>
    %351 = arith.extf %350 : vector<16x128xbf16> to vector<16x128xf32>
    %352 = vector.broadcast %1 : vector<1x128xf32> to vector<16x128xf32>
    %353 = arith.mulf %351, %352 : vector<16x128xf32>
    %354 = vector.broadcast %2 : vector<1x128xf32> to vector<16x128xf32>
    %355 = arith.addf %353, %354 : vector<16x128xf32>
    %cst_172 = arith.constant 0.000000e+00 : f32
    %356 = vector.broadcast %cst_172 : f32 to vector<16x128xf32>
    %357 = arith.maximumf %355, %356 : vector<16x128xf32>
    %cst_173 = arith.constant 0.000000e+00 : f32
    %358 = vector.broadcast %cst_173 : f32 to vector<16x128xf32>
    %359 = arith.select %344, %357, %358 : vector<16x128xf32>
    %360 = tpu.concatenate %3, %359, %4 in 0 : vector<1x128xf32>, vector<16x128xf32>, vector<7x128xf32> -> vector<24x128xf32>
    %c384 = arith.constant 384 : index
    %c0_174 = arith.constant 0 : index
    %361 = vector.load %arg8[%c384, %c0_174] : memref<440x128xf32, #tpu.memory_space<vmem>>, vector<24x128xf32>
    tpu.vector_store %arg8[%c384, %c0_174], %360 {strides = array<i32>} : memref<440x128xf32, #tpu.memory_space<vmem>>, vector<24x128xf32>,
    %c16_i32_175 = arith.constant 16 : i32
    %362 = arith.addi %0, %c16_i32_175 : i32
    %c0_i32_176 = arith.constant 0 : i32
    %363 = arith.cmpi sge, %362, %c0_i32_176 : i32
    %c16_i32_177 = arith.constant 16 : i32
    %364 = arith.cmpi slt, %362, %c16_i32_177 : i32
    %365 = arith.andi %363, %364 : i1
    %c0_i32_178 = arith.constant 0 : i32
    %c15_i32_179 = arith.constant 15 : i32
    %366 = arith.maxsi %c0_i32_178, %362 : i32
    %367 = arith.minsi %c15_i32_179, %366 : i32
    %c0_180 = arith.constant 0 : index
    %368 = arith.index_cast %367 : i32 to index
    %c0_181 = arith.constant 0 : index
    %c0_182 = arith.constant 0 : index
    %369 = vector.load %arg2[%c0_180, %368, %c0_181, %c0_182] : memref<1x16x16x128xbf16, #tpu.memory_space<vmem>>, vector<1x1x16x128xbf16>
    %370 = vector.shape_cast %369 : vector<1x1x16x128xbf16> to vector<1x16x128xbf16>
    %371 = vector.shape_cast %370 : vector<1x16x128xbf16> to vector<16x128xbf16>
    %372 = arith.extf %371 : vector<16x128xbf16> to vector<16x128xf32>
    %373 = vector.broadcast %1 : vector<1x128xf32> to vector<16x128xf32>
    %374 = arith.mulf %372, %373 : vector<16x128xf32>
    %375 = vector.broadcast %2 : vector<1x128xf32> to vector<16x128xf32>
    %376 = arith.addf %374, %375 : vector<16x128xf32>
    %cst_183 = arith.constant 0.000000e+00 : f32
    %377 = vector.broadcast %cst_183 : f32 to vector<16x128xf32>
    %378 = arith.maximumf %376, %377 : vector<16x128xf32>
    %cst_184 = arith.constant 0.000000e+00 : f32
    %379 = vector.broadcast %cst_184 : f32 to vector<16x128xf32>
    %380 = arith.select %365, %378, %379 : vector<16x128xf32>
    %381 = tpu.concatenate %3, %380, %4 in 0 : vector<1x128xf32>, vector<16x128xf32>, vector<7x128xf32> -> vector<24x128xf32>
    %c408 = arith.constant 408 : index
    %c0_185 = arith.constant 0 : index
    %382 = vector.load %arg8[%c408, %c0_185] : memref<440x128xf32, #tpu.memory_space<vmem>>, vector<24x128xf32>
    tpu.vector_store %arg8[%c408, %c0_185], %381 {strides = array<i32>} : memref<440x128xf32, #tpu.memory_space<vmem>>, vector<24x128xf32>,
    %cst_186 = arith.constant 0.000000e+00 : f32
    %383 = vector.broadcast %cst_186 : f32 to vector<8x128xf32>
    %c432 = arith.constant 432 : index
    %c0_187 = arith.constant 0 : index
    %384 = vector.load %arg8[%c432, %c0_187] : memref<440x128xf32, #tpu.memory_space<vmem>>, vector<8x128xf32>
    tpu.vector_store %arg8[%c432, %c0_187], %383 {strides = array<i32>} : memref<440x128xf32, #tpu.memory_space<vmem>>, vector<8x128xf32>,
    %cst_188 = arith.constant 0.000000e+00 : f32
    %385 = vector.broadcast %cst_188 : f32 to vector<384x128xf32>
    %c0_189 = arith.constant 0 : index
    %c0_190 = arith.constant 0 : index
    %386 = vector.load %arg8[%c0_189, %c0_190] : memref<440x128xf32, #tpu.memory_space<vmem>>, vector<392x128xf32>
    %387 = vector.extract_strided_slice %386 {offsets = [0, 0], sizes = [384, 128], strides = [1, 1]} : vector<392x128xf32> to vector<384x128xf32>
    %388 = arith.truncf %387 : vector<384x128xf32> to vector<384x128xbf16>
    %c0_191 = arith.constant 0 : index
    %c0_192 = arith.constant 0 : index
    %c0_193 = arith.constant 0 : index
    %c0_194 = arith.constant 0 : index
    %389 = vector.load %arg3[%c0_191, %c0_192, %c0_193, %c0_194] : memref<3x3x128x128xbf16, #tpu.memory_space<vmem>>, vector<1x1x128x128xbf16>
    %390 = vector.shape_cast %389 : vector<1x1x128x128xbf16> to vector<128x128xbf16>
    %cst_195 = arith.constant dense<0.000000e+00> : vector<384x128xf32>
    %391 = tpu.matmul %388, %390, %cst_195 {dimension_numbers = #tpu.dot_dimension_numbers<[1], [0], [0], [1], [0, 0, 1, 1], [], []>} : vector<384x128xbf16>, vector<128x128xbf16>, vector<384x128xf32> -> vector<384x128xf32>
    %392 = arith.addf %385, %391 : vector<384x128xf32>
    %393 = vector.extract_strided_slice %386 {offsets = [1, 0], sizes = [384, 128], strides = [1, 1]} : vector<392x128xf32> to vector<384x128xf32>
    %394 = arith.truncf %393 : vector<384x128xf32> to vector<384x128xbf16>
    %c0_196 = arith.constant 0 : index
    %c1 = arith.constant 1 : index
    %c0_197 = arith.constant 0 : index
    %c0_198 = arith.constant 0 : index
    %395 = vector.load %arg3[%c0_196, %c1, %c0_197, %c0_198] : memref<3x3x128x128xbf16, #tpu.memory_space<vmem>>, vector<1x1x128x128xbf16>
    %396 = vector.shape_cast %395 : vector<1x1x128x128xbf16> to vector<128x128xbf16>
    %cst_199 = arith.constant dense<0.000000e+00> : vector<384x128xf32>
    %397 = tpu.matmul %394, %396, %cst_199 {dimension_numbers = #tpu.dot_dimension_numbers<[1], [0], [0], [1], [0, 0, 1, 1], [], []>} : vector<384x128xbf16>, vector<128x128xbf16>, vector<384x128xf32> -> vector<384x128xf32>
    %398 = arith.addf %392, %397 : vector<384x128xf32>
    %399 = vector.extract_strided_slice %386 {offsets = [2, 0], sizes = [384, 128], strides = [1, 1]} : vector<392x128xf32> to vector<384x128xf32>
    %400 = arith.truncf %399 : vector<384x128xf32> to vector<384x128xbf16>
    %c0_200 = arith.constant 0 : index
    %c2 = arith.constant 2 : index
    %c0_201 = arith.constant 0 : index
    %c0_202 = arith.constant 0 : index
    %401 = vector.load %arg3[%c0_200, %c2, %c0_201, %c0_202] : memref<3x3x128x128xbf16, #tpu.memory_space<vmem>>, vector<1x1x128x128xbf16>
    %402 = vector.shape_cast %401 : vector<1x1x128x128xbf16> to vector<128x128xbf16>
    %cst_203 = arith.constant dense<0.000000e+00> : vector<384x128xf32>
    %403 = tpu.matmul %400, %402, %cst_203 {dimension_numbers = #tpu.dot_dimension_numbers<[1], [0], [0], [1], [0, 0, 1, 1], [], []>} : vector<384x128xbf16>, vector<128x128xbf16>, vector<384x128xf32> -> vector<384x128xf32>
    %404 = arith.addf %398, %403 : vector<384x128xf32>
    %c24_204 = arith.constant 24 : index
    %c0_205 = arith.constant 0 : index
    %405 = vector.load %arg8[%c24_204, %c0_205] : memref<440x128xf32, #tpu.memory_space<vmem>>, vector<392x128xf32>
    %406 = vector.extract_strided_slice %405 {offsets = [0, 0], sizes = [384, 128], strides = [1, 1]} : vector<392x128xf32> to vector<384x128xf32>
    %407 = arith.truncf %406 : vector<384x128xf32> to vector<384x128xbf16>
    %c1_206 = arith.constant 1 : index
    %c0_207 = arith.constant 0 : index
    %c0_208 = arith.constant 0 : index
    %c0_209 = arith.constant 0 : index
    %408 = vector.load %arg3[%c1_206, %c0_207, %c0_208, %c0_209] : memref<3x3x128x128xbf16, #tpu.memory_space<vmem>>, vector<1x1x128x128xbf16>
    %409 = vector.shape_cast %408 : vector<1x1x128x128xbf16> to vector<128x128xbf16>
    %cst_210 = arith.constant dense<0.000000e+00> : vector<384x128xf32>
    %410 = tpu.matmul %407, %409, %cst_210 {dimension_numbers = #tpu.dot_dimension_numbers<[1], [0], [0], [1], [0, 0, 1, 1], [], []>} : vector<384x128xbf16>, vector<128x128xbf16>, vector<384x128xf32> -> vector<384x128xf32>
    %411 = arith.addf %404, %410 : vector<384x128xf32>
    %412 = vector.extract_strided_slice %405 {offsets = [1, 0], sizes = [384, 128], strides = [1, 1]} : vector<392x128xf32> to vector<384x128xf32>
    %413 = arith.truncf %412 : vector<384x128xf32> to vector<384x128xbf16>
    %c1_211 = arith.constant 1 : index
    %c1_212 = arith.constant 1 : index
    %c0_213 = arith.constant 0 : index
    %c0_214 = arith.constant 0 : index
    %414 = vector.load %arg3[%c1_211, %c1_212, %c0_213, %c0_214] : memref<3x3x128x128xbf16, #tpu.memory_space<vmem>>, vector<1x1x128x128xbf16>
    %415 = vector.shape_cast %414 : vector<1x1x128x128xbf16> to vector<128x128xbf16>
    %cst_215 = arith.constant dense<0.000000e+00> : vector<384x128xf32>
    %416 = tpu.matmul %413, %415, %cst_215 {dimension_numbers = #tpu.dot_dimension_numbers<[1], [0], [0], [1], [0, 0, 1, 1], [], []>} : vector<384x128xbf16>, vector<128x128xbf16>, vector<384x128xf32> -> vector<384x128xf32>
    %417 = arith.addf %411, %416 : vector<384x128xf32>
    %418 = vector.extract_strided_slice %405 {offsets = [2, 0], sizes = [384, 128], strides = [1, 1]} : vector<392x128xf32> to vector<384x128xf32>
    %419 = arith.truncf %418 : vector<384x128xf32> to vector<384x128xbf16>
    %c1_216 = arith.constant 1 : index
    %c2_217 = arith.constant 2 : index
    %c0_218 = arith.constant 0 : index
    %c0_219 = arith.constant 0 : index
    %420 = vector.load %arg3[%c1_216, %c2_217, %c0_218, %c0_219] : memref<3x3x128x128xbf16, #tpu.memory_space<vmem>>, vector<1x1x128x128xbf16>
    %421 = vector.shape_cast %420 : vector<1x1x128x128xbf16> to vector<128x128xbf16>
    %cst_220 = arith.constant dense<0.000000e+00> : vector<384x128xf32>
    %422 = tpu.matmul %419, %421, %cst_220 {dimension_numbers = #tpu.dot_dimension_numbers<[1], [0], [0], [1], [0, 0, 1, 1], [], []>} : vector<384x128xbf16>, vector<128x128xbf16>, vector<384x128xf32> -> vector<384x128xf32>
    %423 = arith.addf %417, %422 : vector<384x128xf32>
    %c48_221 = arith.constant 48 : index
    %c0_222 = arith.constant 0 : index
    %424 = vector.load %arg8[%c48_221, %c0_222] : memref<440x128xf32, #tpu.memory_space<vmem>>, vector<392x128xf32>
    %425 = vector.extract_strided_slice %424 {offsets = [0, 0], sizes = [384, 128], strides = [1, 1]} : vector<392x128xf32> to vector<384x128xf32>
    %426 = arith.truncf %425 : vector<384x128xf32> to vector<384x128xbf16>
    %c2_223 = arith.constant 2 : index
    %c0_224 = arith.constant 0 : index
    %c0_225 = arith.constant 0 : index
    %c0_226 = arith.constant 0 : index
    %427 = vector.load %arg3[%c2_223, %c0_224, %c0_225, %c0_226] : memref<3x3x128x128xbf16, #tpu.memory_space<vmem>>, vector<1x1x128x128xbf16>
    %428 = vector.shape_cast %427 : vector<1x1x128x128xbf16> to vector<128x128xbf16>
    %cst_227 = arith.constant dense<0.000000e+00> : vector<384x128xf32>
    %429 = tpu.matmul %426, %428, %cst_227 {dimension_numbers = #tpu.dot_dimension_numbers<[1], [0], [0], [1], [0, 0, 1, 1], [], []>} : vector<384x128xbf16>, vector<128x128xbf16>, vector<384x128xf32> -> vector<384x128xf32>
    %430 = arith.addf %423, %429 : vector<384x128xf32>
    %431 = vector.extract_strided_slice %424 {offsets = [1, 0], sizes = [384, 128], strides = [1, 1]} : vector<392x128xf32> to vector<384x128xf32>
    %432 = arith.truncf %431 : vector<384x128xf32> to vector<384x128xbf16>
    %c2_228 = arith.constant 2 : index
    %c1_229 = arith.constant 1 : index
    %c0_230 = arith.constant 0 : index
    %c0_231 = arith.constant 0 : index
    %433 = vector.load %arg3[%c2_228, %c1_229, %c0_230, %c0_231] : memref<3x3x128x128xbf16, #tpu.memory_space<vmem>>, vector<1x1x128x128xbf16>
    %434 = vector.shape_cast %433 : vector<1x1x128x128xbf16> to vector<128x128xbf16>
    %cst_232 = arith.constant dense<0.000000e+00> : vector<384x128xf32>
    %435 = tpu.matmul %432, %434, %cst_232 {dimension_numbers = #tpu.dot_dimension_numbers<[1], [0], [0], [1], [0, 0, 1, 1], [], []>} : vector<384x128xbf16>, vector<128x128xbf16>, vector<384x128xf32> -> vector<384x128xf32>
    %436 = arith.addf %430, %435 : vector<384x128xf32>
    %437 = vector.extract_strided_slice %424 {offsets = [2, 0], sizes = [384, 128], strides = [1, 1]} : vector<392x128xf32> to vector<384x128xf32>
    %438 = arith.truncf %437 : vector<384x128xf32> to vector<384x128xbf16>
    %c2_233 = arith.constant 2 : index
    %c2_234 = arith.constant 2 : index
    %c0_235 = arith.constant 0 : index
    %c0_236 = arith.constant 0 : index
    %439 = vector.load %arg3[%c2_233, %c2_234, %c0_235, %c0_236] : memref<3x3x128x128xbf16, #tpu.memory_space<vmem>>, vector<1x1x128x128xbf16>
    %440 = vector.shape_cast %439 : vector<1x1x128x128xbf16> to vector<128x128xbf16>
    %cst_237 = arith.constant dense<0.000000e+00> : vector<384x128xf32>
    %441 = tpu.matmul %438, %440, %cst_237 {dimension_numbers = #tpu.dot_dimension_numbers<[1], [0], [0], [1], [0, 0, 1, 1], [], []>} : vector<384x128xbf16>, vector<128x128xbf16>, vector<384x128xf32> -> vector<384x128xf32>
    %442 = arith.addf %436, %441 : vector<384x128xf32>
    %443 = vector.shape_cast %442 : vector<384x128xf32> to vector<16x24x128xf32>
    %444 = vector.extract_strided_slice %443 {offsets = [0, 0, 0], sizes = [16, 16, 128], strides = [1, 1, 1]} : vector<16x24x128xf32> to vector<16x16x128xf32>
    %445 = arith.truncf %444 : vector<16x16x128xf32> to vector<16x16x128xbf16>
    %c0_238 = arith.constant 0 : index
    %c0_239 = arith.constant 0 : index
    %c0_240 = arith.constant 0 : index
    %c0_241 = arith.constant 0 : index
    %446 = vector.load %arg6[%c0_238, %c0_239, %c0_240, %c0_241] : memref<1x16x16x128xbf16, #tpu.memory_space<vmem>>, vector<1x16x16x128xbf16>
    %447 = vector.shape_cast %446 : vector<1x16x16x128xbf16> to vector<16x16x128xbf16>
    %448 = vector.shape_cast %445 : vector<16x16x128xbf16> to vector<1x16x16x128xbf16>
    tpu.vector_store %arg6[%c0_238, %c0_239, %c0_240, %c0_241], %448 {strides = array<i32>} : memref<1x16x16x128xbf16, #tpu.memory_space<vmem>>, vector<1x16x16x128xbf16>,
    %cst_242 = arith.constant dense<0.000000e+00> : vector<128xf32>
    %449 = vector.multi_reduction <add>, %444, %cst_242 [0, 1] : vector<16x16x128xf32> to vector<128xf32>
    %450 = vector.shape_cast %449 : vector<128xf32> to vector<1x128xf32>
    %451 = arith.mulf %444, %444 : vector<16x16x128xf32>
    %cst_243 = arith.constant dense<0.000000e+00> : vector<128xf32>
    %452 = vector.multi_reduction <add>, %451, %cst_243 [0, 1] : vector<16x16x128xf32> to vector<128xf32>
    %453 = vector.shape_cast %452 : vector<128xf32> to vector<1x128xf32>
    %cst_244 = arith.constant 0.000000e+00 : f32
    %454 = vector.broadcast %cst_244 : f32 to vector<6x128xf32>
    %455 = tpu.concatenate %450, %453, %454 in 0 : vector<1x128xf32>, vector<1x128xf32>, vector<6x128xf32> -> vector<8x128xf32>
    %c0_245 = arith.constant 0 : index
    %c0_246 = arith.constant 0 : index
    %c0_247 = arith.constant 0 : index
    %c0_248 = arith.constant 0 : index
    %456 = vector.load %arg7[%c0_245, %c0_246, %c0_247, %c0_248] : memref<1x1x8x128xf32, #tpu.memory_space<vmem>>, vector<1x1x8x128xf32>
    %457 = vector.shape_cast %456 : vector<1x1x8x128xf32> to vector<8x128xf32>
    %458 = vector.shape_cast %455 : vector<8x128xf32> to vector<1x1x8x128xf32>
    tpu.vector_store %arg7[%c0_245, %c0_246, %c0_247, %c0_248], %458 {strides = array<i32>} : memref<1x1x8x128xf32, #tpu.memory_space<vmem>>, vector<1x1x8x128xf32>,
    return
  }
  func.func @transform_0(%arg0: i32, %arg1: i32) -> (i32, i32, i32, i32) {
    %c0_i32 = arith.constant 0 : i32
    %c0_i32_0 = arith.constant 0 : i32
    %c0_i32_1 = arith.constant 0 : i32
    %c0_i32_2 = arith.constant 0 : i32
    return %arg0, %c0_i32, %c0_i32_0, %c0_i32_1 : i32, i32, i32, i32
  }
  func.func @transform_1(%arg0: i32, %arg1: i32) -> (i32, i32, i32, i32) {
    %c0_i32 = arith.constant 0 : i32
    %c0_i32_0 = arith.constant 0 : i32
    %c0_i32_1 = arith.constant 0 : i32
    %c0_i32_2 = arith.constant 0 : i32
    %c0_i32_3 = arith.constant 0 : i32
    return %c0_i32, %c0_i32_0, %c0_i32_1, %c0_i32_2 : i32, i32, i32, i32
  }
  func.func @transform_2(%arg0: i32, %arg1: i32) -> (i32, i32) {
    %c0_i32 = arith.constant 0 : i32
    %c0_i32_0 = arith.constant 0 : i32
    %c0_i32_1 = arith.constant 0 : i32
    return %c0_i32, %c0_i32_0 : i32, i32
  }
  func.func @transform_3(%arg0: i32, %arg1: i32) -> (i32, i32) {
    %c0_i32 = arith.constant 0 : i32
    %c0_i32_0 = arith.constant 0 : i32
    %c0_i32_1 = arith.constant 0 : i32
    return %c0_i32, %c0_i32_0 : i32, i32
  }
  func.func @transform_4(%arg0: i32, %arg1: i32) -> (i32, i32, i32, i32) {
    %c0_i32 = arith.constant 0 : i32
    %c0_i32_0 = arith.constant 0 : i32
    %c0_i32_1 = arith.constant 0 : i32
    return %arg0, %arg1, %c0_i32, %c0_i32_0 : i32, i32, i32, i32
  }
  func.func @transform_5(%arg0: i32, %arg1: i32) -> (i32, i32, i32, i32) {
    %c0_i32 = arith.constant 0 : i32
    %c0_i32_0 = arith.constant 0 : i32
    %c0_i32_1 = arith.constant 0 : i32
    return %arg0, %arg1, %c0_i32, %c0_i32_0 : i32, i32, i32, i32
  }
}

module attributes {stable_mosaic.version = 11 : i64} {
  func.func @_mm_kernel(%arg0: i32, %arg1: memref<256x128xbf16, #tpu.memory_space<vmem>>, %arg2: memref<128x128xbf16, #tpu.memory_space<vmem>>, %arg3: memref<1x128xf32, #tpu.memory_space<vmem>>, %arg4: memref<1x128xf32, #tpu.memory_space<vmem>>, %arg5: memref<256x128xbf16, #tpu.memory_space<vmem>>, %arg6: memref<1x8x128xf32, #tpu.memory_space<vmem>>) attributes {dimension_semantics = [#tpu.dimension_semantics<parallel>], iteration_bounds = array<i64: 2>, scalar_prefetch = 0 : i64, scratch_operands = 0 : i64, tpu.core_type = #tpu.core_type<tc>, window_params = [{transform_indices = @transform_0, window_bounds = array<i64: 256, 128>}, {pipeline_mode = #tpu.pipeline_mode<synchronous>, transform_indices = @transform_1, window_bounds = array<i64: 128, 128>}, {pipeline_mode = #tpu.pipeline_mode<synchronous>, transform_indices = @transform_2, window_bounds = array<i64: 1, 128>}, {pipeline_mode = #tpu.pipeline_mode<synchronous>, transform_indices = @transform_3, window_bounds = array<i64: 1, 128>}, {transform_indices = @transform_4, window_bounds = array<i64: 256, 128>}, {transform_indices = @transform_5, window_bounds = array<i64: 1, 8, 128>}]} {
    %c0 = arith.constant 0 : index
    %c0_0 = arith.constant 0 : index
    %0 = vector.load %arg1[%c0, %c0_0] : memref<256x128xbf16, #tpu.memory_space<vmem>>, vector<256x128xbf16>
    %1 = arith.extf %0 : vector<256x128xbf16> to vector<256x128xf32>
    %c0_1 = arith.constant 0 : index
    %c0_2 = arith.constant 0 : index
    %2 = vector.load %arg3[%c0_1, %c0_2] : memref<1x128xf32, #tpu.memory_space<vmem>>, vector<1x128xf32>
    %3 = vector.broadcast %2 : vector<1x128xf32> to vector<256x128xf32>
    %4 = arith.mulf %1, %3 : vector<256x128xf32>
    %c0_3 = arith.constant 0 : index
    %c0_4 = arith.constant 0 : index
    %5 = vector.load %arg4[%c0_3, %c0_4] : memref<1x128xf32, #tpu.memory_space<vmem>>, vector<1x128xf32>
    %6 = vector.broadcast %5 : vector<1x128xf32> to vector<256x128xf32>
    %7 = arith.addf %4, %6 : vector<256x128xf32>
    %cst = arith.constant 0.000000e+00 : f32
    %8 = vector.broadcast %cst : f32 to vector<256x128xf32>
    %9 = arith.maximumf %7, %8 : vector<256x128xf32>
    %10 = arith.truncf %9 : vector<256x128xf32> to vector<256x128xbf16>
    %c0_5 = arith.constant 0 : index
    %c0_6 = arith.constant 0 : index
    %11 = vector.load %arg2[%c0_5, %c0_6] : memref<128x128xbf16, #tpu.memory_space<vmem>>, vector<128x128xbf16>
    %cst_7 = arith.constant dense<0.000000e+00> : vector<256x128xf32>
    %12 = tpu.matmul %10, %11, %cst_7 {dimension_numbers = #tpu.dot_dimension_numbers<[1], [0], [0], [1], [0, 0, 1, 1], [], []>} : vector<256x128xbf16>, vector<128x128xbf16>, vector<256x128xf32> -> vector<256x128xf32>
    %13 = arith.truncf %12 : vector<256x128xf32> to vector<256x128xbf16>
    %c0_8 = arith.constant 0 : index
    %c0_9 = arith.constant 0 : index
    %14 = vector.load %arg5[%c0_8, %c0_9] : memref<256x128xbf16, #tpu.memory_space<vmem>>, vector<256x128xbf16>
    tpu.vector_store %arg5[%c0_8, %c0_9], %13 {strides = array<i32>} : memref<256x128xbf16, #tpu.memory_space<vmem>>, vector<256x128xbf16>,
    %cst_10 = arith.constant dense<0.000000e+00> : vector<128xf32>
    %15 = vector.multi_reduction <add>, %12, %cst_10 [0] : vector<256x128xf32> to vector<128xf32>
    %16 = vector.shape_cast %15 : vector<128xf32> to vector<1x128xf32>
    %17 = arith.mulf %12, %12 : vector<256x128xf32>
    %cst_11 = arith.constant dense<0.000000e+00> : vector<128xf32>
    %18 = vector.multi_reduction <add>, %17, %cst_11 [0] : vector<256x128xf32> to vector<128xf32>
    %19 = vector.shape_cast %18 : vector<128xf32> to vector<1x128xf32>
    %cst_12 = arith.constant 0.000000e+00 : f32
    %20 = vector.broadcast %cst_12 : f32 to vector<6x128xf32>
    %21 = tpu.concatenate %16, %19, %20 in 0 : vector<1x128xf32>, vector<1x128xf32>, vector<6x128xf32> -> vector<8x128xf32>
    %c0_13 = arith.constant 0 : index
    %c0_14 = arith.constant 0 : index
    %c0_15 = arith.constant 0 : index
    %22 = vector.load %arg6[%c0_13, %c0_14, %c0_15] : memref<1x8x128xf32, #tpu.memory_space<vmem>>, vector<1x8x128xf32>
    %23 = vector.shape_cast %22 : vector<1x8x128xf32> to vector<8x128xf32>
    %24 = vector.shape_cast %21 : vector<8x128xf32> to vector<1x8x128xf32>
    tpu.vector_store %arg6[%c0_13, %c0_14, %c0_15], %24 {strides = array<i32>} : memref<1x8x128xf32, #tpu.memory_space<vmem>>, vector<1x8x128xf32>,
    return
  }
  func.func @transform_0(%arg0: i32) -> (i32, i32) {
    %c0_i32 = arith.constant 0 : i32
    %c0_i32_0 = arith.constant 0 : i32
    return %arg0, %c0_i32 : i32, i32
  }
  func.func @transform_1(%arg0: i32) -> (i32, i32) {
    %c0_i32 = arith.constant 0 : i32
    %c0_i32_0 = arith.constant 0 : i32
    %c0_i32_1 = arith.constant 0 : i32
    return %c0_i32, %c0_i32_0 : i32, i32
  }
  func.func @transform_2(%arg0: i32) -> (i32, i32) {
    %c0_i32 = arith.constant 0 : i32
    %c0_i32_0 = arith.constant 0 : i32
    %c0_i32_1 = arith.constant 0 : i32
    return %c0_i32, %c0_i32_0 : i32, i32
  }
  func.func @transform_3(%arg0: i32) -> (i32, i32) {
    %c0_i32 = arith.constant 0 : i32
    %c0_i32_0 = arith.constant 0 : i32
    %c0_i32_1 = arith.constant 0 : i32
    return %c0_i32, %c0_i32_0 : i32, i32
  }
  func.func @transform_4(%arg0: i32) -> (i32, i32) {
    %c0_i32 = arith.constant 0 : i32
    %c0_i32_0 = arith.constant 0 : i32
    return %arg0, %c0_i32 : i32, i32
  }
  func.func @transform_5(%arg0: i32) -> (i32, i32, i32) {
    %c0_i32 = arith.constant 0 : i32
    %c0_i32_0 = arith.constant 0 : i32
    %c0_i32_1 = arith.constant 0 : i32
    return %arg0, %c0_i32, %c0_i32_0 : i32, i32, i32
  }
}

module attributes {stable_mosaic.version = 11 : i64} {
  func.func @_bn_add_relu_kernel(%arg0: i32, %arg1: memref<256x128xbf16, #tpu.memory_space<vmem>>, %arg2: memref<256x128xbf16, #tpu.memory_space<vmem>>, %arg3: memref<1x128xf32, #tpu.memory_space<vmem>>, %arg4: memref<1x128xf32, #tpu.memory_space<vmem>>, %arg5: memref<256x128xbf16, #tpu.memory_space<vmem>>) attributes {dimension_semantics = [#tpu.dimension_semantics<parallel>], iteration_bounds = array<i64: 2>, scalar_prefetch = 0 : i64, scratch_operands = 0 : i64, tpu.core_type = #tpu.core_type<tc>, window_params = [{transform_indices = @transform_0, window_bounds = array<i64: 256, 128>}, {transform_indices = @transform_1, window_bounds = array<i64: 256, 128>}, {pipeline_mode = #tpu.pipeline_mode<synchronous>, transform_indices = @transform_2, window_bounds = array<i64: 1, 128>}, {pipeline_mode = #tpu.pipeline_mode<synchronous>, transform_indices = @transform_3, window_bounds = array<i64: 1, 128>}, {transform_indices = @transform_4, window_bounds = array<i64: 256, 128>}]} {
    %c0 = arith.constant 0 : index
    %c0_0 = arith.constant 0 : index
    %0 = vector.load %arg1[%c0, %c0_0] : memref<256x128xbf16, #tpu.memory_space<vmem>>, vector<256x128xbf16>
    %1 = arith.extf %0 : vector<256x128xbf16> to vector<256x128xf32>
    %c0_1 = arith.constant 0 : index
    %c0_2 = arith.constant 0 : index
    %2 = vector.load %arg2[%c0_1, %c0_2] : memref<256x128xbf16, #tpu.memory_space<vmem>>, vector<256x128xbf16>
    %3 = arith.extf %2 : vector<256x128xbf16> to vector<256x128xf32>
    %c0_3 = arith.constant 0 : index
    %c0_4 = arith.constant 0 : index
    %4 = vector.load %arg3[%c0_3, %c0_4] : memref<1x128xf32, #tpu.memory_space<vmem>>, vector<1x128xf32>
    %5 = vector.broadcast %4 : vector<1x128xf32> to vector<256x128xf32>
    %6 = arith.mulf %1, %5 : vector<256x128xf32>
    %c0_5 = arith.constant 0 : index
    %c0_6 = arith.constant 0 : index
    %7 = vector.load %arg4[%c0_5, %c0_6] : memref<1x128xf32, #tpu.memory_space<vmem>>, vector<1x128xf32>
    %8 = vector.broadcast %7 : vector<1x128xf32> to vector<256x128xf32>
    %9 = arith.addf %6, %8 : vector<256x128xf32>
    %cst = arith.constant 0.000000e+00 : f32
    %10 = vector.broadcast %cst : f32 to vector<256x128xf32>
    %11 = arith.maximumf %9, %10 : vector<256x128xf32>
    %12 = arith.addf %11, %3 : vector<256x128xf32>
    %cst_7 = arith.constant 0.000000e+00 : f32
    %13 = vector.broadcast %cst_7 : f32 to vector<256x128xf32>
    %14 = arith.maximumf %12, %13 : vector<256x128xf32>
    %15 = arith.truncf %14 : vector<256x128xf32> to vector<256x128xbf16>
    %c0_8 = arith.constant 0 : index
    %c0_9 = arith.constant 0 : index
    %16 = vector.load %arg5[%c0_8, %c0_9] : memref<256x128xbf16, #tpu.memory_space<vmem>>, vector<256x128xbf16>
    tpu.vector_store %arg5[%c0_8, %c0_9], %15 {strides = array<i32>} : memref<256x128xbf16, #tpu.memory_space<vmem>>, vector<256x128xbf16>,
    return
  }
  func.func @transform_0(%arg0: i32) -> (i32, i32) {
    %c0_i32 = arith.constant 0 : i32
    %c0_i32_0 = arith.constant 0 : i32
    return %arg0, %c0_i32 : i32, i32
  }
  func.func @transform_1(%arg0: i32) -> (i32, i32) {
    %c0_i32 = arith.constant 0 : i32
    %c0_i32_0 = arith.constant 0 : i32
    return %arg0, %c0_i32 : i32, i32
  }
  func.func @transform_2(%arg0: i32) -> (i32, i32) {
    %c0_i32 = arith.constant 0 : i32
    %c0_i32_0 = arith.constant 0 : i32
    %c0_i32_1 = arith.constant 0 : i32
    return %c0_i32, %c0_i32_0 : i32, i32
  }
  func.func @transform_3(%arg0: i32) -> (i32, i32) {
    %c0_i32 = arith.constant 0 : i32
    %c0_i32_0 = arith.constant 0 : i32
    %c0_i32_1 = arith.constant 0 : i32
    return %c0_i32, %c0_i32_0 : i32, i32
  }
  func.func @transform_4(%arg0: i32) -> (i32, i32) {
    %c0_i32 = arith.constant 0 : i32
    %c0_i32_0 = arith.constant 0 : i32
    return %arg0, %c0_i32 : i32, i32
  }
}

</mosaic_0001>

<bundles_post_ra>
// kernel: bottleneck_forward.4
= control target key start
LH: loop header
LB: loop body
LE: loop exit
PB: predicated region body
PF: predicated region fallthrough
CT: control target
= control target key end

     0   :  { %s1240_s12 = smov 0   ;;  %s1416_s0 = inlined_call_operand.vmem [shape: bf16[512,128], index: 0, kind: input, shape index: {}]   ;;  %s1417_s1 = inlined_call_operand.vmem [shape: bf16[128,128], index: 1, kind: input, shape index: {}]   ;;  %s1418_s2 = inlined_call_operand.vmem [shape: bf16[512,128], index: 2, kind: output, shape index: {0}]   ;;  %s1419_s3 = inlined_call_operand.vmem [shape: f32[2,8,128], index: 3, kind: output, shape index: {1}]  }
   0x1 LB: > { %s1246_s13 = sadd.s32 4294967295, %s1218_s12   ;;  %p901_p0 = scmp.ge.s32.totalorder %s1218_s12, 1  ;;  %s1218_s12 = sphi %s1240_s12, %s14_s12  }
   0x2   : > { %p141_p1 = scmp.lt.s32.totalorder %s1218_s12, 3 }
   0x4   : > { %p142_p2 = pnand %p901_p0, %p141_p1 }
   0x5   : > { %v1188_v0 = vld [vmem:[%s1417_s1] sm:$0xff] (!%p142_p2)   ;;  %s902_s16 = sshll.u32 (!%p142_p2), %s1246_s13, 5  ;;  %v1189_v1 = vld [vmem:[%s1417_s1 + $0x8] sm:$0xff] (!%p142_p2)   ;;  %v1190_v2 = vld [vmem:[%s1417_s1 + $0x10] sm:$0xff] (!%p142_p2)   ;;  %p181_p4 = scmp.lt.s32.totalorder (!%p142_p2), %s1246_s13, 1  ;;  %vm805_vm0 = vcmask (!%p142_p2), 1040384  }
   0x6   : > { %145 = sbr.rel (%p142_p2) target bundleno = 332 (0x14c), region = 28  ;;  %p170_p3 = scmp.lt.s32.totalorder (!%p142_p2), %s902_s16, 63  ;;  %1116 = vmatprep.subr.bf16.mxu0 (!%p142_p2), %v1188_v0  ;;  %1164 = vmatprep.subr.bf16.mxu1 (!%p142_p2), %v1188_v0  ;;  %v1191_v3 = vld [vmem:[%s1417_s1 + $0x18] sm:$0xff] (!%p142_p2)   ;;  %v1192_v5 = vld [vmem:[%s1417_s1 + $0x20] sm:$0xff] (!%p142_p2)   ;;  %v1193_v6 = vld [vmem:[%s1417_s1 + $0x28] sm:$0xff] (!%p142_p2)   ;;  %vm807_vm1 = vcmask (!%p142_p2), 1041408  }
   0x7   : > { %1117 = vmatpush3.bf16.msra.mxu0 (!%p142_p2), %v1188_v0  ;;  %1172 = vmatpush3.bf16.msra.mxu1 (!%p142_p2), %v1188_v0  ;;  %v1194_v8 = vld [vmem:[%s1417_s1 + $0x30] sm:$0xff] (!%p142_p2)   ;;  %v1195_v9 = vld [vmem:[%s1417_s1 + $0x38] sm:$0xff] (!%p142_p2)  }
   0x8   : > { %1118 = vmatprep.subr.bf16.mxu0 (!%p142_p2), %v1189_v1  ;;  %1165 = vmatprep.subr.bf16.mxu1 (!%p142_p2), %v1189_v1 }
   0xb   : > { %1119 = vmatpush3.bf16.msra.mxu0 (!%p142_p2), %v1189_v1  ;;  %1173 = vmatpush3.bf16.msra.mxu1 (!%p142_p2), %v1189_v1 }
   0xc   : > { %1120 = vmatprep.subr.bf16.mxu0 (!%p142_p2), %v1190_v2  ;;  %1166 = vmatprep.subr.bf16.mxu1 (!%p142_p2), %v1190_v2 }
   0xd   : > { %s1421_s16 = smov (!%p170_p3, %s902_s16), 63  ;;  %s1423_s13 = smov (!%p181_p4, %s1246_s13), 1 }
   0xe   : > { %s903_s21 = sshll.u32 %s1421_s16, 2  ;;  %s906_s11 = sshll.u32 %s1423_s13, 3 }
   0xf   : > { %s1268_s24 = scalar_lea.vmem %s1416_s0, %s903_s21  ;;  %1121 = vmatpush3.bf16.msra.mxu0 %v1190_v2  ;;  %1174 = vmatpush3.bf16.msra.mxu1 %v1190_v2  ;;  %s1310_s10 = scalar_lea.vmem %s1418_s2, %s903_s21 }
  0x10   : > { %v1196_v4 = vld [vmem:[%s1268_s24] sm:$0xff]   ;;  %1122 = vmatprep.subr.bf16.mxu0 %v1191_v3  ;;  %1167 = vmatprep.subr.bf16.mxu1 %v1191_v3  ;;  %v1197_v10 = vld [vmem:[%s1268_s24 + $0x8] sm:$0xff]   ;;  %v1198_v12 = vld [vmem:[%s1268_s24 + $0x10] sm:$0xff]   ;;  %s184_s16 = scalar_lea.vmem %s1419_s3, %s906_s11 }
  0x11   : > { %1132 = vmatprep.mubr.bf16.mxu0 %v1196_v4  ;;  %v1204_v7 = vld [vmem:[%s1268_s24 + $0x40] sm:$0xff]   ;;  %v1205_v11 = vld [vmem:[%s1268_s24 + $0x48] sm:$0xff]   ;;  %v1206_v13 = vld [vmem:[%s1268_s24 + $0x50] sm:$0xff]  }
  0x12   : > { %1148 = vmatprep.mubr.bf16.mxu1 %v1204_v7  ;;  %v1199_v14 = vld [vmem:[%s1268_s24 + $0x18] sm:$0xff]   ;;  %v1200_v16 = vld [vmem:[%s1268_s24 + $0x20] sm:$0xff]   ;;  %v1201_v18 = vld [vmem:[%s1268_s24 + $0x28] sm:$0xff]  }
  0x13   : > { %1123 = vmatpush3.bf16.msra.mxu0 %v1191_v3  ;;  %1175 = vmatpush3.bf16.msra.mxu1 %v1191_v3  ;;  %v1207_v15 = vld [vmem:[%s1268_s24 + $0x58] sm:$0xff]   ;;  %v1208_v17 = vld [vmem:[%s1268_s24 + $0x60] sm:$0xff]   ;;  %v1209_v19 = vld [vmem:[%s1268_s24 + $0x68] sm:$0xff]  }
  0x14   : > { %1124 = vmatprep.subr.bf16.mxu0 %v1192_v5  ;;  %1168 = vmatprep.subr.bf16.mxu1 %v1192_v5  ;;  %v1202_v20 = vld [vmem:[%s1268_s24 + $0x30] sm:$0xff]   ;;  %v1203_v22 = vld [vmem:[%s1268_s24 + $0x38] sm:$0xff]  }
  0x15   : > { %v1210_v21 = vld [vmem:[%s1268_s24 + $0x70] sm:$0xff]   ;;  %v1211_v23 = vld [vmem:[%s1268_s24 + $0x78] sm:$0xff]  }
  0x17   : > { %1125 = vmatpush3.bf16.msra.mxu0 %v1192_v5  ;;  %1176 = vmatpush3.bf16.msra.mxu1 %v1192_v5 }
  0x18   : > { %1126 = vmatprep.subr.bf16.mxu0 %v1193_v6  ;;  %1169 = vmatprep.subr.bf16.mxu1 %v1193_v6 }
  0x1b   : > { %1127 = vmatpush3.bf16.msra.mxu0 %v1193_v6  ;;  %1177 = vmatpush3.bf16.msra.mxu1 %v1193_v6 }
  0x1c   : > { %1128 = vmatprep.subr.bf16.mxu0 %v1194_v8  ;;  %1170 = vmatprep.subr.bf16.mxu1 %v1194_v8 }
  0x1f   : > { %1129 = vmatpush3.bf16.msra.mxu0 %v1194_v8  ;;  %1178 = vmatpush3.bf16.msra.mxu1 %v1194_v8 }
  0x20   : > { %1130 = vmatprep.subr.bf16.mxu0 %v1195_v9  ;;  %1171 = vmatprep.subr.bf16.mxu1 %v1195_v9 }
  0x23   : > { %1131 = vmatpush3.bf16.msra.mxu0 %v1195_v9  ;;  %1179 = vmatpush3.bf16.msra.mxu1 %v1195_v9 }
  0x26   : > { %1133 = vmatmul.mubr.bf16.vlgmr.msra.gmra.mrb[0].mxu0 %v1197_v10  ;;  %1149 = vmatmul.mubr.bf16.vlgmr.msra.gmra.mrb[0].mxu1 %v1205_v11 }
  0x27   : > { %1136 = vmatprep.mubr.bf16.mxu0 %v1198_v12  ;;  %1152 = vmatprep.mubr.bf16.mxu1 %v1206_v13 }
  0x2e   : > { %1137 = vmatmul.mubr.bf16.gmra.mrb[4].mxu0 %v1199_v14  ;;  %1153 = vmatmul.mubr.bf16.gmra.mrb[4].mxu1 %v1207_v15 }
  0x2f   : > { %1140 = vmatprep.mubr.bf16.mxu0 %v1200_v16  ;;  %1156 = vmatprep.mubr.bf16.mxu1 %v1208_v17 }
  0x36   : > { %1141 = vmatmul.mubr.bf16.gmra.mrb[8].mxu0 %v1201_v18  ;;  %1157 = vmatmul.mubr.bf16.gmra.mrb[8].mxu1 %v1209_v19 }
  0x37   : > { %1144 = vmatprep.mubr.bf16.mxu0 %v1202_v20  ;;  %1160 = vmatprep.mubr.bf16.mxu1 %v1210_v21 }
  0x3e   : > { %1145 = vmatmul.mubr.bf16.gmra.mrb[12].mxu0 %v1203_v22  ;;  %1161 = vmatmul.mubr.bf16.gmra.mrb[12].mxu1 %v1211_v23 }
  0xf9   : > { %v1134_v24 = vpop.f32.mrb[0].mxu0  ;;  %v1301_v25 = vpop.f32.mrb[0].mxu1 }
  0xfa   : > { %v412_v26 = vpop.f32.mrb[1].mxu0  ;;  %v1303_v27 = vpop.f32.mrb[1].mxu1  ;;  %v738_v39 = vmul.f32 %v1134_v24, %v1134_v24 }
  0xfb   : > { %v1135_v28 = vpop.f32.mrb[2].mxu0  ;;  %v1312_v29 = vpop.f32.mrb[2].mxu1  ;;  %v736_v30 = vmul.f32 %v412_v26, %v412_v26 }
  0xfc   : > { %v1005_v31 = vpack.c.bf16 %v1135_v28, %v1134_v24  ;;  %v415_v32 = vpop.f32.mrb[3].mxu0  ;;  %v1045_v33 = vpack.c.bf16 %v1312_v29, %v1301_v25  ;;  %v1316_v34 = vpop.f32.mrb[3].mxu1  ;;  %v739_v42 = vmul.f32 %v1135_v28, %v1135_v28 }
  0xfd   : > { %v1000_v35 = vpack.c.bf16 %v415_v32, %v412_v26  ;;  %v699_v36 = vadd.f32 %v415_v32, %v412_v26  ;;  %v737_v37 = vmul.f32 %v415_v32, %v415_v32  ;;  %v1040_v38 = vpack.c.bf16 %v1316_v34, %v1303_v27 }
  0xfe   : > { %1077 = vst [vmem:[%s1310_s10 + $0x8] sm:$0xff] %v1005_v31   ;;  %1085 = vst [vmem:[%s1310_s10 + $0x48] sm:$0xff] %v1045_v33  }
  0xff   : > { %1001 = vst [vmem:[%s1310_s10] sm:$0xff] %v1000_v35   ;;  %v700_v40 = vadd.f32 %v1134_v24, %v699_v36  ;;  %v768_v41 = vadd.f32 %v737_v37, %v736_v30  ;;  %1084 = vst [vmem:[%s1310_s10 + $0x40] sm:$0xff] %v1040_v38  }
 0x101   : > { %v769_v43 = vadd.f32 %v768_v41, %v738_v39  ;;  %v1138_v44 = vpop.f32.mrb[4].mxu0  ;;  %v701_v45 = vadd.f32 %v1135_v28, %v700_v40  ;;  %v1324_v46 = vpop.f32.mrb[4].mxu1 }
 0x102   : > { %v428_v47 = vpop.f32.mrb[5].mxu0  ;;  %v1326_v48 = vpop.f32.mrb[5].mxu1  ;;  %v742_v63 = vmul.f32 %v1138_v44, %v1138_v44 }
 0x103   : > { %v702_v49 = vadd.f32 %v701_v45, %v428_v47  ;;  %v740_v50 = vmul.f32 %v428_v47, %v428_v47  ;;  %v770_v51 = vadd.f32 %v769_v43, %v739_v42  ;;  %v1139_v52 = vpop.f32.mrb[6].mxu0  ;;  %v1328_v53 = vpop.f32.mrb[6].mxu1 }
 0x104   : > { %v1015_v54 = vpack.c.bf16 %v1139_v52, %v1138_v44  ;;  %v431_v55 = vpop.f32.mrb[7].mxu0  ;;  %v1055_v56 = vpack.c.bf16 %v1328_v53, %v1324_v46  ;;  %v1332_v57 = vpop.f32.mrb[7].mxu1  ;;  %v743_v2 = vmul.f32 %v1139_v52, %v1139_v52 }
 0x105   : > { %v771_v58 = vadd.f32 %v770_v51, %v740_v50  ;;  %v1010_v59 = vpack.c.bf16 %v431_v55, %v428_v47  ;;  %v703_v60 = vadd.f32 %v702_v49, %v431_v55  ;;  %v741_v61 = vmul.f32 %v431_v55, %v431_v55 }
 0x106   : > { %1079 = vst [vmem:[%s1310_s10 + $0x18] sm:$0xff] %v1015_v54   ;;  %1087 = vst [vmem:[%s1310_s10 + $0x58] sm:$0xff] %v1055_v56   ;;  %v1050_v62 = vpack.c.bf16 %v1332_v57, %v1326_v48 }
 0x107   : > { %1078 = vst [vmem:[%s1310_s10 + $0x10] sm:$0xff] %v1010_v59   ;;  %v704_v0 = vadd.f32 %v1138_v44, %v703_v60  ;;  %v772_v1 = vadd.f32 %v771_v58, %v741_v61  ;;  %v752_v61 = vmul.f32 %v1303_v27, %v1303_v27 }
 0x108   : > { %1086 = vst [vmem:[%s1310_s10 + $0x50] sm:$0xff] %v1050_v62  }
 0x109   : > { %v773_v3 = vadd.f32 %v772_v1, %v742_v63  ;;  %v1142_v4 = vpop.f32.mrb[8].mxu0  ;;  %v705_v5 = vadd.f32 %v1139_v52, %v704_v0  ;;  %v1340_v6 = vpop.f32.mrb[8].mxu1 }
 0x10a   : > { %v444_v7 = vpop.f32.mrb[9].mxu0  ;;  %v1342_v8 = vpop.f32.mrb[9].mxu1  ;;  %v746_v23 = vmul.f32 %v1142_v4, %v1142_v4 }
 0x10b   : > { %v706_v9 = vadd.f32 %v705_v5, %v444_v7  ;;  %v744_v10 = vmul.f32 %v444_v7, %v444_v7  ;;  %v774_v11 = vadd.f32 %v773_v3, %v743_v2  ;;  %v1143_v12 = vpop.f32.mrb[10].mxu0  ;;  %v1344_v13 = vpop.f32.mrb[10].mxu1  ;;  %v753_v2 = vmul.f32 %v1316_v34, %v1316_v34 }
 0x10c   : > { %v1025_v14 = vpack.c.bf16 %v1143_v12, %v1142_v4  ;;  %v447_v15 = vpop.f32.mrb[11].mxu0  ;;  %v1065_v16 = vpack.c.bf16 %v1344_v13, %v1340_v6  ;;  %v1348_v17 = vpop.f32.mrb[11].mxu1  ;;  %v747_v28 = vmul.f32 %v1143_v12, %v1143_v12  ;;  %v754_v3 = vmul.f32 %v1301_v25, %v1301_v25 }
 0x10d   : > { %v775_v18 = vadd.f32 %v774_v11, %v744_v10  ;;  %v1020_v19 = vpack.c.bf16 %v447_v15, %v444_v7  ;;  %v707_v20 = vadd.f32 %v706_v9, %v447_v15  ;;  %v745_v21 = vmul.f32 %v447_v15, %v447_v15 }
 0x10e   : > { %1081 = vst [vmem:[%s1310_s10 + $0x28] sm:$0xff] %v1025_v14   ;;  %1089 = vst [vmem:[%s1310_s10 + $0x68] sm:$0xff] %v1065_v16   ;;  %v1060_v22 = vpack.c.bf16 %v1348_v17, %v1342_v8  ;;  %v755_v7 = vmul.f32 %v1312_v29, %v1312_v29  ;;  %v757_v15 = vmul.f32 %v1332_v57, %v1332_v57 }
 0x10f   : > { %1080 = vst [vmem:[%s1310_s10 + $0x20] sm:$0xff] %v1020_v19   ;;  %v708_v24 = vadd.f32 %v1142_v4, %v707_v20  ;;  %v776_v26 = vadd.f32 %v775_v18, %v745_v21 }
 0x110   : > { %1088 = vst [vmem:[%s1310_s10 + $0x60] sm:$0xff] %v1060_v22  }
 0x111   : > { %v777_v30 = vadd.f32 %v776_v26, %v746_v23  ;;  %v1146_v31 = vpop.f32.mrb[12].mxu0  ;;  %v709_v32 = vadd.f32 %v1143_v12, %v708_v24  ;;  %v1356_v33 = vpop.f32.mrb[12].mxu1  ;;  %v761_v24 = vmul.f32 %v1348_v17, %v1348_v17 }
 0x112   : > { %v460_v35 = vpop.f32.mrb[13].mxu0  ;;  %v524_v36 = vpop.f32.mrb[13].mxu1  ;;  %v750_v54 = vmul.f32 %v1146_v31, %v1146_v31 }
 0x113   : > { %v710_v37 = vadd.f32 %v709_v32, %v460_v35  ;;  %v748_v38 = vmul.f32 %v460_v35, %v460_v35  ;;  %v778_v39 = vadd.f32 %v777_v30, %v747_v28  ;;  %v1147_v40 = vpop.f32.mrb[14].mxu0  ;;  %v1358_v41 = vpop.f32.mrb[14].mxu1 }
 0x114   : > { %v1035_v42 = vpack.c.bf16 %v1147_v40, %v1146_v31  ;;  %v463_v43 = vpop.f32.mrb[15].mxu0  ;;  %v1075_v44 = vpack.c.bf16 %v1358_v41, %v1356_v33  ;;  %v527_v45 = vpop.f32.mrb[15].mxu1  ;;  %v751_v58 = vmul.f32 %v1147_v40, %v1147_v40 }
 0x115   : > { %v779_v47 = vadd.f32 %v778_v39, %v748_v38  ;;  %v1030_v49 = vpack.c.bf16 %v463_v43, %v460_v35  ;;  %v711_v50 = vadd.f32 %v710_v37, %v463_v43  ;;  %v749_v51 = vmul.f32 %v463_v43, %v463_v43 }
 0x116   : > { %1083 = vst [vmem:[%s1310_s10 + $0x38] sm:$0xff] %v1035_v42   ;;  %1091 = vst [vmem:[%s1310_s10 + $0x78] sm:$0xff] %v1075_v44   ;;  %v1070_v52 = vpack.c.bf16 %v527_v45, %v524_v36  ;;  %v766_v39 = vmul.f32 %v1356_v33, %v1356_v33  ;;  %v767_v42 = vmul.f32 %v1358_v41, %v1358_v41 }
 0x117   : > { %1082 = vst [vmem:[%s1310_s10 + $0x30] sm:$0xff] %v1030_v49   ;;  %v712_v55 = vadd.f32 %v1146_v31, %v711_v50  ;;  %v780_v56 = vadd.f32 %v779_v47, %v749_v51  ;;  %v764_v31 = vmul.f32 %v524_v36, %v524_v36 }
 0x118   : > { %1090 = vst [vmem:[%s1310_s10 + $0x70] sm:$0xff] %v1070_v52  }
 0x119   : > { %v781_v59 = vadd.f32 %v780_v56, %v750_v54  ;;  %v713_v60 = vadd.f32 %v1147_v40, %v712_v55 }
 0x11b   : > { %v714_v62 = vadd.f32 %v713_v60, %v1303_v27  ;;  %v782_v63 = vadd.f32 %v781_v59, %v751_v58  ;;  %v756_v27 = vmul.f32 %v1326_v48, %v1326_v48 }
 0x11d   : > { %v783_v0 = vadd.f32 %v782_v63, %v752_v61  ;;  %v715_v1 = vadd.f32 %v714_v62, %v1316_v34 }
 0x11f   : > { %v716_v4 = vadd.f32 %v1301_v25, %v715_v1  ;;  %v784_v5 = vadd.f32 %v783_v0, %v753_v2  ;;  %v758_v25 = vmul.f32 %v1324_v46, %v1324_v46 }
 0x121   : > { %v785_v9 = vadd.f32 %v784_v5, %v754_v3  ;;  %v717_v10 = vadd.f32 %v1312_v29, %v716_v4  ;;  %v759_v29 = vmul.f32 %v1328_v53, %v1328_v53 }
 0x123   : > { %v718_v11 = vadd.f32 %v717_v10, %v1326_v48  ;;  %v786_v12 = vadd.f32 %v785_v9, %v755_v7  ;;  %v760_v48 = vmul.f32 %v1342_v8, %v1342_v8 }
 0x125   : > { %v787_v14 = vadd.f32 %v786_v12, %v756_v27  ;;  %v719_v34 = vadd.f32 %v718_v11, %v1332_v57 }
 0x127   : > { %v720_v16 = vadd.f32 %v1324_v46, %v719_v34  ;;  %v788_v18 = vadd.f32 %v787_v14, %v757_v15  ;;  %v762_v46 = vmul.f32 %v1340_v6, %v1340_v6 }
 0x129   : > { %v789_v19 = vadd.f32 %v788_v18, %v758_v25  ;;  %v721_v20 = vadd.f32 %v1328_v53, %v720_v16  ;;  %v763_v53 = vmul.f32 %v1344_v13, %v1344_v13 }
 0x12b   : > { %v722_v21 = vadd.f32 %v721_v20, %v1342_v8  ;;  %v790_v22 = vadd.f32 %v789_v19, %v759_v29 }
 0x12d   : > { %v791_v23 = vadd.f32 %v790_v22, %v760_v48  ;;  %v723_v57 = vadd.f32 %v722_v21, %v1348_v17  ;;  %v765_v17 = vmul.f32 %v527_v45, %v527_v45 }
 0x12f   : > { %v724_v26 = vadd.f32 %v1340_v6, %v723_v57  ;;  %v792_v28 = vadd.f32 %v791_v23, %v761_v24 }
 0x131   : > { %v793_v30 = vadd.f32 %v792_v28, %v762_v46  ;;  %v725_v8 = vadd.f32 %v1344_v13, %v724_v26 }
 0x133   : > { %v726_v32 = vadd.f32 %v725_v8, %v524_v36  ;;  %v794_v35 = vadd.f32 %v793_v30, %v763_v53 }
 0x135   : > { %v795_v37 = vadd.f32 %v794_v35, %v764_v31  ;;  %v727_v38 = vadd.f32 %v726_v32, %v527_v45 }
 0x137   : > { %v728_v6 = vadd.f32 %v1356_v33, %v727_v38  ;;  %v796_v40 = vadd.f32 %v795_v37, %v765_v17 }
 0x139   : > { %v729_v43 = vadd.f32 %v1358_v41, %v728_v6  ;;  %v797_v44 = vadd.f32 %v796_v40, %v766_v39 }
 0x13b   : > { %v730_v13 = vrot.slane %v729_v43, 4  ;;  %v798_v47 = vadd.f32 %v797_v44, %v767_v42 }
 0x13d   : > { %v731_v36 = vadd.f32 %v730_v13, %v729_v43  ;;  %v799_v49 = vrot.slane %v798_v47, 4 }
 0x13f   : > { %v732_v50 = vrot.slane %v731_v36, 2  ;;  %v800_v51 = vadd.f32 %v799_v49, %v798_v47 }
 0x141   : > { %v733_v45 = vadd.f32 %v732_v50, %v731_v36  ;;  %v801_v52 = vrot.slane %v800_v51, 2 }
 0x143   : > { %v734_v54 = vrot.slane %v733_v45, 1  ;;  %v802_v55 = vadd.f32 %v801_v52, %v800_v51 }
 0x145   : > { %v803_v33 = vrot.slane %v802_v55, 1  ;;  %v735_v56 = vadd.f32 %v734_v54, %v733_v45 }
 0x147   : > { %v804_v58 = vadd.f32 %v803_v33, %v802_v55 }
 0x149   : > { %v806_v41 = vsel %vm805_vm0, %v735_v56, %v804_v58 }
 0x14a   : > { %v808_v59 = vsel %vm807_vm1, %v806_v41, 0.0 }
 0x14b   : > { %809 = vst [vmem:[%s184_s16] sm:$0xff] %v808_v59 }
 0x14c PF: > { %s14_s12 = sadd.s32 1, %s1218_s12  }
 0x14d   : > { %p11_p5 = scmp.ge.s32.totalorder %s14_s12, 4  }
 0x14f   :  { %13 = sbr.rel (!%p11_p5) target bundleno = 1 (0x1), region = 70 }

// kernel: bottleneck_forward.6
= control target key start
LH: loop header
LB: loop body
LE: loop exit
PB: predicated region body
PF: predicated region fallthrough
CT: control target
= control target key end

     0   :  { %s1415_s18 = smov 0   ;;  %s1683_s0 = inlined_call_operand.vmem [shape: bf16[512,128], index: 0, kind: input, shape index: {}]   ;;  %s1684_s1 = inlined_call_operand.vmem [shape: bf16[128,128], index: 1, kind: input, shape index: {}]   ;;  %s1685_s2 = inlined_call_operand.vmem [shape: f32[1,128], index: 2, kind: input, shape index: {}]   ;;  %s1686_s3 = inlined_call_operand.vmem [shape: f32[1,128], index: 3, kind: input, shape index: {}]   ;;  %s1687_s4 = inlined_call_operand.vmem [shape: bf16[512,128], index: 4, kind: output, shape index: {0}]   ;;  %s1688_s5 = inlined_call_operand.vmem [shape: f32[2,8,128], index: 5, kind: output, shape index: {1}]  }
   0x1 LB: > { %s1421_s19 = sadd.s32 4294967295, %s1383_s18   ;;  %p1017_p0 = scmp.ge.s32.totalorder %s1383_s18, 1  ;;  %s1383_s18 = sphi %s1415_s18, %s16_s18  }
   0x2   : > { %p191_p1 = scmp.lt.s32.totalorder %s1383_s18, 3 }
   0x4   : > { %p192_p2 = pnand %p1017_p0, %p191_p1 }
   0x5   : > { %v1369_v0 = vld [vmem:[%s1684_s1] sm:$0xff] (!%p192_p2)   ;;  %s1018_s22 = sshll.u32 (!%p192_p2), %s1421_s19, 5  ;;  %v1370_v1 = vld [vmem:[%s1684_s1 + $0x8] sm:$0xff] (!%p192_p2)   ;;  %v1371_v2 = vld [vmem:[%s1684_s1 + $0x10] sm:$0xff] (!%p192_p2)   ;;  %p235_p4 = scmp.lt.s32.totalorder (!%p192_p2), %s1421_s19, 1  ;;  %vm921_vm0 = vcmask (!%p192_p2), 1040384  }
   0x6   : > { %195 = sbr.rel (%p192_p2) target bundleno = 332 (0x14c), region = 36  ;;  %p224_p3 = scmp.lt.s32.totalorder (!%p192_p2), %s1018_s22, 63  ;;  %1297 = vmatprep.subr.bf16.mxu0 (!%p192_p2), %v1369_v0  ;;  %1345 = vmatprep.subr.bf16.mxu1 (!%p192_p2), %v1369_v0  ;;  %v1372_v3 = vld [vmem:[%s1684_s1 + $0x18] sm:$0xff] (!%p192_p2)   ;;  %v1452_v5 = vld [vmem:[%s1685_s2] ss:$0 sm:$0xff] (!%p192_p2)  ;;  %v1374_v34 = vld [vmem:[%s1684_s1 + $0x28] sm:$0xff] (!%p192_p2)  }
   0x7   : > { %1298 = vmatpush3.bf16.msra.mxu0 (!%p192_p2), %v1369_v0  ;;  %1353 = vmatpush3.bf16.msra.mxu1 (!%p192_p2), %v1369_v0  ;;  %v1460_v11 = vld [vmem:[%s1686_s3] ss:$0 sm:$0xff] (!%p192_p2)  ;;  %v1375_v49 = vld [vmem:[%s1684_s1 + $0x30] sm:$0xff] (!%p192_p2)   ;;  %v1376_v63 = vld [vmem:[%s1684_s1 + $0x38] sm:$0xff] (!%p192_p2)   ;;  %vm923_vm1 = vcmask (!%p192_p2), 1041408  }
   0x8   : > { %1299 = vmatprep.subr.bf16.mxu0 (!%p192_p2), %v1370_v1  ;;  %1346 = vmatprep.subr.bf16.mxu1 (!%p192_p2), %v1370_v1  ;;  %v1373_v20 = vld [vmem:[%s1684_s1 + $0x20] sm:$0xff] (!%p192_p2)  }
   0xb   : > { %1300 = vmatpush3.bf16.msra.mxu0 (!%p192_p2), %v1370_v1  ;;  %1354 = vmatpush3.bf16.msra.mxu1 (!%p192_p2), %v1370_v1 }
   0xc   : > { %1301 = vmatprep.subr.bf16.mxu0 (!%p192_p2), %v1371_v2  ;;  %1347 = vmatprep.subr.bf16.mxu1 (!%p192_p2), %v1371_v2 }
   0xd   : > { %s1690_s22 = smov (!%p224_p3, %s1018_s22), 63  ;;  %s1692_s19 = smov (!%p235_p4, %s1421_s19), 1 }
   0xe   : > { %s1019_s27 = sshll.u32 %s1690_s22, 2  ;;  %s1022_s22 = sshll.u32 %s1692_s19, 3 }
   0xf   : > { %s1443_s30 = scalar_lea.vmem %s1683_s0, %s1019_s27  ;;  %1302 = vmatpush3.bf16.msra.mxu0 %v1371_v2  ;;  %1355 = vmatpush3.bf16.msra.mxu1 %v1371_v2  ;;  %s1585_s25 = scalar_lea.vmem %s1687_s4, %s1019_s27 }
  0x10   : > { %v1100_v4 = vld [vmem:[%s1443_s30] sm:$0xff]   ;;  %v1243_v8 = vld [vmem:[%s1443_s30 + $0x8] sm:$0xff]   ;;  %v1244_v9 = vld [vmem:[%s1443_s30 + $0x10] sm:$0xff]   ;;  %1303 = vmatprep.subr.bf16.mxu0 %v1372_v3  ;;  %1348 = vmatprep.subr.bf16.mxu1 %v1372_v3  ;;  %s238_s28 = scalar_lea.vmem %s1688_s5, %s1022_s22 }
  0x11   : > { %v1101_v6 = vunpack.c.l.bf16 %v1100_v4  ;;  %v1102_v7 = vunpack.c.h.bf16 %v1100_v4  ;;  %v1245_v10 = vld [vmem:[%s1443_s30 + $0x18] sm:$0xff]   ;;  %v1105_v12 = vunpack.c.l.bf16 %v1243_v8  ;;  %v1106_v13 = vunpack.c.h.bf16 %v1243_v8  ;;  %v1246_v29 = vld [vmem:[%s1443_s30 + $0x20] sm:$0xff]   ;;  %v1247_v33 = vld [vmem:[%s1443_s30 + $0x28] sm:$0xff]  }
  0x12   : > { %v1109_v14 = vunpack.c.l.bf16 %v1244_v9  ;;  %v1110_v15 = vunpack.c.h.bf16 %v1244_v9  ;;  %v1113_v18 = vunpack.c.l.bf16 %v1245_v10  ;;  %v1114_v19 = vunpack.c.h.bf16 %v1245_v10  ;;  %v1248_v42 = vld [vmem:[%s1443_s30 + $0x30] sm:$0xff]   ;;  %v1489_v48 = vld [vmem:[%s1443_s30 + $0x38] sm:$0xff]   ;;  %v1250_v60 = vld [vmem:[%s1443_s30 + $0x40] sm:$0xff]  }
  0x13   : > { %v311_v16 = vmul.f32 %v1101_v6, %v1452_v5  ;;  %v312_v17 = vmul.f32 %v1102_v7, %v1452_v5  ;;  %v313_v21 = vmul.f32 %v1105_v12, %v1452_v5  ;;  %v314_v22 = vmul.f32 %v1106_v13, %v1452_v5  ;;  %1304 = vmatpush3.bf16.msra.mxu0 %v1372_v3  ;;  %v1252_v9 = vld [vmem:[%s1443_s30 + $0x50] sm:$0xff]  }
  0x14   : > { %v315_v23 = vmul.f32 %v1109_v14, %v1452_v5  ;;  %v316_v24 = vmul.f32 %v1110_v15, %v1452_v5  ;;  %v317_v27 = vmul.f32 %v1113_v18, %v1452_v5  ;;  %v318_v28 = vmul.f32 %v1114_v19, %v1452_v5  ;;  %1356 = vmatpush3.bf16.msra.mxu1 %v1372_v3  ;;  %v1251_v3 = vld [vmem:[%s1443_s30 + $0x48] sm:$0xff]   ;;  %v1253_v19 = vld [vmem:[%s1443_s30 + $0x58] sm:$0xff]  }
  0x15   : > { %v350_v25 = vadd.f32 %v1460_v11, %v311_v16  ;;  %v351_v26 = vadd.f32 %v1460_v11, %v312_v17  ;;  %v352_v32 = vadd.f32 %v1460_v11, %v313_v21  ;;  %1305 = vmatprep.subr.bf16.mxu0 %v1373_v20  ;;  %v353_v35 = vadd.f32 %v1460_v11, %v314_v22 }
  0x16   : > { %v354_v36 = vadd.f32 %v1460_v11, %v315_v23  ;;  %v355_v37 = vadd.f32 %v1460_v11, %v316_v24  ;;  %1349 = vmatprep.subr.bf16.mxu1 %v1373_v20  ;;  %v356_v39 = vadd.f32 %v1460_v11, %v317_v27  ;;  %v357_v40 = vadd.f32 %v1460_v11, %v318_v28 }
  0x17   : > { %v382_v30 = vmax.f32 %v350_v25, 0.0  ;;  %v383_v31 = vmax.f32 %v351_v26, 0.0  ;;  %v1117_v41 = vunpack.c.l.bf16 %v1246_v29  ;;  %v1118_v43 = vunpack.c.h.bf16 %v1246_v29  ;;  %1306 = vmatpush3.bf16.msra.mxu0 %v1373_v20 }
  0x18   : > { %v1121_v44 = vunpack.c.l.bf16 %v1247_v33  ;;  %v384_v45 = vmax.f32 %v352_v32, 0.0  ;;  %v1122_v47 = vunpack.c.h.bf16 %v1247_v33  ;;  %1307 = vmatprep.subr.bf16.mxu0 %v1374_v34  ;;  %v385_v50 = vmax.f32 %v353_v35, 0.0  ;;  %1357 = vmatpush3.bf16.msra.mxu1 %v1373_v20  ;;  %v1254_v32 = vld [vmem:[%s1443_s30 + $0x60] sm:$0xff]  }
  0x19   : > { %v414_v38 = vpack.c.bf16 %v383_v31, %v382_v30  ;;  %v319_v46 = vmul.f32 %v1117_v41, %v1452_v5  ;;  %v386_v51 = vmax.f32 %v354_v36, 0.0  ;;  %v387_v52 = vmax.f32 %v355_v37, 0.0  ;;  %1350 = vmatprep.subr.bf16.mxu1 %v1374_v34 }
  0x1a   : > { %v1125_v53 = vunpack.c.l.bf16 %v1248_v42  ;;  %v388_v54 = vmax.f32 %v356_v39, 0.0  ;;  %v389_v55 = vmax.f32 %v357_v40, 0.0  ;;  %v320_v56 = vmul.f32 %v1118_v43, %v1452_v5 }
  0x1b   : > { %1313 = vmatprep.mubr.bf16.mxu0 %v414_v38  ;;  %v321_v57 = vmul.f32 %v1121_v44, %v1452_v5  ;;  %v1126_v58 = vunpack.c.h.bf16 %v1248_v42  ;;  %v1129_v59 = vunpack.c.l.bf16 %v1489_v48  ;;  %1308 = vmatpush3.bf16.msra.mxu0 %v1374_v34  ;;  %v1499_v61 = vadd.f32 %v1460_v11, %v319_v46 }
  0x1c   : > { %v322_v62 = vmul.f32 %v1122_v47, %v1452_v5  ;;  %1309 = vmatprep.subr.bf16.mxu0 %v1375_v49  ;;  %v415_v0 = vpack.c.bf16 %v385_v50, %v384_v45  ;;  %v416_v1 = vpack.c.bf16 %v387_v52, %v386_v51  ;;  %1358 = vmatpush3.bf16.msra.mxu1 %v1374_v34  ;;  %v1130_v7 = vunpack.c.h.bf16 %v1489_v48  ;;  %v1255_v45 = vld [vmem:[%s1443_s30 + $0x68] sm:$0xff]  }
  0x1d   : > { %v323_v2 = vmul.f32 %v1125_v53, %v1452_v5  ;;  %v1507_v4 = vpack.c.bf16 %v389_v55, %v388_v54  ;;  %v1510_v6 = vadd.f32 %v1460_v11, %v320_v56  ;;  %1351 = vmatprep.subr.bf16.mxu1 %v1375_v49  ;;  %v1133_v8 = vunpack.c.l.bf16 %v1250_v60  ;;  %v1256_v55 = vld [vmem:[%s1443_s30 + $0x70] sm:$0xff]  }
  0x1e   : > { %v1515_v10 = vadd.f32 %v1460_v11, %v321_v57  ;;  %v1518_v12 = vmul.f32 %v1126_v58, %v1452_v5  ;;  %v1521_v13 = vmul.f32 %v1129_v59, %v1452_v5  ;;  %v1134_v14 = vunpack.c.h.bf16 %v1250_v60 }
  0x1f   : > { %1310 = vmatpush3.bf16.msra.mxu0 %v1375_v49  ;;  %v390_v15 = vmax.f32 %v1499_v61, 0.0  ;;  %v1525_v16 = vadd.f32 %v1460_v11, %v322_v62  ;;  %v327_v17 = vmul.f32 %v1133_v8, %v1452_v5  ;;  %v1137_v18 = vunpack.c.l.bf16 %v1251_v3 }
  0x20   : > { %1311 = vmatprep.subr.bf16.mxu0 %v1376_v63  ;;  %1359 = vmatpush3.bf16.msra.mxu1 %v1375_v49  ;;  %v1530_v20 = vadd.f32 %v1460_v11, %v323_v2  ;;  %v328_v21 = vmul.f32 %v1134_v14, %v1452_v5  ;;  %v1138_v22 = vunpack.c.h.bf16 %v1251_v3  ;;  %v1141_v23 = vunpack.c.l.bf16 %v1252_v9 }
  0x21   : > { %v391_v24 = vmax.f32 %v1510_v6, 0.0  ;;  %1352 = vmatprep.subr.bf16.mxu1 %v1376_v63  ;;  %v366_v25 = vadd.f32 %v1460_v11, %v327_v17  ;;  %v329_v26 = vmul.f32 %v1137_v18, %v1452_v5  ;;  %v1142_v27 = vunpack.c.h.bf16 %v1252_v9  ;;  %v1257_v17 = vld [vmem:[%s1443_s30 + $0x78] sm:$0xff]  }
  0x22   : > { %v367_v28 = vadd.f32 %v1460_v11, %v328_v21  ;;  %v330_v29 = vmul.f32 %v1138_v22, %v1452_v5  ;;  %v331_v30 = vmul.f32 %v1141_v23, %v1452_v5  ;;  %v1145_v31 = vunpack.c.l.bf16 %v1253_v19 }
  0x23   : > { %1312 = vmatpush3.bf16.msra.mxu0 %v1376_v63  ;;  %v398_v33 = vmax.f32 %v366_v25, 0.0  ;;  %v368_v34 = vadd.f32 %v1460_v11, %v329_v26  ;;  %v332_v35 = vmul.f32 %v1142_v27, %v1452_v5  ;;  %v1146_v36 = vunpack.c.h.bf16 %v1253_v19 }
  0x24   : > { %1360 = vmatpush3.bf16.msra.mxu1 %v1376_v63  ;;  %v399_v37 = vmax.f32 %v367_v28, 0.0  ;;  %v369_v38 = vadd.f32 %v1460_v11, %v330_v29  ;;  %v370_v39 = vadd.f32 %v1460_v11, %v331_v30  ;;  %v333_v40 = vmul.f32 %v1145_v31, %v1452_v5 }
  0x25   : > { %v400_v41 = vmax.f32 %v368_v34, 0.0  ;;  %v371_v42 = vadd.f32 %v1460_v11, %v332_v35  ;;  %v334_v43 = vmul.f32 %v1146_v36, %v1452_v5  ;;  %v1149_v44 = vunpack.c.l.bf16 %v1254_v32 }
  0x26   : > { %1314 = vmatmul.mubr.bf16.vlgmr.msra.gmra.mrb[0].mxu0 %v415_v0  ;;  %v422_v46 = vpack.c.bf16 %v399_v37, %v398_v33  ;;  %v401_v47 = vmax.f32 %v369_v38, 0.0  ;;  %v402_v49 = vmax.f32 %v370_v39, 0.0  ;;  %v372_v50 = vadd.f32 %v1460_v11, %v333_v40 }
  0x27   : > { %1317 = vmatprep.mubr.bf16.mxu0 %v416_v1  ;;  %v403_v51 = vmax.f32 %v371_v42, 0.0  ;;  %v373_v52 = vadd.f32 %v1460_v11, %v334_v43  ;;  %v1150_v53 = vunpack.c.h.bf16 %v1254_v32  ;;  %v335_v54 = vmul.f32 %v1149_v44, %v1452_v5 }
  0x28   : > { %1329 = vmatprep.mubr.bf16.mxu1 %v422_v46  ;;  %v423_v56 = vpack.c.bf16 %v401_v47, %v400_v41  ;;  %v404_v57 = vmax.f32 %v372_v50, 0.0  ;;  %v1153_v58 = vunpack.c.l.bf16 %v1255_v45  ;;  %v1154_v59 = vunpack.c.h.bf16 %v1255_v45 }
  0x29   : > { %v424_v60 = vpack.c.bf16 %v403_v51, %v402_v49  ;;  %v405_v61 = vmax.f32 %v373_v52, 0.0  ;;  %v336_v62 = vmul.f32 %v1150_v53, %v1452_v5  ;;  %v374_v63 = vadd.f32 %v1460_v11, %v335_v54 }
  0x2a   : > { %1330 = vmatmul.mubr.bf16.vlgmr.msra.gmra.mrb[0].mxu1 %v423_v56  ;;  %v337_v0 = vmul.f32 %v1153_v58, %v1452_v5  ;;  %v338_v1 = vmul.f32 %v1154_v59, %v1452_v5  ;;  %v1157_v2 = vunpack.c.l.bf16 %v1256_v55  ;;  %v1158_v3 = vunpack.c.h.bf16 %v1256_v55 }
  0x2b   : > { %v418_v6 = vpack.c.bf16 %v391_v24, %v390_v15  ;;  %v363_v8 = vadd.f32 %v1460_v11, %v1518_v12  ;;  %1333 = vmatprep.mubr.bf16.mxu1 %v424_v60  ;;  %v375_v9 = vadd.f32 %v1460_v11, %v336_v62  ;;  %v406_v14 = vmax.f32 %v374_v63, 0.0 }
  0x2c   : > { %v392_v18 = vmax.f32 %v1515_v10, 0.0  ;;  %v326_v19 = vmul.f32 %v1130_v7, %v1452_v5  ;;  %v339_v21 = vmul.f32 %v1157_v2, %v1452_v5  ;;  %v340_v22 = vmul.f32 %v1158_v3, %v1452_v5 }
  0x2d   : > { %v393_v15 = vmax.f32 %v1525_v16, 0.0  ;;  %v394_v23 = vmax.f32 %v1530_v20, 0.0  ;;  %v425_v12 = vpack.c.bf16 %v405_v61, %v404_v57  ;;  %v407_v24 = vmax.f32 %v375_v9, 0.0 }
  0x2e   : > { %1318 = vmatmul.mubr.bf16.gmra.mrb[4].mxu0 %v1507_v4  ;;  %v376_v25 = vadd.f32 %v1460_v11, %v337_v0  ;;  %v377_v10 = vadd.f32 %v1460_v11, %v338_v1  ;;  %v1161_v26 = vunpack.c.l.bf16 %v1257_v17  ;;  %v1162_v27 = vunpack.c.h.bf16 %v1257_v17 }
  0x2f   : > { %1321 = vmatprep.mubr.bf16.mxu0 %v418_v6  ;;  %v395_v48 = vmax.f32 %v363_v8, 0.0  ;;  %v426_v7 = vpack.c.bf16 %v407_v24, %v406_v14  ;;  %v378_v28 = vadd.f32 %v1460_v11, %v339_v21  ;;  %v379_v29 = vadd.f32 %v1460_v11, %v340_v22 }
  0x30   : > { %v419_v16 = vpack.c.bf16 %v393_v15, %v392_v18  ;;  %v364_v20 = vadd.f32 %v1460_v11, %v1521_v13  ;;  %v365_v30 = vadd.f32 %v1460_v11, %v326_v19  ;;  %v408_v4 = vmax.f32 %v376_v25, 0.0 }
  0x31   : > { %v409_v31 = vmax.f32 %v377_v10, 0.0  ;;  %v341_v32 = vmul.f32 %v1161_v26, %v1452_v5  ;;  %v342_v33 = vmul.f32 %v1162_v27, %v1452_v5  ;;  %v420_v34 = vpack.c.bf16 %v395_v48, %v394_v23 }
  0x32   : > { %1334 = vmatmul.mubr.bf16.gmra.mrb[4].mxu1 %v425_v12  ;;  %v410_v35 = vmax.f32 %v378_v28, 0.0  ;;  %v411_v36 = vmax.f32 %v379_v29, 0.0  ;;  %v396_v37 = vmax.f32 %v364_v20, 0.0  ;;  %v397_v38 = vmax.f32 %v365_v30, 0.0 }
  0x33   : > { %1337 = vmatprep.mubr.bf16.mxu1 %v426_v7  ;;  %v427_v39 = vpack.c.bf16 %v409_v31, %v408_v4  ;;  %v380_v13 = vadd.f32 %v1460_v11, %v341_v32  ;;  %v381_v40 = vadd.f32 %v1460_v11, %v342_v33 }
  0x34   : > { %v428_v41 = vpack.c.bf16 %v411_v36, %v410_v35  ;;  %v421_v42 = vpack.c.bf16 %v397_v38, %v396_v37 }
  0x35   : > { %v412_v43 = vmax.f32 %v380_v13, 0.0  ;;  %v413_v44 = vmax.f32 %v381_v40, 0.0 }
  0x36   : > { %1322 = vmatmul.mubr.bf16.gmra.mrb[8].mxu0 %v419_v16 }
  0x37   : > { %1325 = vmatprep.mubr.bf16.mxu0 %v420_v34  ;;  %v429_v5 = vpack.c.bf16 %v413_v44, %v412_v43 }
  0x3a   : > { %1338 = vmatmul.mubr.bf16.gmra.mrb[8].mxu1 %v427_v39 }
  0x3b   : > { %1341 = vmatprep.mubr.bf16.mxu1 %v428_v41 }
  0x3e   : > { %1326 = vmatmul.mubr.bf16.gmra.mrb[12].mxu0 %v421_v42 }
  0x42   : > { %1342 = vmatmul.mubr.bf16.gmra.mrb[12].mxu1 %v429_v5 }
  0xf9   : > { %v1315_v45 = vpop.f32.mrb[0].mxu0 }
  0xfa   : > { %v528_v46 = vpop.f32.mrb[1].mxu0  ;;  %v854_v56 = vmul.f32 %v1315_v45, %v1315_v45 }
  0xfb   : > { %v1316_v11 = vpop.f32.mrb[2].mxu0  ;;  %v852_v50 = vmul.f32 %v528_v46, %v528_v46 }
  0xfc   : > { %v1171_v47 = vpack.c.bf16 %v1316_v11, %v1315_v45  ;;  %v531_v49 = vpop.f32.mrb[3].mxu0  ;;  %v855_v62 = vmul.f32 %v1316_v11, %v1316_v11 }
  0xfd   : > { %v1166_v51 = vpack.c.bf16 %v531_v49, %v528_v46  ;;  %v815_v52 = vadd.f32 %v531_v49, %v528_v46  ;;  %v853_v53 = vmul.f32 %v531_v49, %v531_v49  ;;  %v1587_v54 = vpop.f32.mrb[0].mxu1 }
  0xfe   : > { %1258 = vst [vmem:[%s1585_s25 + $0x8] sm:$0xff] %v1171_v47   ;;  %v1590_v55 = vpop.f32.mrb[1].mxu1 }
  0xff   : > { %1167 = vst [vmem:[%s1585_s25] sm:$0xff] %v1166_v51   ;;  %v816_v57 = vadd.f32 %v1315_v45, %v815_v52  ;;  %v884_v58 = vadd.f32 %v853_v53, %v852_v50  ;;  %v1593_v59 = vpop.f32.mrb[2].mxu1 }
 0x100   : > { %v1211_v60 = vpack.c.bf16 %v1593_v59, %v1587_v54  ;;  %v1597_v61 = vpop.f32.mrb[3].mxu1 }
 0x101   : > { %v885_v63 = vadd.f32 %v884_v58, %v854_v56  ;;  %v1319_v0 = vpop.f32.mrb[4].mxu0  ;;  %v817_v1 = vadd.f32 %v1316_v11, %v816_v57  ;;  %v1206_v2 = vpack.c.bf16 %v1597_v61, %v1590_v55 }
 0x102   : > { %v544_v3 = vpop.f32.mrb[5].mxu0  ;;  %1266 = vst [vmem:[%s1585_s25 + $0x48] sm:$0xff] %v1211_v60   ;;  %v858_v24 = vmul.f32 %v1319_v0, %v1319_v0 }
 0x103   : > { %v818_v6 = vadd.f32 %v817_v1, %v544_v3  ;;  %v856_v8 = vmul.f32 %v544_v3, %v544_v3  ;;  %v886_v9 = vadd.f32 %v885_v63, %v855_v62  ;;  %v1320_v14 = vpop.f32.mrb[6].mxu0  ;;  %1265 = vst [vmem:[%s1585_s25 + $0x40] sm:$0xff] %v1206_v2  }
 0x104   : > { %v1181_v17 = vpack.c.bf16 %v1320_v14, %v1319_v0  ;;  %v547_v18 = vpop.f32.mrb[7].mxu0  ;;  %v859_v7 = vmul.f32 %v1320_v14, %v1320_v14 }
 0x105   : > { %v887_v19 = vadd.f32 %v886_v9, %v856_v8  ;;  %v1176_v21 = vpack.c.bf16 %v547_v18, %v544_v3  ;;  %v819_v22 = vadd.f32 %v818_v6, %v547_v18  ;;  %v857_v15 = vmul.f32 %v547_v18, %v547_v18  ;;  %v1603_v23 = vpop.f32.mrb[4].mxu1 }
 0x106   : > { %1260 = vst [vmem:[%s1585_s25 + $0x18] sm:$0xff] %v1181_v17   ;;  %v1606_v12 = vpop.f32.mrb[5].mxu1  ;;  %v868_v17 = vmul.f32 %v1590_v55, %v1590_v55 }
 0x107   : > { %1259 = vst [vmem:[%s1585_s25 + $0x10] sm:$0xff] %v1176_v21   ;;  %v820_v25 = vadd.f32 %v1319_v0, %v819_v22  ;;  %v888_v10 = vadd.f32 %v887_v19, %v857_v15  ;;  %v1609_v26 = vpop.f32.mrb[6].mxu1 }
 0x108   : > { %v1221_v27 = vpack.c.bf16 %v1609_v26, %v1603_v23  ;;  %v1613_v48 = vpop.f32.mrb[7].mxu1 }
 0x109   : > { %v889_v28 = vadd.f32 %v888_v10, %v858_v24  ;;  %v1323_v29 = vpop.f32.mrb[8].mxu0  ;;  %v821_v16 = vadd.f32 %v1320_v14, %v820_v25  ;;  %v1216_v20 = vpack.c.bf16 %v1613_v48, %v1606_v12 }
 0x10a   : > { %v560_v30 = vpop.f32.mrb[9].mxu0  ;;  %1268 = vst [vmem:[%s1585_s25 + $0x58] sm:$0xff] %v1221_v27   ;;  %v862_v41 = vmul.f32 %v1323_v29, %v1323_v29 }
 0x10b   : > { %v822_v4 = vadd.f32 %v821_v16, %v560_v30  ;;  %v860_v31 = vmul.f32 %v560_v30, %v560_v30  ;;  %v890_v32 = vadd.f32 %v889_v28, %v859_v7  ;;  %v1324_v33 = vpop.f32.mrb[10].mxu0  ;;  %1267 = vst [vmem:[%s1585_s25 + $0x50] sm:$0xff] %v1216_v20   ;;  %v869_v28 = vmul.f32 %v1597_v61, %v1597_v61 }
 0x10c   : > { %v1191_v34 = vpack.c.bf16 %v1324_v33, %v1323_v29  ;;  %v563_v35 = vpop.f32.mrb[11].mxu0  ;;  %v863_v46 = vmul.f32 %v1324_v33, %v1324_v33 }
 0x10d   : > { %v891_v36 = vadd.f32 %v890_v32, %v860_v31  ;;  %v1186_v37 = vpack.c.bf16 %v563_v35, %v560_v30  ;;  %v823_v38 = vadd.f32 %v822_v4, %v563_v35  ;;  %v861_v39 = vmul.f32 %v563_v35, %v563_v35  ;;  %v1619_v13 = vpop.f32.mrb[8].mxu1 }
 0x10e   : > { %1262 = vst [vmem:[%s1585_s25 + $0x28] sm:$0xff] %v1191_v34   ;;  %v1622_v40 = vpop.f32.mrb[9].mxu1  ;;  %v871_v30 = vmul.f32 %v1593_v59, %v1593_v59  ;;  %v872_v31 = vmul.f32 %v1606_v12, %v1606_v12  ;;  %v873_v35 = vmul.f32 %v1613_v48, %v1613_v48 }
 0x10f   : > { %1261 = vst [vmem:[%s1585_s25 + $0x20] sm:$0xff] %v1186_v37   ;;  %v824_v42 = vadd.f32 %v1323_v29, %v823_v38  ;;  %v892_v43 = vadd.f32 %v891_v36, %v861_v39  ;;  %v1625_v44 = vpop.f32.mrb[10].mxu1  ;;  %v870_v29 = vmul.f32 %v1587_v54, %v1587_v54 }
 0x110   : > { %v1231_v5 = vpack.c.bf16 %v1625_v44, %v1619_v13  ;;  %v1629_v45 = vpop.f32.mrb[11].mxu1 }
 0x111   : > { %v893_v11 = vadd.f32 %v892_v43, %v862_v41  ;;  %v1327_v47 = vpop.f32.mrb[12].mxu0  ;;  %v825_v49 = vadd.f32 %v1324_v33, %v824_v42  ;;  %v1226_v50 = vpack.c.bf16 %v1629_v45, %v1622_v40 }
 0x112   : > { %v576_v51 = vpop.f32.mrb[13].mxu0  ;;  %1270 = vst [vmem:[%s1585_s25 + $0x68] sm:$0xff] %v1231_v5   ;;  %v866_v6 = vmul.f32 %v1327_v47, %v1327_v47  ;;  %v877_v5 = vmul.f32 %v1629_v45, %v1629_v45 }
 0x113   : > { %v826_v52 = vadd.f32 %v825_v49, %v576_v51  ;;  %v864_v53 = vmul.f32 %v576_v51, %v576_v51  ;;  %v894_v56 = vadd.f32 %v893_v11, %v863_v46  ;;  %v1328_v57 = vpop.f32.mrb[14].mxu0  ;;  %1269 = vst [vmem:[%s1585_s25 + $0x60] sm:$0xff] %v1226_v50  }
 0x114   : > { %v1201_v58 = vpack.c.bf16 %v1328_v57, %v1327_v47  ;;  %v579_v60 = vpop.f32.mrb[15].mxu0  ;;  %v867_v21 = vmul.f32 %v1328_v57, %v1328_v57 }
 0x115   : > { %v895_v62 = vadd.f32 %v894_v56, %v864_v53  ;;  %v1196_v63 = vpack.c.bf16 %v579_v60, %v576_v51  ;;  %v827_v0 = vadd.f32 %v826_v52, %v579_v60  ;;  %v865_v1 = vmul.f32 %v579_v60, %v579_v60  ;;  %v1343_v2 = vpop.f32.mrb[12].mxu1 }
 0x116   : > { %1264 = vst [vmem:[%s1585_s25 + $0x38] sm:$0xff] %v1201_v58   ;;  %v640_v3 = vpop.f32.mrb[13].mxu1  ;;  %v882_v56 = vmul.f32 %v1343_v2, %v1343_v2 }
 0x117   : > { %1263 = vst [vmem:[%s1585_s25 + $0x30] sm:$0xff] %v1196_v63   ;;  %v828_v8 = vadd.f32 %v1327_v47, %v827_v0  ;;  %v896_v9 = vadd.f32 %v895_v62, %v865_v1  ;;  %v1344_v14 = vpop.f32.mrb[14].mxu1  ;;  %v880_v49 = vmul.f32 %v640_v3, %v640_v3 }
 0x118   : > { %v1241_v18 = vpack.c.bf16 %v1344_v14, %v1343_v2  ;;  %v643_v19 = vpop.f32.mrb[15].mxu1  ;;  %v883_v60 = vmul.f32 %v1344_v14, %v1344_v14 }
 0x119   : > { %v897_v22 = vadd.f32 %v896_v9, %v866_v6  ;;  %v829_v15 = vadd.f32 %v1328_v57, %v828_v8  ;;  %v1236_v24 = vpack.c.bf16 %v643_v19, %v640_v3 }
 0x11a   : > { %1272 = vst [vmem:[%s1585_s25 + $0x78] sm:$0xff] %v1241_v18  }
 0x11b   : > { %v830_v25 = vadd.f32 %v829_v15, %v1590_v55  ;;  %v898_v10 = vadd.f32 %v897_v22, %v867_v21  ;;  %1271 = vst [vmem:[%s1585_s25 + $0x70] sm:$0xff] %v1236_v24  }
 0x11d   : > { %v899_v27 = vadd.f32 %v898_v10, %v868_v17  ;;  %v831_v7 = vadd.f32 %v830_v25, %v1597_v61 }
 0x11f   : > { %v832_v16 = vadd.f32 %v1587_v54, %v831_v7  ;;  %v900_v20 = vadd.f32 %v899_v27, %v869_v28  ;;  %v874_v54 = vmul.f32 %v1603_v23, %v1603_v23 }
 0x121   : > { %v901_v4 = vadd.f32 %v900_v20, %v870_v29  ;;  %v833_v55 = vadd.f32 %v1593_v59, %v832_v16  ;;  %v875_v59 = vmul.f32 %v1609_v26, %v1609_v26 }
 0x123   : > { %v834_v32 = vadd.f32 %v833_v55, %v1606_v12  ;;  %v902_v33 = vadd.f32 %v901_v4, %v871_v30  ;;  %v876_v12 = vmul.f32 %v1622_v40, %v1622_v40 }
 0x125   : > { %v903_v34 = vadd.f32 %v902_v33, %v872_v31  ;;  %v835_v61 = vadd.f32 %v834_v32, %v1613_v48 }
 0x127   : > { %v836_v36 = vadd.f32 %v1603_v23, %v835_v61  ;;  %v904_v37 = vadd.f32 %v903_v34, %v873_v35  ;;  %v878_v23 = vmul.f32 %v1619_v13, %v1619_v13 }
 0x129   : > { %v905_v38 = vadd.f32 %v904_v37, %v874_v54  ;;  %v837_v39 = vadd.f32 %v1609_v26, %v836_v36  ;;  %v879_v26 = vmul.f32 %v1625_v44, %v1625_v44 }
 0x12b   : > { %v838_v41 = vadd.f32 %v837_v39, %v1622_v40  ;;  %v906_v42 = vadd.f32 %v905_v38, %v875_v59 }
 0x12d   : > { %v907_v43 = vadd.f32 %v906_v42, %v876_v12  ;;  %v839_v48 = vadd.f32 %v838_v41, %v1629_v45  ;;  %v881_v45 = vmul.f32 %v643_v19, %v643_v19 }
 0x12f   : > { %v840_v46 = vadd.f32 %v1619_v13, %v839_v48  ;;  %v908_v11 = vadd.f32 %v907_v43, %v877_v5 }
 0x131   : > { %v909_v47 = vadd.f32 %v908_v11, %v878_v23  ;;  %v841_v40 = vadd.f32 %v1625_v44, %v840_v46 }
 0x133   : > { %v842_v50 = vadd.f32 %v841_v40, %v640_v3  ;;  %v910_v51 = vadd.f32 %v909_v47, %v879_v26 }
 0x135   : > { %v911_v52 = vadd.f32 %v910_v51, %v880_v49  ;;  %v843_v53 = vadd.f32 %v842_v50, %v643_v19 }
 0x137   : > { %v844_v57 = vadd.f32 %v1343_v2, %v843_v53  ;;  %v912_v58 = vadd.f32 %v911_v52, %v881_v45 }
 0x139   : > { %v845_v13 = vadd.f32 %v1344_v14, %v844_v57  ;;  %v913_v62 = vadd.f32 %v912_v58, %v882_v56 }
 0x13b   : > { %v846_v63 = vrot.slane %v845_v13, 4  ;;  %v914_v0 = vadd.f32 %v913_v62, %v883_v60 }
 0x13d   : > { %v847_v1 = vadd.f32 %v846_v63, %v845_v13  ;;  %v915_v6 = vrot.slane %v914_v0, 4 }
 0x13f   : > { %v848_v8 = vrot.slane %v847_v1, 2  ;;  %v916_v44 = vadd.f32 %v915_v6, %v914_v0 }
 0x141   : > { %v849_v3 = vadd.f32 %v848_v8, %v847_v1  ;;  %v917_v9 = vrot.slane %v916_v44, 2 }
 0x143   : > { %v850_v17 = vrot.slane %v849_v3, 1  ;;  %v918_v18 = vadd.f32 %v917_v9, %v916_v44 }
 0x145   : > { %v919_v19 = vrot.slane %v918_v18, 1  ;;  %v851_v2 = vadd.f32 %v850_v17, %v849_v3 }
 0x147   : > { %v920_v21 = vadd.f32 %v919_v19, %v918_v18 }
 0x149   : > { %v922_v14 = vsel %vm921_vm0, %v851_v2, %v920_v21 }
 0x14a   : > { %v924_v22 = vsel %vm923_vm1, %v922_v14, 0.0 }
 0x14b   : > { %925 = vst [vmem:[%s238_s28] sm:$0xff] %v924_v22 }
 0x14c PF: > { %s16_s18 = sadd.s32 1, %s1383_s18  }
 0x14d   : > { %p13_p5 = scmp.ge.s32.totalorder %s16_s18, 4  }
 0x14f   :  { %15 = sbr.rel (!%p13_p5) target bundleno = 1 (0x1), region = 78 }

// kernel: bottleneck_forward.7
= control target key start
LH: loop header
LB: loop body
LE: loop exit
PB: predicated region body
PF: predicated region fallthrough
CT: control target
= control target key end

     0   :  { %s1126_s15 = smov 0   ;;  %s1279_s0 = inlined_call_operand.vmem [shape: bf16[512,128], index: 0, kind: input, shape index: {}]   ;;  %s1280_s1 = inlined_call_operand.vmem [shape: bf16[512,128], index: 1, kind: input, shape index: {}]   ;;  %s1281_s2 = inlined_call_operand.vmem [shape: f32[1,128], index: 2, kind: input, shape index: {}]   ;;  %s1282_s3 = inlined_call_operand.vmem [shape: f32[1,128], index: 3, kind: input, shape index: {}]   ;;  %s1283_s4 = inlined_call_operand.vmem [shape: bf16[512,128], index: 4, kind: output, shape index: {}]  }
   0x1 LB: > { %s753_s16 = sadd.s32 4294967295, %s1099_s15   ;;  %p757_p0 = scmp.ge.s32.totalorder %s1099_s15, 1  ;;  %s1099_s15 = sphi %s1126_s15, %s14_s15  }
   0x2   : > { %p174_p1 = scmp.lt.s32.totalorder %s1099_s15, 3 }
   0x4   : > { %p175_p2 = pnand %p757_p0, %p174_p1 }
   0x5   : > { %s758_s17 = sshll.u32 (!%p175_p2), %s753_s16, 5  ;;  %v1151_v0 = vld [vmem:[%s1281_s2] ss:$0 sm:$0xff] (!%p175_p2) }
   0x6   : > { %178 = sbr.rel (%p175_p2) target bundleno = 85 (0x55), region = 36  ;;  %p206_p3 = scmp.lt.s32.totalorder (!%p175_p2), %s758_s17, 63  ;;  %v1162_v11 = vld [vmem:[%s1282_s3] ss:$0 sm:$0xff] (!%p175_p2) }
   0xd   : > { %s1285_s17 = smov (!%p206_p3, %s758_s17), 63 }
   0xe   : > { %s1134_s18 = sshll.u32 %s1285_s17, 2 }
   0xf   : > { %s1140_s21 = scalar_lea.vmem %s1279_s0, %s1134_s18  ;;  %s1146_s24 = scalar_lea.vmem %s1280_s1, %s1134_s18 }
  0x10   : > { %v833_v1 = vld [vmem:[%s1140_s21] sm:$0xff]   ;;  %v1040_v3 = vld [vmem:[%s1140_s21 + $0x8] sm:$0xff]   ;;  %v1041_v9 = vld [vmem:[%s1140_s21 + $0x10] sm:$0xff]   ;;  %s1185_s5 = scalar_lea.vmem %s1283_s4, %s1134_s18 }
  0x11   : > { %v897_v2 = vld [vmem:[%s1146_s24] sm:$0xff]   ;;  %v834_v4 = vunpack.c.l.bf16 %v833_v1  ;;  %v835_v5 = vunpack.c.h.bf16 %v833_v1  ;;  %v1055_v8 = vld [vmem:[%s1146_s24 + $0x8] sm:$0xff]   ;;  %v1056_v10 = vld [vmem:[%s1146_s24 + $0x10] sm:$0xff]   ;;  %v838_v12 = vunpack.c.l.bf16 %v1040_v3  ;;  %v839_v13 = vunpack.c.h.bf16 %v1040_v3 }
  0x12   : > { %v898_v6 = vunpack.c.l.bf16 %v897_v2  ;;  %v899_v7 = vunpack.c.h.bf16 %v897_v2  ;;  %v902_v14 = vunpack.c.l.bf16 %v1055_v8  ;;  %v903_v15 = vunpack.c.h.bf16 %v1055_v8  ;;  %v1042_v20 = vld [vmem:[%s1140_s21 + $0x18] sm:$0xff]   ;;  %v1043_v50 = vld [vmem:[%s1140_s21 + $0x20] sm:$0xff]   ;;  %v1044_v1 = vld [vmem:[%s1140_s21 + $0x28] sm:$0xff]  }
  0x13   : > { %v358_v16 = vmul.f32 %v834_v4, %v1151_v0  ;;  %v359_v17 = vmul.f32 %v835_v5, %v1151_v0  ;;  %v842_v18 = vunpack.c.l.bf16 %v1041_v9  ;;  %v843_v19 = vunpack.c.h.bf16 %v1041_v9  ;;  %v1057_v29 = vld [vmem:[%s1146_s24 + $0x18] sm:$0xff]   ;;  %v1058_v59 = vld [vmem:[%s1146_s24 + $0x20] sm:$0xff]  }
  0x14   : > { %v360_v21 = vmul.f32 %v838_v12, %v1151_v0  ;;  %v361_v22 = vmul.f32 %v839_v13, %v1151_v0  ;;  %v906_v23 = vunpack.c.l.bf16 %v1056_v10  ;;  %v907_v24 = vunpack.c.h.bf16 %v1056_v10 }
  0x15   : > { %v397_v25 = vadd.f32 %v1162_v11, %v358_v16  ;;  %v398_v26 = vadd.f32 %v1162_v11, %v359_v17  ;;  %v362_v27 = vmul.f32 %v842_v18, %v1151_v0  ;;  %v363_v28 = vmul.f32 %v843_v19, %v1151_v0  ;;  %v1045_v16 = vld [vmem:[%s1140_s21 + $0x30] sm:$0xff]  }
  0x16   : > { %v399_v30 = vadd.f32 %v1162_v11, %v360_v21  ;;  %v400_v31 = vadd.f32 %v1162_v11, %v361_v22  ;;  %v846_v32 = vunpack.c.l.bf16 %v1042_v20  ;;  %v847_v33 = vunpack.c.h.bf16 %v1042_v20  ;;  %v1060_v21 = vld [vmem:[%s1146_s24 + $0x30] sm:$0xff]  }
  0x17   : > { %v429_v34 = vmax.f32 %v397_v25, 0.0  ;;  %v430_v35 = vmax.f32 %v398_v26, 0.0  ;;  %v401_v36 = vadd.f32 %v1162_v11, %v362_v27  ;;  %v402_v37 = vadd.f32 %v1162_v11, %v363_v28 }
  0x18   : > { %v431_v38 = vmax.f32 %v399_v30, 0.0  ;;  %v432_v39 = vmax.f32 %v400_v31, 0.0  ;;  %v910_v40 = vunpack.c.l.bf16 %v1057_v29  ;;  %v911_v41 = vunpack.c.h.bf16 %v1057_v29  ;;  %v1046_v30 = vld [vmem:[%s1140_s21 + $0x38] sm:$0xff]  }
  0x19   : > { %v461_v42 = vadd.f32 %v898_v6, %v429_v34  ;;  %v462_v43 = vadd.f32 %v899_v7, %v430_v35  ;;  %v433_v44 = vmax.f32 %v401_v36, 0.0  ;;  %v434_v45 = vmax.f32 %v402_v37, 0.0  ;;  %v1059_v6 = vld [vmem:[%s1146_s24 + $0x28] sm:$0xff]  }
  0x1a   : > { %v463_v46 = vadd.f32 %v902_v14, %v431_v38  ;;  %v464_v47 = vadd.f32 %v903_v15, %v432_v39  ;;  %v364_v48 = vmul.f32 %v846_v32, %v1151_v0  ;;  %v365_v49 = vmul.f32 %v847_v33, %v1151_v0  ;;  %v1061_v39 = vld [vmem:[%s1146_s24 + $0x38] sm:$0xff]  }
  0x1b   : > { %v493_v51 = vmax.f32 %v461_v42, 0.0  ;;  %v494_v52 = vmax.f32 %v462_v43, 0.0  ;;  %v465_v53 = vadd.f32 %v906_v23, %v433_v44  ;;  %v466_v54 = vadd.f32 %v907_v24, %v434_v45 }
  0x1c   : > { %v495_v55 = vmax.f32 %v463_v46, 0.0  ;;  %v496_v56 = vmax.f32 %v464_v47, 0.0  ;;  %v403_v57 = vadd.f32 %v1162_v11, %v364_v48  ;;  %v404_v58 = vadd.f32 %v1162_v11, %v365_v49 }
  0x1d   : > { %v963_v60 = vpack.c.bf16 %v494_v52, %v493_v51  ;;  %v497_v61 = vmax.f32 %v465_v53, 0.0  ;;  %v498_v62 = vmax.f32 %v466_v54, 0.0  ;;  %v850_v63 = vunpack.c.l.bf16 %v1043_v50  ;;  %v1047_v52 = vld [vmem:[%s1140_s21 + $0x40] sm:$0xff]  }
  0x1e   : > { %v968_v2 = vpack.c.bf16 %v496_v56, %v495_v55  ;;  %v435_v3 = vmax.f32 %v403_v57, 0.0  ;;  %v436_v4 = vmax.f32 %v404_v58, 0.0  ;;  %v851_v5 = vunpack.c.h.bf16 %v1043_v50  ;;  %v1062_v57 = vld [vmem:[%s1146_s24 + $0x40] sm:$0xff]  }
  0x1f   : > { %964 = vst [vmem:[%s1185_s5] sm:$0xff] %v963_v60   ;;  %v973_v7 = vpack.c.bf16 %v498_v62, %v497_v61  ;;  %v914_v8 = vunpack.c.l.bf16 %v1058_v59  ;;  %v915_v9 = vunpack.c.h.bf16 %v1058_v59  ;;  %v366_v10 = vmul.f32 %v850_v63, %v1151_v0 }
  0x20   : > { %1070 = vst [vmem:[%s1185_s5 + $0x8] sm:$0xff] %v968_v2   ;;  %v467_v12 = vadd.f32 %v910_v40, %v435_v3  ;;  %v468_v13 = vadd.f32 %v911_v41, %v436_v4  ;;  %v367_v14 = vmul.f32 %v851_v5, %v1151_v0  ;;  %v854_v15 = vunpack.c.l.bf16 %v1044_v1 }
  0x21   : > { %1071 = vst [vmem:[%s1185_s5 + $0x10] sm:$0xff] %v973_v7   ;;  %v405_v17 = vadd.f32 %v1162_v11, %v366_v10  ;;  %v855_v18 = vunpack.c.h.bf16 %v1044_v1  ;;  %v918_v19 = vunpack.c.l.bf16 %v1059_v6  ;;  %v919_v20 = vunpack.c.h.bf16 %v1059_v6  ;;  %v1048_v7 = vld [vmem:[%s1140_s21 + $0x48] sm:$0xff]  }
  0x22   : > { %v499_v22 = vmax.f32 %v467_v12, 0.0  ;;  %v500_v23 = vmax.f32 %v468_v13, 0.0  ;;  %v406_v24 = vadd.f32 %v1162_v11, %v367_v14  ;;  %v368_v25 = vmul.f32 %v854_v15, %v1151_v0 }
  0x23   : > { %v437_v26 = vmax.f32 %v405_v17, 0.0  ;;  %v369_v27 = vmul.f32 %v855_v18, %v1151_v0  ;;  %v858_v28 = vunpack.c.l.bf16 %v1045_v16  ;;  %v859_v29 = vunpack.c.h.bf16 %v1045_v16 }
  0x24   : > { %v978_v31 = vpack.c.bf16 %v500_v23, %v499_v22  ;;  %v438_v32 = vmax.f32 %v406_v24, 0.0  ;;  %v407_v33 = vadd.f32 %v1162_v11, %v368_v25  ;;  %v922_v34 = vunpack.c.l.bf16 %v1060_v21  ;;  %v1049_v22 = vld [vmem:[%s1140_s21 + $0x50] sm:$0xff]  }
  0x25   : > { %v469_v35 = vadd.f32 %v914_v8, %v437_v26  ;;  %v408_v36 = vadd.f32 %v1162_v11, %v369_v27  ;;  %v923_v37 = vunpack.c.h.bf16 %v1060_v21  ;;  %v370_v38 = vmul.f32 %v858_v28, %v1151_v0  ;;  %v1063_v8 = vld [vmem:[%s1146_s24 + $0x48] sm:$0xff]   ;;  %v1064_v27 = vld [vmem:[%s1146_s24 + $0x50] sm:$0xff]  }
  0x26   : > { %1072 = vst [vmem:[%s1185_s5 + $0x18] sm:$0xff] %v978_v31   ;;  %v470_v40 = vadd.f32 %v915_v9, %v438_v32  ;;  %v439_v41 = vmax.f32 %v407_v33, 0.0  ;;  %v371_v42 = vmul.f32 %v859_v29, %v1151_v0  ;;  %v862_v43 = vunpack.c.l.bf16 %v1046_v30 }
  0x27   : > { %v501_v44 = vmax.f32 %v469_v35, 0.0  ;;  %v440_v45 = vmax.f32 %v408_v36, 0.0  ;;  %v409_v46 = vadd.f32 %v1162_v11, %v370_v38  ;;  %v863_v47 = vunpack.c.h.bf16 %v1046_v30 }
  0x28   : > { %v502_v48 = vmax.f32 %v470_v40, 0.0  ;;  %v471_v49 = vadd.f32 %v918_v19, %v439_v41  ;;  %v410_v50 = vadd.f32 %v1162_v11, %v371_v42  ;;  %v926_v51 = vunpack.c.l.bf16 %v1061_v39  ;;  %v1050_v40 = vld [vmem:[%s1140_s21 + $0x58] sm:$0xff]  }
  0x29   : > { %v472_v53 = vadd.f32 %v919_v20, %v440_v45  ;;  %v441_v54 = vmax.f32 %v409_v46, 0.0  ;;  %v927_v55 = vunpack.c.h.bf16 %v1061_v39  ;;  %v372_v56 = vmul.f32 %v862_v43, %v1151_v0 }
  0x2a   : > { %v983_v58 = vpack.c.bf16 %v502_v48, %v501_v44  ;;  %v503_v59 = vmax.f32 %v471_v49, 0.0  ;;  %v442_v60 = vmax.f32 %v410_v50, 0.0  ;;  %v373_v61 = vmul.f32 %v863_v47, %v1151_v0  ;;  %v1065_v49 = vld [vmem:[%s1146_s24 + $0x58] sm:$0xff]  }
  0x2b   : > { %v504_v62 = vmax.f32 %v472_v53, 0.0  ;;  %v473_v63 = vadd.f32 %v922_v34, %v441_v54  ;;  %v411_v1 = vadd.f32 %v1162_v11, %v372_v56  ;;  %v866_v2 = vunpack.c.l.bf16 %v1047_v52 }
  0x2c   : > { %1073 = vst [vmem:[%s1185_s5 + $0x20] sm:$0xff] %v983_v58   ;;  %v474_v3 = vadd.f32 %v923_v37, %v442_v60  ;;  %v412_v4 = vadd.f32 %v1162_v11, %v373_v61  ;;  %v867_v5 = vunpack.c.h.bf16 %v1047_v52  ;;  %v930_v6 = vunpack.c.l.bf16 %v1062_v57  ;;  %v1051_v58 = vld [vmem:[%s1140_s21 + $0x60] sm:$0xff]  }
  0x2d   : > { %v988_v9 = vpack.c.bf16 %v504_v62, %v503_v59  ;;  %v505_v10 = vmax.f32 %v473_v63, 0.0  ;;  %v443_v12 = vmax.f32 %v411_v1, 0.0  ;;  %v931_v13 = vunpack.c.h.bf16 %v1062_v57 }
  0x2e   : > { %v506_v14 = vmax.f32 %v474_v3, 0.0  ;;  %v444_v15 = vmax.f32 %v412_v4, 0.0  ;;  %v374_v16 = vmul.f32 %v866_v2, %v1151_v0  ;;  %v375_v17 = vmul.f32 %v867_v5, %v1151_v0  ;;  %v1066_v3 = vld [vmem:[%s1146_s24 + $0x60] sm:$0xff]  }
  0x2f   : > { %1074 = vst [vmem:[%s1185_s5 + $0x28] sm:$0xff] %v988_v9   ;;  %v475_v18 = vadd.f32 %v926_v51, %v443_v12  ;;  %v870_v19 = vunpack.c.l.bf16 %v1048_v7  ;;  %v871_v20 = vunpack.c.h.bf16 %v1048_v7  ;;  %v934_v21 = vunpack.c.l.bf16 %v1063_v8 }
  0x30   : > { %v993_v23 = vpack.c.bf16 %v506_v14, %v505_v10  ;;  %v476_v24 = vadd.f32 %v927_v55, %v444_v15  ;;  %v413_v25 = vadd.f32 %v1162_v11, %v374_v16  ;;  %v414_v26 = vadd.f32 %v1162_v11, %v375_v17 }
  0x31   : > { %v507_v28 = vmax.f32 %v475_v18, 0.0  ;;  %v935_v29 = vunpack.c.h.bf16 %v1063_v8  ;;  %v376_v30 = vmul.f32 %v870_v19, %v1151_v0  ;;  %v377_v31 = vmul.f32 %v871_v20, %v1151_v0  ;;  %v1052_v8 = vld [vmem:[%s1140_s21 + $0x68] sm:$0xff]  }
  0x32   : > { %1075 = vst [vmem:[%s1185_s5 + $0x30] sm:$0xff] %v993_v23   ;;  %v508_v32 = vmax.f32 %v476_v24, 0.0  ;;  %v445_v33 = vmax.f32 %v413_v25, 0.0  ;;  %v446_v34 = vmax.f32 %v414_v26, 0.0  ;;  %v874_v35 = vunpack.c.l.bf16 %v1049_v22  ;;  %v1067_v18 = vld [vmem:[%s1146_s24 + $0x68] sm:$0xff]  }
  0x33   : > { %v415_v36 = vadd.f32 %v1162_v11, %v376_v30  ;;  %v416_v37 = vadd.f32 %v1162_v11, %v377_v31  ;;  %v875_v38 = vunpack.c.h.bf16 %v1049_v22  ;;  %v938_v39 = vunpack.c.l.bf16 %v1064_v27 }
  0x34   : > { %v998_v41 = vpack.c.bf16 %v508_v32, %v507_v28  ;;  %v477_v42 = vadd.f32 %v930_v6, %v445_v33  ;;  %v478_v43 = vadd.f32 %v931_v13, %v446_v34  ;;  %v939_v44 = vunpack.c.h.bf16 %v1064_v27  ;;  %v1053_v27 = vld [vmem:[%s1140_s21 + $0x70] sm:$0xff]  }
  0x35   : > { %v447_v45 = vmax.f32 %v415_v36, 0.0  ;;  %v448_v46 = vmax.f32 %v416_v37, 0.0  ;;  %v378_v47 = vmul.f32 %v874_v35, %v1151_v0  ;;  %v379_v48 = vmul.f32 %v875_v38, %v1151_v0  ;;  %v1068_v36 = vld [vmem:[%s1146_s24 + $0x70] sm:$0xff]  }
  0x36   : > { %1076 = vst [vmem:[%s1185_s5 + $0x38] sm:$0xff] %v998_v41   ;;  %v509_v50 = vmax.f32 %v477_v42, 0.0  ;;  %v510_v51 = vmax.f32 %v478_v43, 0.0  ;;  %v878_v52 = vunpack.c.l.bf16 %v1050_v40  ;;  %v879_v53 = vunpack.c.h.bf16 %v1050_v40 }
  0x37   : > { %v479_v54 = vadd.f32 %v934_v21, %v447_v45  ;;  %v480_v55 = vadd.f32 %v935_v29, %v448_v46  ;;  %v417_v56 = vadd.f32 %v1162_v11, %v378_v47  ;;  %v418_v57 = vadd.f32 %v1162_v11, %v379_v48  ;;  %v1054_v45 = vld [vmem:[%s1140_s21 + $0x78] sm:$0xff]  }
  0x38   : > { %v1003_v59 = vpack.c.bf16 %v510_v51, %v509_v50  ;;  %v942_v60 = vunpack.c.l.bf16 %v1065_v49  ;;  %v380_v61 = vmul.f32 %v878_v52, %v1151_v0  ;;  %v381_v4 = vmul.f32 %v879_v53, %v1151_v0 }
  0x39   : > { %v511_v62 = vmax.f32 %v479_v54, 0.0  ;;  %v512_v63 = vmax.f32 %v480_v55, 0.0  ;;  %v449_v1 = vmax.f32 %v417_v56, 0.0  ;;  %v450_v2 = vmax.f32 %v418_v57, 0.0 }
  0x3a   : > { %1077 = vst [vmem:[%s1185_s5 + $0x40] sm:$0xff] %v1003_v59   ;;  %v419_v5 = vadd.f32 %v1162_v11, %v380_v61  ;;  %v882_v6 = vunpack.c.l.bf16 %v1051_v58  ;;  %v883_v7 = vunpack.c.h.bf16 %v1051_v58  ;;  %v943_v13 = vunpack.c.h.bf16 %v1065_v49 }
  0x3b   : > { %v1008_v9 = vpack.c.bf16 %v512_v63, %v511_v62  ;;  %v481_v10 = vadd.f32 %v938_v39, %v449_v1  ;;  %v482_v12 = vadd.f32 %v939_v44, %v450_v2  ;;  %v420_v14 = vadd.f32 %v1162_v11, %v381_v4  ;;  %v1069_v62 = vld [vmem:[%s1146_s24 + $0x78] sm:$0xff]  }
  0x3c   : > { %v451_v15 = vmax.f32 %v419_v5, 0.0  ;;  %v946_v16 = vunpack.c.l.bf16 %v1066_v3  ;;  %v382_v17 = vmul.f32 %v882_v6, %v1151_v0  ;;  %v383_v21 = vmul.f32 %v883_v7, %v1151_v0 }
  0x3d   : > { %1078 = vst [vmem:[%s1185_s5 + $0x48] sm:$0xff] %v1008_v9   ;;  %v513_v19 = vmax.f32 %v481_v10, 0.0  ;;  %v514_v20 = vmax.f32 %v482_v12, 0.0  ;;  %v886_v22 = vunpack.c.l.bf16 %v1052_v8  ;;  %v452_v23 = vmax.f32 %v420_v14, 0.0 }
  0x3e   : > { %v483_v24 = vadd.f32 %v942_v60, %v451_v15  ;;  %v421_v25 = vadd.f32 %v1162_v11, %v382_v17  ;;  %v887_v26 = vunpack.c.h.bf16 %v1052_v8  ;;  %v947_v29 = vunpack.c.h.bf16 %v1066_v3 }
  0x3f   : > { %v1013_v28 = vpack.c.bf16 %v514_v20, %v513_v19  ;;  %v422_v30 = vadd.f32 %v1162_v11, %v383_v21  ;;  %v950_v31 = vunpack.c.l.bf16 %v1067_v18  ;;  %v484_v32 = vadd.f32 %v943_v13, %v452_v23 }
  0x40   : > { %v515_v33 = vmax.f32 %v483_v24, 0.0  ;;  %v453_v34 = vmax.f32 %v421_v25, 0.0  ;;  %v384_v35 = vmul.f32 %v886_v22, %v1151_v0  ;;  %v385_v38 = vmul.f32 %v887_v26, %v1151_v0 }
  0x41   : > { %1079 = vst [vmem:[%s1185_s5 + $0x50] sm:$0xff] %v1013_v28   ;;  %v454_v37 = vmax.f32 %v422_v30, 0.0  ;;  %v890_v39 = vunpack.c.l.bf16 %v1053_v27  ;;  %v891_v40 = vunpack.c.h.bf16 %v1053_v27  ;;  %v516_v41 = vmax.f32 %v484_v32, 0.0 }
  0x42   : > { %v485_v42 = vadd.f32 %v946_v16, %v453_v34  ;;  %v951_v43 = vunpack.c.h.bf16 %v1067_v18  ;;  %v423_v44 = vadd.f32 %v1162_v11, %v384_v35  ;;  %v424_v47 = vadd.f32 %v1162_v11, %v385_v38 }
  0x43   : > { %v486_v46 = vadd.f32 %v947_v29, %v454_v37  ;;  %v954_v48 = vunpack.c.l.bf16 %v1068_v36  ;;  %v386_v49 = vmul.f32 %v890_v39, %v1151_v0  ;;  %v1018_v50 = vpack.c.bf16 %v516_v41, %v515_v33 }
  0x44   : > { %v517_v51 = vmax.f32 %v485_v42, 0.0  ;;  %v455_v52 = vmax.f32 %v423_v44, 0.0  ;;  %v387_v53 = vmul.f32 %v891_v40, %v1151_v0  ;;  %v456_v55 = vmax.f32 %v424_v47, 0.0 }
  0x45   : > { %v518_v54 = vmax.f32 %v486_v46, 0.0  ;;  %v425_v56 = vadd.f32 %v1162_v11, %v386_v49  ;;  %v894_v57 = vunpack.c.l.bf16 %v1054_v45  ;;  %1080 = vst [vmem:[%s1185_s5 + $0x58] sm:$0xff] %v1018_v50   ;;  %v955_v59 = vunpack.c.h.bf16 %v1068_v36 }
  0x46   : > { %v487_v58 = vadd.f32 %v950_v31, %v455_v52  ;;  %v426_v60 = vadd.f32 %v1162_v11, %v387_v53  ;;  %v895_v61 = vunpack.c.h.bf16 %v1054_v45  ;;  %v488_v1 = vadd.f32 %v951_v43, %v456_v55 }
  0x47   : > { %v1023_v63 = vpack.c.bf16 %v518_v54, %v517_v51  ;;  %v457_v2 = vmax.f32 %v425_v56, 0.0  ;;  %v388_v5 = vmul.f32 %v894_v57, %v1151_v0  ;;  %v958_v9 = vunpack.c.l.bf16 %v1069_v62 }
  0x48   : > { %v519_v3 = vmax.f32 %v487_v58, 0.0  ;;  %v458_v4 = vmax.f32 %v426_v60, 0.0  ;;  %v389_v6 = vmul.f32 %v895_v61, %v1151_v0  ;;  %v520_v7 = vmax.f32 %v488_v1, 0.0 }
  0x49   : > { %1081 = vst [vmem:[%s1185_s5 + $0x60] sm:$0xff] %v1023_v63   ;;  %v489_v8 = vadd.f32 %v954_v48, %v457_v2  ;;  %v959_v12 = vunpack.c.h.bf16 %v1069_v62  ;;  %v427_v13 = vadd.f32 %v1162_v11, %v388_v5 }
  0x4a   : > { %v490_v10 = vadd.f32 %v955_v59, %v458_v4  ;;  %v428_v14 = vadd.f32 %v1162_v11, %v389_v6  ;;  %v1028_v15 = vpack.c.bf16 %v520_v7, %v519_v3 }
  0x4b   : > { %v521_v16 = vmax.f32 %v489_v8, 0.0  ;;  %v459_v18 = vmax.f32 %v427_v13, 0.0 }
  0x4c   : > { %v522_v17 = vmax.f32 %v490_v10, 0.0  ;;  %v460_v19 = vmax.f32 %v428_v14, 0.0  ;;  %1082 = vst [vmem:[%s1185_s5 + $0x68] sm:$0xff] %v1028_v15  }
  0x4d   : > { %v491_v0 = vadd.f32 %v958_v9, %v459_v18 }
  0x4e   : > { %v1033_v20 = vpack.c.bf16 %v522_v17, %v521_v16  ;;  %v492_v21 = vadd.f32 %v959_v12, %v460_v19 }
  0x4f   : > { %v523_v22 = vmax.f32 %v491_v0, 0.0 }
  0x50   : > { %1083 = vst [vmem:[%s1185_s5 + $0x70] sm:$0xff] %v1033_v20   ;;  %v524_v23 = vmax.f32 %v492_v21, 0.0 }
  0x52   : > { %v1038_v24 = vpack.c.bf16 %v524_v23, %v523_v22 }
  0x54   : > { %1084 = vst [vmem:[%s1185_s5 + $0x78] sm:$0xff] %v1038_v24  }
  0x55 PF: > { %s14_s15 = sadd.s32 1, %s1099_s15  }
  0x56   : > { %p11_p4 = scmp.ge.s32.totalorder %s14_s15, 4  }
  0x58   :  { %13 = sbr.rel (!%p11_p4) target bundleno = 1 (0x1), region = 69 }

// kernel: bottleneck_forward.5
= control target key start
LH: loop header
LB: loop body
LE: loop exit
PB: predicated region body
PF: predicated region fallthrough
CT: control target
= control target key end

     0   :  { %s7473_s18 = smov 0   ;;  %s7475_s19 = smov 0   ;;  %s9114_s0 = inlined_call_operand.vmem [shape: bf16[2,16,16,128], index: 0, kind: input, shape index: {}]   ;;  %s9115_s1 = inlined_call_operand.vmem [shape: bf16[3,3,128,128], index: 1, kind: input, shape index: {}]   ;;  %s9116_s2 = inlined_call_operand.vmem [shape: f32[1,128], index: 2, kind: input, shape index: {}]   ;;  %s9117_s3 = inlined_call_operand.vmem [shape: f32[1,128], index: 3, kind: input, shape index: {}]   ;;  %s9118_s4 = inlined_call_operand.vmem [shape: bf16[2,16,16,128], index: 4, kind: output, shape index: {0}]   ;;  %s9119_s5 = inlined_call_operand.vmem [shape: f32[2,1,8,128], index: 5, kind: output, shape index: {1}]  }
   0x1   :  { %s7477_s20 = smov 0  }
   0x2 LB: > { %s28_s21 = sadd.s32 1, %s7433_s19  ;;  %p5311_p0 = scmp.ge.s32.totalorder %s7437_s20, 1  ;;  %s7437_s20 = sphi %s7477_s20, %s16_s20   ;;  %s7433_s19 = sphi %s7475_s19, %s9453_s19   ;;  %s7429_s18 = sphi %s7473_s18, %s9452_s18  }
   0x3   : > { %p30_p1 = scmp.ge.s32.totalorder %s28_s21, 2  ;;  %p206_p2 = scmp.lt.s32.totalorder %s7437_s20, 3 }
   0x5   : > { %s9455_s21 = smov (%p30_p1, %s28_s21), 0  ;;  %p207_p3 = pnand %p5311_p0, %p206_p2 }
   0x7   : > { %210 = sbr.rel (%p207_p3) target bundleno = 723 (0x2d3), region = 36 }
   0xe   : > { %v7333_v0 = vld [vmem:[%s9115_s1 + $0x40] sm:$0xff]   ;;  %v7335_v2 = vld [vmem:[%s9115_s1 + $0x48] sm:$0xff]   ;;  %p246_p4 = scmp.lt.s32.totalorder %s7429_s18, 1  ;;  %v7337_v4 = vld [vmem:[%s9115_s1 + $0x50] sm:$0xff]   ;;  %vm314_vm0 = vcmask 1040384   ;;  %v7439_v6 = vmov 0.0  }
   0xf   : > { %v7334_v1 = vld [vmem:[%s9115_s1 + $0x100] sm:$0xff]   ;;  %6345 = vmatprep.subr.bf16.mxu1 %v7333_v0  ;;  %v7336_v3 = vld [vmem:[%s9115_s1 + $0x108] sm:$0xff]   ;;  %v7338_v5 = vld [vmem:[%s9115_s1 + $0x110] sm:$0xff]   ;;  %v7509_v7 = vrot.slane %v7439_v6, 7  ;;  %vm1113_vm1 = vsmask.f32 7424 }
  0x10   : > { %6601 = vmatprep.subr.bf16.mxu0 %v7334_v1  ;;  %6346 = vmatpush3.bf16.msra.mxu1 %v7333_v0  ;;  %s9457_s18 = smov (!%p246_p4, %s7429_s18), 1  ;;  %v7339_v9 = vld [vmem:[%s9115_s1 + $0x58] sm:$0xff]   ;;  %v7341_v12 = vld [vmem:[%s9115_s1 + $0x60] sm:$0xff]   ;;  %v7343_v15 = vld [vmem:[%s9115_s1 + $0x68] sm:$0xff]   ;;  %vm1890_vm2 = vcmask 1046528   ;;  %vm7440_vm4 = vmmov 1  }
  0x11   : > { %6602 = vmatpush3.bf16.msra.mxu0 %v7334_v1  ;;  %6347 = vmatprep.subr.bf16.mxu1 %v7335_v2  ;;  %v7515_v8 = vsel %vm314_vm0, 0.0, %v7509_v7  ;;  %v7340_v11 = vld [vmem:[%s9115_s1 + $0x118] sm:$0xff]   ;;  %s5585_s13 = sshll.u32 %s9457_s18, 7  ;;  %v7342_v14 = vld [vmem:[%s9115_s1 + $0x120] sm:$0xff]   ;;  %v7344_v16 = vld [vmem:[%s9115_s1 + $0x128] sm:$0xff]   ;;  %v7568_v30 = vsel %vm314_vm0, %v7509_v7, 0.0 }
  0x12   : > { %6603 = vmatprep.subr.bf16.mxu0 %v7336_v3  ;;  %9245 = vst [vmem:[#allocation3_spill] sm:$0xff] %v7515_v8  ;;  %v7522_v10 = vpack.c.bf16 %v7509_v7, %v7515_v8  ;;  %s7540_s24 = scalar_lea.vmem %s9114_s0, %s5585_s13  ;;  %v7551_v17 = vld [vmem:[%s9116_s2] ss:$0 sm:$0xff]  ;;  %v7345_v29 = vld [vmem:[%s9115_s1 + $0x70] sm:$0xff]   ;;  %9247 = vst [vmem:[#allocation5_spill] sm:$0xff] %v7568_v30  ;;  %s9074_s12 = scalar_lea.vmem %s9118_s4, %s5585_s13  ;;  %vm5140_vm8 = vcmask 1041408  }
  0x13   : > { %v5620_v18 = vld [vmem:[%s7540_s24] sm:$0xff]   ;;  %v5763_v24 = vld [vmem:[%s7540_s24 + $0x8] sm:$0xff]   ;;  %v5764_v34 = vld [vmem:[%s7540_s24 + $0x10] sm:$0xff]   ;;  %s5316_s13 = sshll.u32 %s9457_s18, 3 }
  0x14   : > { %6348 = vmatpush3.bf16.msra.mxu1 %v7335_v2  ;;  %9246 = vst [vmem:[#allocation4_spill] sm:$0xff] %v7522_v10  ;;  %v1117_v13 = vshll.u32 %v7522_v10, 16  ;;  %v1115_v19 = vshrl.u32 %v7522_v10, 16  ;;  %v7558_v21 = vld [vmem:[%s9117_s3] ss:$0 sm:$0xff]  ;;  %v5621_v22 = vunpack.c.l.bf16 %v5620_v18  ;;  %v5622_v23 = vunpack.c.h.bf16 %v5620_v18  ;;  %v5765_v35 = vld [vmem:[%s7540_s24 + $0x18] sm:$0xff]   ;;  %vm8319_vm3 = vmneg %vm314_vm0  ;;  %s268_s16 = scalar_lea.vmem %s9119_s5, %s5316_s13 }
  0x15   : > { %6604 = vmatpush3.bf16.msra.mxu0 %v7336_v3  ;;  %6349 = vmatprep.subr.bf16.mxu1 %v7337_v4  ;;  %v5625_v25 = vunpack.c.l.bf16 %v5763_v24  ;;  %v5626_v26 = vunpack.c.h.bf16 %v5763_v24  ;;  %v7346_v36 = vld [vmem:[%s9115_s1 + $0x130] sm:$0xff]   ;;  %v5629_v39 = vunpack.c.l.bf16 %v5764_v34  ;;  %v5630_v40 = vunpack.c.h.bf16 %v5764_v34  ;;  %v7347_v49 = vld [vmem:[%s9115_s1 + $0x78] sm:$0xff]   ;;  %vm8333_vm5 = vmpackc.low %vm7440_vm4, %vm8319_vm3 }
  0x16   : > { %6605 = vmatprep.subr.bf16.mxu0 %v7338_v5  ;;  %v1119_v20 = vrot.slane %v1117_v13, 1  ;;  %v341_v27 = vmul.f32 %v5621_v22, %v7551_v17  ;;  %v342_v28 = vmul.f32 %v5622_v23, %v7551_v17  ;;  %v5633_v43 = vunpack.c.l.bf16 %v5765_v35  ;;  %v7348_v50 = vld [vmem:[%s9115_s1 + $0x138] sm:$0xff]   ;;  %vm8357_vm6 = vmpackc.low %vm8319_vm3, %vm314_vm0 }
  0x17   : > { %v381_v32 = vmul.f32 %v5625_v25, %v7551_v17  ;;  %v382_v33 = vmul.f32 %v5626_v26, %v7551_v17  ;;  %v5634_v44 = vunpack.c.h.bf16 %v5765_v35  ;;  %v421_v47 = vmul.f32 %v5629_v39, %v7551_v17  ;;  %vm8365_vm7 = vmpackc.low %vm314_vm0, %vm7440_vm4 }
  0x18   : > { %6350 = vmatpush3.bf16.msra.mxu1 %v7337_v4  ;;  %v7570_v31 = vor.u32 %v1119_v20, %v1115_v19  ;;  %v343_v37 = vadd.f32 %v7558_v21, %v341_v27  ;;  %v344_v38 = vadd.f32 %v7558_v21, %v342_v28  ;;  %v422_v48 = vmul.f32 %v5630_v40, %v7551_v17 }
  0x19   : > { %6606 = vmatpush3.bf16.msra.mxu0 %v7338_v5  ;;  %6351 = vmatprep.subr.bf16.mxu1 %v7339_v9  ;;  %v383_v41 = vadd.f32 %v7558_v21, %v381_v32  ;;  %v384_v42 = vadd.f32 %v7558_v21, %v382_v33  ;;  %v461_v53 = vmul.f32 %v5633_v43, %v7551_v17 }
  0x1a   : > { %6607 = vmatprep.subr.bf16.mxu0 %v7340_v11  ;;  %v345_v45 = vmax.f32 %v343_v37, 0.0  ;;  %v346_v46 = vmax.f32 %v344_v38, 0.0  ;;  %v462_v54 = vmul.f32 %v5634_v44, %v7551_v17  ;;  %v423_v57 = vadd.f32 %v7558_v21, %v421_v47 }
  0x1b   : > { %v385_v51 = vmax.f32 %v383_v41, 0.0  ;;  %v386_v52 = vmax.f32 %v384_v42, 0.0  ;;  %v424_v58 = vadd.f32 %v7558_v21, %v422_v48  ;;  %v7604_v61 = vadd.f32 %v7558_v21, %v461_v53  ;;  %v7351_v42 = vld [vmem:[%s9115_s1 + $0x148] sm:$0xff]  }
  0x1c   : > { %6352 = vmatpush3.bf16.msra.mxu1 %v7339_v9  ;;  %v7593_v55 = vrot.slane %v345_v45, 7  ;;  %v7595_v56 = vrot.slane %v346_v46, 7  ;;  %v7607_v62 = vadd.f32 %v7558_v21, %v462_v54  ;;  %v425_v2 = vmax.f32 %v423_v57, 0.0  ;;  %v7349_v9 = vld [vmem:[%s9115_s1] sm:$0xff]   ;;  %v7352_v45 = vld [vmem:[%s9115_s1 + $0x8] sm:$0xff]  }
  0x1d   : > { %6608 = vmatpush3.bf16.msra.mxu0 %v7340_v11  ;;  %6353 = vmatprep.subr.bf16.mxu1 %v7341_v12  ;;  %v7599_v59 = vrot.slane %v385_v51, 7  ;;  %v7601_v60 = vrot.slane %v386_v52, 7 }
  0x1e   : > { %6609 = vmatprep.subr.bf16.mxu0 %v7342_v14  ;;  %v360_v63 = vsel %vm314_vm0, 0.0, %v7593_v55  ;;  %v7614_v0 = vsel %vm314_vm0, %v7593_v55, %v7595_v56  ;;  %v361_v1 = vsel %vm314_vm0, %v7595_v56, 0.0  ;;  %v7659_v35 = vrot.slane %v425_v2, 7 }
  0x1f   : > { %v7619_v3 = vpack.c.bf16 %v360_v63, %v7568_v30  ;;  %v400_v4 = vsel %vm314_vm0, 0.0, %v7599_v59  ;;  %v7624_v5 = vpack.c.bf16 %v7614_v0, %v360_v63  ;;  %v7627_v6 = vpack.c.bf16 %v361_v1, %v7614_v0  ;;  %v5766_v63 = vld [vmem:[%s7540_s24 + $0x20] sm:$0xff]  }
  0x20   : > { %6354 = vmatpush3.bf16.msra.mxu1 %v7341_v12  ;;  %v7632_v11 = vpack.c.bf16 %v400_v4, %v361_v1  ;;  %v7637_v12 = vsel %vm314_vm0, %v7599_v59, %v7601_v60  ;;  %v401_v13 = vsel %vm314_vm0, %v7601_v60, 0.0  ;;  %v440_v48 = vsel %vm314_vm0, 0.0, %v7659_v35  ;;  %v7355_v1 = vld [vmem:[%s9115_s1 + $0x10] sm:$0xff]  }
  0x21   : > { %6610 = vmatpush3.bf16.msra.mxu0 %v7342_v14  ;;  %6355 = vmatprep.subr.bf16.mxu1 %v7343_v15  ;;  %9248 = vst [vmem:[#allocation6_spill] sm:$0xff] %v7619_v3  ;;  %9249 = vst [vmem:[#allocation7_spill] sm:$0xff] %v7627_v6  ;;  %v7350_v14 = vld [vmem:[%s9115_s1 + $0x140] sm:$0xff]   ;;  %v2651_v18 = vshrl.u32 %v7624_v5, 16  ;;  %v2653_v19 = vshll.u32 %v7624_v5, 16  ;;  %v1126_v20 = vshrl.u32 %v7619_v3, 16  ;;  %v7651_v24 = vpack.c.bf16 %v401_v13, %v7637_v12 }
  0x22   : > { %6611 = vmatprep.subr.bf16.mxu0 %v7344_v16  ;;  %v2658_v22 = vshll.u32 %v7632_v11, 16  ;;  %v1130_v23 = vshll.u32 %v7627_v6, 16  ;;  %v2662_v25 = vshrl.u32 %v7632_v11, 16  ;;  %v7655_v28 = vpack.c.bf16 %v7637_v12, %v400_v4 }
  0x23   : > { %v2655_v27 = vrot.slane %v2653_v19, 1  ;;  %v2666_v34 = vshll.u32 %v7651_v24, 16  ;;  %v2670_v51 = vshrl.u32 %v7651_v24, 16  ;;  %v7683_v52 = vpack.c.bf16 %v440_v48, %v401_v13 }
  0x24   : > { %6356 = vmatpush3.bf16.msra.mxu1 %v7343_v15  ;;  %v426_v15 = vmax.f32 %v424_v58, 0.0  ;;  %9250 = vst [vmem:[#allocation8_spill] sm:$0xff] %v7655_v28  ;;  %v2660_v32 = vrot.slane %v2658_v22, 1  ;;  %v1132_v33 = vrot.slane %v1130_v23, 1  ;;  %v1138_v39 = vshll.u32 %v7655_v28, 16 }
  0x25   : > { %6612 = vmatpush3.bf16.msra.mxu0 %v7344_v16  ;;  %6357 = vmatprep.subr.bf16.mxu1 %v7345_v29  ;;  %v1122_v16 = vshll.u32 %v7619_v3, 16  ;;  %v2656_v37 = vor.u32 %v2655_v27, %v2651_v18  ;;  %v2668_v41 = vrot.slane %v2666_v34, 1  ;;  %9251 = vst [vmem:[#allocation9_spill] sm:$0xff] %v7683_v52  ;;  %v1142_v57 = vshrl.u32 %v7655_v28, 16 }
  0x26   : > { %6613 = vmatprep.subr.bf16.mxu0 %v7346_v36  ;;  %v2664_v40 = vor.u32 %v2662_v25, %v2660_v32  ;;  %v7667_v44 = vrot.slane %v426_v15, 7  ;;  %v1140_v47 = vrot.slane %v1138_v39, 1  ;;  %v1146_v4 = vshll.u32 %v7683_v52, 16 }
  0x27   : > { %v1124_v26 = vrot.slane %v1122_v16, 1  ;;  %v2672_v2 = vor.u32 %v2670_v51, %v2668_v41  ;;  %v1150_v19 = vshrl.u32 %v7683_v52, 16  ;;  %v466_v25 = vmax.f32 %v7607_v62, 0.0  ;;  %v7354_v62 = vld [vmem:[%s9115_s1 + $0x158] sm:$0xff]  }
  0x28   : > { %6358 = vmatpush3.bf16.msra.mxu1 %v7345_v29  ;;  %v1134_v29 = vshrl.u32 %v7627_v6, 16  ;;  %v441_v58 = vsel %vm314_vm0, %v7667_v44, 0.0  ;;  %v1144_v16 = vor.u32 %v1142_v57, %v1140_v47  ;;  %v1148_v22 = vrot.slane %v1146_v4, 1  ;;  %v7361_v57 = vld [vmem:[%s9115_s1 + $0x20] sm:$0xff]  }
  0x29   : > { %6614 = vmatpush3.bf16.msra.mxu0 %v7346_v36  ;;  %6359 = vmatprep.subr.bf16.mxu1 %v7347_v49  ;;  %v1125_v36 = vsel %vm1113_vm1, %v7570_v31, %v1124_v26  ;;  %v1128_v38 = vor.u32 %v1126_v20, %v1124_v26  ;;  %v2661_v31 = vsel %vm1113_vm1, %v2656_v37, %v2660_v32  ;;  %v7708_v20 = vld [vmem:[%s7540_s24 + $0x28] sm:$0xff]   ;;  %v5638_v32 = vunpack.c.h.bf16 %v5766_v63 }
  0x2a   : > { %6615 = vmatprep.subr.bf16.mxu0 %v7348_v50  ;;  %6361 = vmatprep.mubr.bf16.mxu1 %v1125_v36  ;;  %v1136_v43 = vor.u32 %v1134_v29, %v1132_v33  ;;  %v5637_v29 = vunpack.c.l.bf16 %v5766_v63  ;;  %v1152_v36 = vor.u32 %v1150_v19, %v1148_v22 }
  0x2b   : > { %v1133_v46 = vsel %vm1113_vm1, %v1128_v38, %v1132_v33  ;;  %6617 = vmatprep.mubr.bf16.mxu0 %v2661_v31  ;;  %v7716_v33 = vsel %vm1113_vm1, %v1144_v16, %v1148_v22 }
  0x2c   : > { %6360 = vmatpush3.bf16.msra.mxu1 %v7347_v49  ;;  %v2669_v49 = vsel %vm1113_vm1, %v2664_v40, %v2668_v41  ;;  %v1141_v53 = vsel %vm1113_vm1, %v1136_v43, %v1140_v47  ;;  %9253 = vst [vmem:[#allocation11_spill] sm:$0xff] %v7716_v33  ;;  %v7726_v41 = vrot.slane %v466_v25, 7  ;;  %v501_v31 = vmul.f32 %v5637_v29, %v7551_v17  ;;  %v5768_v47 = vld [vmem:[%s7540_s24 + $0x30] sm:$0xff]  }
  0x2d   : > { %6616 = vmatpush3.bf16.msra.mxu0 %v7348_v50  ;;  %6409 = vmatprep.subr.bf16.mxu1 %v7349_v9  ;;  %v7680_v50 = vsel %vm314_vm0, %v7659_v35, %v7667_v44  ;;  %v5645_v16 = vunpack.c.l.bf16 %v5768_v47 }
  0x2e   : > { %6665 = vmatprep.subr.bf16.mxu0 %v7350_v14  ;;  %v7687_v54 = vpack.c.bf16 %v7680_v50, %v440_v48  ;;  %v7699_v13 = vpack.c.bf16 %v441_v58, %v7680_v50  ;;  %v481_v51 = vsel %vm314_vm0, %v7726_v41, 0.0  ;;  %v503_v4 = vadd.f32 %v7558_v21, %v501_v31 }
  0x2f   : > { %6362 = vmatmul.mubr.bf16.vlgmr.msra.gmra.mrb[0].mxu1 %v1133_v46  ;;  %v5641_v46 = vunpack.c.l.bf16 %v7708_v20  ;;  %v5646_v31 = vunpack.c.h.bf16 %v5768_v47 }
  0x30   : > { %6618 = vmatmul.mubr.bf16.vlgmr.msra.gmra.mrb[0].mxu0 %v2669_v49  ;;  %6410 = vmatpush3.bf16.msra.mxu1 %v7349_v9  ;;  %v465_v9 = vmax.f32 %v7604_v61, 0.0  ;;  %9252 = vst [vmem:[#allocation10_spill] sm:$0xff] %v7699_v13  ;;  %v2674_v15 = vshll.u32 %v7687_v54, 16  ;;  %v2678_v18 = vshrl.u32 %v7687_v54, 16  ;;  %v1154_v23 = vshll.u32 %v7699_v13, 16 }
  0x31   : > { %6666 = vmatpush3.bf16.msra.mxu0 %v7350_v14  ;;  %6365 = vmatprep.mubr.bf16.mxu1 %v1141_v53  ;;  %v7353_v14 = vld [vmem:[%s9115_s1 + $0x150] sm:$0xff]   ;;  %v1158_v27 = vshrl.u32 %v7699_v13, 16  ;;  %v505_v22 = vmax.f32 %v503_v4, 0.0 }
  0x32   : > { %6667 = vmatprep.subr.bf16.mxu0 %v7351_v42  ;;  %6411 = vmatprep.subr.bf16.mxu1 %v7352_v45  ;;  %v7710_v61 = vrot.slane %v465_v9, 7  ;;  %v2676_v26 = vrot.slane %v2674_v15, 1  ;;  %v1156_v37 = vrot.slane %v1154_v23, 1  ;;  %v541_v15 = vmul.f32 %v5641_v46, %v7551_v17  ;;  %v7356_v23 = vld [vmem:[%s9115_s1 + $0x160] sm:$0xff]  }
  0x33   : > { %v581_v46 = vmul.f32 %v5645_v16, %v7551_v17 }
  0x34   : > { %6412 = vmatpush3.bf16.msra.mxu1 %v7352_v45  ;;  %v480_v34 = vsel %vm314_vm0, 0.0, %v7710_v61  ;;  %v2677_v38 = vsel %vm1113_vm1, %v2672_v2, %v2676_v26  ;;  %v2680_v40 = vor.u32 %v2678_v18, %v2676_v26  ;;  %v7733_v43 = vsel %vm1113_vm1, %v1152_v36, %v1156_v37 }
  0x35   : > { %6668 = vmatpush3.bf16.msra.mxu0 %v7351_v42  ;;  %6413 = vmatprep.subr.bf16.mxu1 %v7355_v1  ;;  %v7724_v39 = vpack.c.bf16 %v480_v34, %v441_v58  ;;  %v7358_v42 = vld [vmem:[%s9115_s1 + $0x18] sm:$0xff]   ;;  %9254 = vst [vmem:[#allocation12_spill] sm:$0xff] %v7733_v43  ;;  %v1160_v45 = vor.u32 %v1158_v27, %v1156_v37  ;;  %v7770_v36 = vrot.slane %v505_v22, 7  ;;  %v7363_v37 = vld [vmem:[%s9115_s1 + $0x28] sm:$0xff]  }
  0x36   : > { %6669 = vmatprep.subr.bf16.mxu0 %v7353_v14  ;;  %6621 = vmatprep.mubr.bf16.mxu0 %v2677_v38  ;;  %v7743_v49 = vsel %vm314_vm0, %v7710_v61, %v7726_v41  ;;  %v502_v2 = vmul.f32 %v5638_v32, %v7551_v17  ;;  %v543_v38 = vadd.f32 %v7558_v21, %v541_v15 }
  0x37   : > { %6366 = vmatmul.mubr.bf16.gmra.mrb[4].mxu1 %v7716_v33  ;;  %v2682_v48 = vshll.u32 %v7724_v39, 16  ;;  %v2686_v53 = vshrl.u32 %v7724_v39, 16  ;;  %v7752_v58 = vpack.c.bf16 %v481_v51, %v7743_v49  ;;  %v7755_v63 = vpack.c.bf16 %v7743_v49, %v480_v34 }
  0x38   : > { %6369 = vmatprep.mubr.bf16.mxu1 %v7733_v43  ;;  %6414 = vmatpush3.bf16.msra.mxu1 %v7355_v1  ;;  %v5642_v1 = vunpack.c.h.bf16 %v7708_v20  ;;  %v504_v19 = vadd.f32 %v7558_v21, %v502_v2  ;;  %v520_v2 = vsel %vm314_vm0, 0.0, %v7770_v36  ;;  %v545_v15 = vmax.f32 %v543_v38, 0.0 }
  0x39   : > { %6670 = vmatpush3.bf16.msra.mxu0 %v7353_v14  ;;  %9255 = vst [vmem:[#allocation13_spill] sm:$0xff] %v7755_v63  ;;  %v2684_v9 = vrot.slane %v2682_v48, 1  ;;  %6415 = vmatprep.subr.bf16.mxu1 %v7358_v42  ;;  %v2690_v18 = vshll.u32 %v7752_v58, 16  ;;  %v1162_v14 = vshll.u32 %v7755_v63, 16  ;;  %v2694_v27 = vshrl.u32 %v7752_v58, 16 }
  0x3a   : > { %6671 = vmatprep.subr.bf16.mxu0 %v7354_v62  ;;  %v1166_v20 = vshrl.u32 %v7755_v63, 16  ;;  %v506_v34 = vmax.f32 %v504_v19, 0.0  ;;  %v7790_v4 = vpack.c.bf16 %v520_v2, %v481_v51  ;;  %v7365_v51 = vld [vmem:[%s9115_s1 + $0x30] sm:$0xff]  }
  0x3b   : > { %v2685_v25 = vsel %vm1113_vm1, %v2680_v40, %v2684_v9  ;;  %v2688_v26 = vor.u32 %v2686_v53, %v2684_v9  ;;  %v2692_v29 = vrot.slane %v2690_v18, 1  ;;  %v1164_v32 = vrot.slane %v1162_v14, 1  ;;  %v7359_v14 = vld [vmem:[%s9115_s1 + $0x170] sm:$0xff]  }
  0x3c   : > { %6416 = vmatpush3.bf16.msra.mxu1 %v7358_v42  ;;  %6622 = vmatmul.mubr.bf16.gmra.mrb[4].mxu0 %v2685_v25  ;;  %v542_v40 = vmul.f32 %v5642_v1, %v7551_v17  ;;  %v7782_v53 = vrot.slane %v506_v34, 7  ;;  %9257 = vst [vmem:[#allocation15_spill] sm:$0xff] %v7790_v4  ;;  %v582_v18 = vmul.f32 %v5646_v31, %v7551_v17  ;;  %v1170_v22 = vshll.u32 %v7790_v4, 16 }
  0x3d   : > { %6417 = vmatprep.subr.bf16.mxu1 %v7361_v57  ;;  %6672 = vmatpush3.bf16.msra.mxu0 %v7354_v62  ;;  %v2693_v42 = vsel %vm1113_vm1, %v2688_v26, %v2692_v29  ;;  %v7780_v48 = vsel %vm1113_vm1, %v1160_v45, %v1164_v32  ;;  %v7357_v62 = vld [vmem:[%s9115_s1 + $0x168] sm:$0xff]   ;;  %v2696_v47 = vor.u32 %v2694_v27, %v2692_v29  ;;  %v7811_v25 = vrot.slane %v545_v15, 7 }
  0x3e   : > { %9256 = vst [vmem:[#allocation14_spill] sm:$0xff] %v7780_v48  ;;  %6673 = vmatprep.subr.bf16.mxu0 %v7356_v23  ;;  %6625 = vmatprep.mubr.bf16.mxu0 %v2693_v42  ;;  %v1168_v9 = vor.u32 %v1166_v20, %v1164_v32  ;;  %v7795_v45 = vsel %vm314_vm0, %v7770_v36, %v7782_v53  ;;  %v521_v1 = vsel %vm314_vm0, %v7782_v53, 0.0  ;;  %v1174_v27 = vshrl.u32 %v7790_v4, 16 }
  0x3f   : > { %6370 = vmatmul.mubr.bf16.gmra.mrb[8].mxu1 %v7780_v48  ;;  %v544_v16 = vadd.f32 %v7558_v21, %v542_v40  ;;  %v7808_v19 = vpack.c.bf16 %v7795_v45, %v520_v2  ;;  %v7814_v26 = vpack.c.bf16 %v521_v1, %v7795_v45  ;;  %v584_v29 = vadd.f32 %v7558_v21, %v582_v18 }
  0x40   : > { %6418 = vmatpush3.bf16.msra.mxu1 %v7361_v57  ;;  %v583_v57 = vadd.f32 %v7558_v21, %v581_v46  ;;  %v1172_v34 = vrot.slane %v1170_v22, 1  ;;  %v560_v38 = vsel %vm314_vm0, 0.0, %v7811_v25  ;;  %v7360_v46 = vld [vmem:[%s9115_s1 + $0x178] sm:$0xff]  }
  0x41   : > { %9258 = vst [vmem:[#allocation16_spill] sm:$0xff] %v7814_v26  ;;  %6674 = vmatpush3.bf16.msra.mxu0 %v7356_v23  ;;  %6419 = vmatprep.subr.bf16.mxu1 %v7363_v37  ;;  %v546_v20 = vmax.f32 %v544_v16, 0.0  ;;  %v2698_v32 = vshll.u32 %v7808_v19, 16  ;;  %v2702_v40 = vshrl.u32 %v7808_v19, 16  ;;  %v7823_v31 = vpack.c.bf16 %v560_v38, %v521_v1 }
  0x42   : > { %6675 = vmatprep.subr.bf16.mxu0 %v7357_v62  ;;  %v1178_v23 = vshll.u32 %v7814_v26, 16  ;;  %v1182_v2 = vshrl.u32 %v7814_v26, 16  ;;  %v7833_v16 = vsel %vm1113_vm1, %v1168_v9, %v1172_v34  ;;  %v1176_v18 = vor.u32 %v1174_v27, %v1172_v34  ;;  %v5769_v9 = vld [vmem:[%s7540_s24 + $0x38] sm:$0xff]  }
  0x43   : > { %v7826_v42 = vrot.slane %v546_v20, 7  ;;  %v2700_v15 = vrot.slane %v2698_v32, 1  ;;  %9260 = vst [vmem:[#allocation18_spill] sm:$0xff] %v7833_v16  ;;  %v585_v1 = vmax.f32 %v583_v57, 0.0  ;;  %6373 = vmatprep.mubr.bf16.mxu1 %v7833_v16  ;;  %v2706_v22 = vshll.u32 %v7823_v31, 16 }
  0x44   : > { %6420 = vmatpush3.bf16.msra.mxu1 %v7363_v37  ;;  %v1180_v20 = vrot.slane %v1178_v23, 1  ;;  %v2710_v34 = vshrl.u32 %v7823_v31, 16  ;;  %v7854_v23 = vld [vmem:[%s7540_s24 + $0x40] sm:$0xff]  }
  0x45   : > { %9259 = vst [vmem:[#allocation17_spill] sm:$0xff] %v7826_v42  ;;  %6676 = vmatpush3.bf16.msra.mxu0 %v7357_v62  ;;  %6421 = vmatprep.subr.bf16.mxu1 %v7365_v51  ;;  %v7840_v30 = vsel %vm314_vm0, %v7811_v25, %v7826_v42  ;;  %v561_v37 = vsel %vm314_vm0, %v7826_v42, 0.0  ;;  %v7367_v62 = vld [vmem:[%s9115_s1 + $0x38] sm:$0xff]   ;;  %v2701_v27 = vsel %vm1113_vm1, %v2696_v47, %v2700_v15  ;;  %v2708_v16 = vrot.slane %v2706_v22, 1  ;;  %v7865_v47 = vld [vmem:[%s9115_s1 + $0x180] sm:$0xff]  }
  0x46   : > { %9261 = vst [vmem:[#allocation19_spill] sm:$0xff] %v7840_v30  ;;  %6677 = vmatprep.subr.bf16.mxu0 %v7359_v14  ;;  %v2704_v57 = vor.u32 %v2702_v40, %v2700_v15  ;;  %v7850_v32 = vpack.c.bf16 %v561_v37, %v7840_v30  ;;  %6626 = vmatmul.mubr.bf16.gmra.mrb[8].mxu0 %v2701_v27  ;;  %v7870_v40 = vld [vmem:[%s9115_s1 + $0x80] sm:$0xff]   ;;  %v7874_v22 = vrot.slane %v585_v1, 7  ;;  %v5649_v1 = vunpack.c.l.bf16 %v5769_v9 }
  0x47   : > { %v7857_v48 = vsel %vm1113_vm1, %v1176_v18, %v1180_v20  ;;  %v7860_v43 = vpack.c.bf16 %v7840_v30, %v560_v38  ;;  %v1184_v33 = vor.u32 %v1182_v2, %v1180_v20  ;;  %v586_v18 = vmax.f32 %v584_v29, 0.0 }
  0x48   : > { %9262 = vst [vmem:[#allocation20_spill] sm:$0xff] %v7857_v48  ;;  %6422 = vmatpush3.bf16.msra.mxu1 %v7365_v51  ;;  %v2714_v15 = vshll.u32 %v7850_v32, 16  ;;  %9264 = vst [vmem:[#allocation22_spill] sm:$0xff] %v7874_v22  ;;  %v2718_v38 = vshrl.u32 %v7850_v32, 16  ;;  %v2709_v2 = vsel %vm1113_vm1, %v2704_v57, %v2708_v16  ;;  %v2712_v20 = vor.u32 %v2710_v34, %v2708_v16 }
  0x49   : > { %9263 = vst [vmem:[#allocation21_spill] sm:$0xff] %v7860_v43  ;;  %6374 = vmatmul.mubr.bf16.gmra.mrb[12].mxu1 %v7857_v48  ;;  %6678 = vmatpush3.bf16.msra.mxu0 %v7359_v14  ;;  %v1186_v51 = vshll.u32 %v7860_v43, 16  ;;  %v1190_v27 = vshrl.u32 %v7860_v43, 16  ;;  %v7880_v48 = vrot.slane %v586_v18, 7  ;;  %v600_v29 = vsel %vm314_vm0, 0.0, %v7874_v22 }
  0x4a   : > { %6679 = vmatprep.subr.bf16.mxu0 %v7360_v46  ;;  %6423 = vmatprep.subr.bf16.mxu1 %v7367_v62  ;;  %v2716_v26 = vrot.slane %v2714_v15, 1  ;;  %v7884_v63 = vpack.c.bf16 %v600_v29, %v561_v37  ;;  %v5650_v14 = vunpack.c.h.bf16 %v5769_v9  ;;  %v5653_v16 = vunpack.c.l.bf16 %v7854_v23 }
  0x4b   : > { %6629 = vmatprep.mubr.bf16.mxu0 %v2709_v2  ;;  %9265 = vst [vmem:[#allocation23_spill] sm:$0xff] %v7880_v48  ;;  %v1188_v4 = vrot.slane %v1186_v51, 1  ;;  %v7891_v34 = vsel %vm314_vm0, %v7874_v22, %v7880_v48  ;;  %v601_v18 = vsel %vm314_vm0, %v7880_v48, 0.0 }
  0x4c   : > { %9266 = vst [vmem:[#allocation24_spill] sm:$0xff] %v7884_v63  ;;  %6424 = vmatpush3.bf16.msra.mxu1 %v7367_v62  ;;  %v2717_v57 = vsel %vm1113_vm1, %v2712_v20, %v2716_v26  ;;  %9267 = vst [vmem:[#allocation25_spill] sm:$0xff] %v7891_v34  ;;  %v2720_v15 = vor.u32 %v2718_v38, %v2716_v26  ;;  %v7900_v9 = vpack.c.bf16 %v7891_v34, %v600_v29 }
  0x4d   : > { %6680 = vmatpush3.bf16.msra.mxu0 %v7360_v46  ;;  %6473 = vmatprep.subr.bf16.mxu1 %v7870_v40  ;;  %v7897_v37 = vsel %vm1113_vm1, %v1184_v33, %v1188_v4  ;;  %v1192_v62 = vor.u32 %v1190_v27, %v1188_v4  ;;  %v1194_v2 = vshll.u32 %v7884_v63, 16  ;;  %v621_v26 = vmul.f32 %v5649_v1, %v7551_v17 }
  0x4e   : > { %9268 = vst [vmem:[#allocation26_spill] sm:$0xff] %v7897_v37  ;;  %6729 = vmatprep.subr.bf16.mxu0 %v7865_v47  ;;  %6377 = vmatprep.mubr.bf16.mxu1 %v7897_v37  ;;  %v7907_v38 = vpack.c.bf16 %v601_v18, %v7891_v34  ;;  %v1198_v46 = vshrl.u32 %v7884_v63, 16  ;;  %v622_v33 = vmul.f32 %v5650_v14, %v7551_v17  ;;  %v2722_v20 = vshll.u32 %v7900_v9, 16 }
  0x4f   : > { %6630 = vmatmul.mubr.bf16.gmra.mrb[12].mxu0 %v2717_v57  ;;  %v1196_v51 = vrot.slane %v1194_v2, 1  ;;  %v2726_v4 = vshrl.u32 %v7900_v9, 16  ;;  %v5654_v27 = vunpack.c.h.bf16 %v7854_v23  ;;  %v623_v29 = vadd.f32 %v7558_v21, %v621_v26 }
  0x50   : > { %9269 = vst [vmem:[#allocation27_spill] sm:$0xff] %v7907_v38  ;;  %v1202_v37 = vshll.u32 %v7907_v38, 16  ;;  %v624_v1 = vadd.f32 %v7558_v21, %v622_v33  ;;  %v1206_v43 = vshrl.u32 %v7907_v38, 16  ;;  %v2724_v13 = vrot.slane %v2722_v20, 1 }
  0x51   : > { %v7919_v63 = vsel %vm1113_vm1, %v1192_v62, %v1196_v51  ;;  %v1200_v14 = vor.u32 %v1198_v46, %v1196_v51  ;;  %v661_v57 = vmul.f32 %v5653_v16, %v7551_v17  ;;  %v625_v2 = vmax.f32 %v623_v29, 0.0  ;;  %v5771_v29 = vld [vmem:[%s7540_s24 + $0x48] sm:$0xff]  }
  0x52   : > { %9270 = vst [vmem:[#allocation28_spill] sm:$0xff] %v7919_v63  ;;  %6378 = vmatmul.mubr.bf16.gmra.mrb[16].mxu1 %v7919_v63  ;;  %v1204_v23 = vrot.slane %v1202_v37, 1  ;;  %v626_v52 = vmax.f32 %v624_v1, 0.0  ;;  %v662_v26 = vmul.f32 %v5654_v27, %v7551_v17  ;;  %v2725_v28 = vsel %vm1113_vm1, %v2720_v15, %v2724_v13 }
  0x53   : > { %v663_v33 = vadd.f32 %v7558_v21, %v661_v57  ;;  %6633 = vmatprep.mubr.bf16.mxu0 %v2725_v28  ;;  %v7926_v20 = vrot.slane %v625_v2, 7  ;;  %v2728_v16 = vor.u32 %v2726_v4, %v2724_v13  ;;  %v5658_v27 = vunpack.c.h.bf16 %v5771_v29 }
  0x54   : > { %v7929_v62 = vsel %vm1113_vm1, %v1200_v14, %v1204_v23  ;;  %v7931_v46 = vrot.slane %v626_v52, 7  ;;  %v664_v37 = vadd.f32 %v7558_v21, %v662_v26  ;;  %v1208_v13 = vor.u32 %v1206_v43, %v1204_v23 }
  0x55   : > { %9271 = vst [vmem:[#allocation29_spill] sm:$0xff] %v7926_v20  ;;  %9272 = vst [vmem:[#allocation30_spill] sm:$0xff] %v7929_v62  ;;  %6381 = vmatprep.mubr.bf16.mxu1 %v7929_v62  ;;  %v665_v51 = vmax.f32 %v663_v33, 0.0  ;;  %v640_v15 = vsel %vm314_vm0, 0.0, %v7926_v20  ;;  %v3202_v26 = vrot.slane %v7632_v11, 1  ;;  %v5657_v33 = vunpack.c.l.bf16 %v5771_v29 }
  0x56   : > { %9273 = vst [vmem:[#allocation31_spill] sm:$0xff] %v7931_v46  ;;  %v7942_v28 = vsel %vm314_vm0, %v7926_v20, %v7931_v46  ;;  %v641_v52 = vsel %vm314_vm0, %v7931_v46, 0.0  ;;  %v7946_v4 = vpack.c.bf16 %v640_v15, %v601_v18  ;;  %v666_v57 = vmax.f32 %v664_v37, 0.0 }
  0x57   : > { %9274 = vst [vmem:[#allocation32_spill] sm:$0xff] %v7942_v28  ;;  %v7949_v1 = vpack.c.bf16 %v641_v52, %v7942_v28  ;;  %v7952_v14 = vpack.c.bf16 %v7942_v28, %v640_v15  ;;  %v7954_v2 = vrot.slane %v665_v51, 7  ;;  %v701_v10 = vmul.f32 %v5657_v33, %v7551_v17 }
  0x58   : > { %v2730_v62 = vshll.u32 %v7946_v4, 16  ;;  %v2734_v63 = vshrl.u32 %v7946_v4, 16  ;;  %v7961_v23 = vrot.slane %v666_v57, 7  ;;  %v702_v46 = vmul.f32 %v5658_v27, %v7551_v17  ;;  %v5772_v17 = vld [vmem:[%s7540_s24 + $0x50] sm:$0xff]  }
  0x59   : > { %9275 = vst [vmem:[#allocation33_spill] sm:$0xff] %v7952_v14  ;;  %9276 = vst [vmem:[#allocation34_spill] sm:$0xff] %v7954_v2  ;;  %v2738_v43 = vshll.u32 %v7949_v1, 16  ;;  %v1210_v18 = vshll.u32 %v7952_v14, 16  ;;  %v680_v37 = vsel %vm314_vm0, 0.0, %v7954_v2  ;;  %v2742_v51 = vshrl.u32 %v7949_v1, 16 }
  0x5a   : > { %9277 = vst [vmem:[#allocation35_spill] sm:$0xff] %v7961_v23  ;;  %v1214_v11 = vshrl.u32 %v7952_v14, 16  ;;  %v2732_v15 = vrot.slane %v2730_v62, 1  ;;  %v7967_v6 = vpack.c.bf16 %v680_v37, %v641_v52  ;;  %v7972_v3 = vsel %vm314_vm0, %v7954_v2, %v7961_v23 }
  0x5b   : > { %v2740_v29 = vrot.slane %v2738_v43, 1  ;;  %v1212_v38 = vrot.slane %v1210_v18, 1  ;;  %9279 = vst [vmem:[#allocation37_spill] sm:$0xff] %v7972_v3  ;;  %v7976_v57 = vsel %vm314_vm0, %v7961_v23, 0.0  ;;  %v7985_v52 = vpack.c.bf16 %v7972_v3, %v680_v37 }
  0x5c   : > { %9278 = vst [vmem:[#allocation36_spill] sm:$0xff] %v7967_v6  ;;  %v2733_v62 = vsel %vm1113_vm1, %v2728_v16, %v2732_v15  ;;  %v2736_v43 = vor.u32 %v2734_v63, %v2732_v15  ;;  %v1218_v23 = vshll.u32 %v7967_v6, 16  ;;  %v7991_v33 = vpack.c.bf16 %v7976_v57, %v7972_v3 }
  0x5d   : > { %v7982_v18 = vsel %vm1113_vm1, %v1208_v13, %v1212_v38  ;;  %9281 = vst [vmem:[#allocation39_spill] sm:$0xff] %v7985_v52  ;;  %6634 = vmatmul.mubr.bf16.gmra.mrb[16].mxu0 %v2733_v62  ;;  %v2744_v14 = vor.u32 %v2742_v51, %v2740_v29  ;;  %v1216_v2 = vor.u32 %v1214_v11, %v1212_v38  ;;  %v2746_v16 = vshll.u32 %v7985_v52, 16 }
  0x5e   : > { %9280 = vst [vmem:[#allocation38_spill] sm:$0xff] %v7982_v18  ;;  %6382 = vmatmul.mubr.bf16.gmra.mrb[20].mxu1 %v7982_v18  ;;  %9282 = vst [vmem:[#allocation40_spill] sm:$0xff] %v7991_v33  ;;  %v2741_v63 = vsel %vm1113_vm1, %v2736_v43, %v2740_v29  ;;  %v1222_v27 = vshrl.u32 %v7967_v6, 16  ;;  %v703_v13 = vadd.f32 %v7558_v21, %v701_v10  ;;  %v1220_v37 = vrot.slane %v1218_v23, 1 }
  0x5f   : > { %6637 = vmatprep.mubr.bf16.mxu0 %v2741_v63  ;;  %v1226_v51 = vshll.u32 %v7991_v33, 16  ;;  %v3204_v38 = vrot.slane %v7651_v24, 1  ;;  %v704_v11 = vadd.f32 %v7558_v21, %v702_v46  ;;  %v8001_v15 = vrot.slane %v2746_v16, 1  ;;  %v8015_v21 = vld [vmem:[%s9116_s2] ss:$0 sm:$0xff] }
  0x60   : > { %v705_v62 = vmax.f32 %v703_v13, 0.0  ;;  %v1230_v29 = vshrl.u32 %v7991_v33, 16  ;;  %v5661_v43 = vunpack.c.l.bf16 %v5772_v17  ;;  %v8005_v18 = vsel %vm1113_vm1, %v1216_v2, %v1220_v37  ;;  %v5773_v2 = vld [vmem:[%s7540_s24 + $0x58] sm:$0xff]  }
  0x61   : > { %9283 = vst [vmem:[#allocation41_spill] sm:$0xff] %v8001_v15  ;;  %9284 = vst [vmem:[#allocation42_spill] sm:$0xff] %v8005_v18  ;;  %v1224_v6 = vor.u32 %v1222_v27, %v1220_v37  ;;  %v1228_v10 = vrot.slane %v1226_v51, 1  ;;  %v706_v23 = vmax.f32 %v704_v11, 0.0  ;;  %v2749_v63 = vsel %vm1113_vm1, %v2744_v14, %v8001_v15  ;;  %6385 = vmatprep.mubr.bf16.mxu1 %v8005_v18  ;;  %v8035_v11 = vld [vmem:[%s9117_s3] ss:$0 sm:$0xff] }
  0x62   : > { %v8010_v24 = vrot.slane %v705_v62, 7  ;;  %v741_v46 = vmul.f32 %v8015_v21, %v5661_v43  ;;  %v9286_v16 = vrot.slane %v7624_v5, 1  ;;  %v3205_v37 = vsel %vm1890_vm2, %v3202_v26, %v3204_v38  ;;  %v5774_v43 = vld [vmem:[%s7540_s24 + $0x60] sm:$0xff]  }
  0x63   : > { %v8023_v13 = vsel %vm1113_vm1, %v1224_v6, %v1228_v10  ;;  %v8025_v14 = vrot.slane %v706_v23, 7  ;;  %v5662_v62 = vunpack.c.h.bf16 %v5772_v17  ;;  %v3206_v23 = vrot.slane %v7687_v54, 1 }
  0x64   : > { %9285 = vst [vmem:[#allocation43_spill] sm:$0xff] %v8010_v24  ;;  %v3203_v27 = vsel %vm1890_vm2, %v9286_v16, %v3202_v26  ;;  %9287 = vst [vmem:[#allocation44_spill] sm:$0xff] %v8023_v13  ;;  %v8030_v51 = vsel %vm314_vm0, 0.0, %v8010_v24  ;;  %v743_v5 = vadd.f32 %v8035_v11, %v741_v46  ;;  %v1232_v26 = vor.u32 %v1230_v29, %v1228_v10 }
  0x65   : > { %9288 = vst [vmem:[#allocation45_spill] sm:$0xff] %v8025_v14  ;;  %6638 = vmatmul.mubr.bf16.gmra.mrb[20].mxu0 %v2749_v63  ;;  %v8043_v6 = vsel %vm314_vm0, %v8010_v24, %v8025_v14  ;;  %v5665_v16 = vunpack.c.l.bf16 %v5773_v2  ;;  %v3208_v17 = vrot.slane %v7724_v39, 1  ;;  %v742_v63 = vmul.f32 %v8015_v21, %v5662_v62 }
  0x66   : > { %6386 = vmatmul.mubr.bf16.gmra.mrb[24].mxu1 %v8023_v13  ;;  %6681 = vmatprep.mubr.bf16.mxu0 %v3203_v27  ;;  %v8048_v15 = vpack.c.bf16 %v8043_v6, %v8030_v51  ;;  %v745_v46 = vmax.f32 %v743_v5, 0.0  ;;  %v8054_v13 = vsel %vm314_vm0, %v8025_v14, 0.0  ;;  %v5666_v18 = vunpack.c.h.bf16 %v5773_v2 }
  0x67   : > { %v781_v29 = vmul.f32 %v8015_v21, %v5665_v16  ;;  %v5669_v10 = vunpack.c.l.bf16 %v5774_v43  ;;  %v744_v5 = vadd.f32 %v8035_v11, %v742_v63  ;;  %v3207_v39 = vsel %vm1890_vm2, %v3204_v38, %v3206_v23 }
  0x68   : > { %9289 = vst [vmem:[#allocation46_spill] sm:$0xff] %v8048_v15  ;;  %v1234_v54 = vshll.u32 %v8048_v15, 16  ;;  %v8058_v27 = vrot.slane %v745_v46, 7  ;;  %v1238_v33 = vshrl.u32 %v8048_v15, 16  ;;  %v782_v62 = vmul.f32 %v8015_v21, %v5666_v18  ;;  %v7364_v18 = vld [vmem:[%s9115_s1 + $0x188] sm:$0xff]  }
  0x69   : > { %v783_v24 = vadd.f32 %v8035_v11, %v781_v29  ;;  %v821_v14 = vmul.f32 %v8015_v21, %v5669_v10  ;;  %v746_v3 = vmax.f32 %v744_v5, 0.0  ;;  %v3209_v46 = vsel %vm1890_vm2, %v3206_v23, %v3208_v17 }
  0x6a   : > { %9290 = vst [vmem:[#allocation47_spill] sm:$0xff] %v8058_v27  ;;  %v1236_v2 = vrot.slane %v1234_v54, 1  ;;  %v8068_v16 = vsel %vm314_vm0, 0.0, %v8058_v27  ;;  %v784_v38 = vadd.f32 %v8035_v11, %v782_v62 }
  0x6b   : > { %v8073_v63 = vpack.c.bf16 %v8068_v16, %v8054_v13  ;;  %v785_v29 = vmax.f32 %v783_v24, 0.0  ;;  %v823_v10 = vadd.f32 %v8035_v11, %v821_v14  ;;  %v8084_v15 = vrot.slane %v746_v3, 7  ;;  %v5775_v24 = vld [vmem:[%s7540_s24 + $0x68] sm:$0xff]  }
  0x6c   : > { %v8081_v54 = vsel %vm1113_vm1, %v1232_v26, %v1236_v2  ;;  %v1240_v5 = vor.u32 %v1238_v33, %v1236_v2  ;;  %v786_v48 = vmax.f32 %v784_v38, 0.0  ;;  %v9297_v38 = vrot.slane %v7752_v58, 1 }
  0x6d   : > { %9291 = vst [vmem:[#allocation48_spill] sm:$0xff] %v8073_v63  ;;  %9292 = vst [vmem:[#allocation49_spill] sm:$0xff] %v8081_v54  ;;  %6682 = vmatmul.mubr.bf16.vlgmr.msra.gmra.mrb[0].mxu0 %v3205_v37  ;;  %6389 = vmatprep.mubr.bf16.mxu1 %v8081_v54  ;;  %v1242_v28 = vshll.u32 %v8073_v63, 16  ;;  %v1246_v20 = vshrl.u32 %v8073_v63, 16  ;;  %v8089_v62 = vrot.slane %v785_v29, 7  ;;  %v8096_v33 = vsel %vm314_vm0, %v8058_v27, %v8084_v15  ;;  %v5776_v27 = vld [vmem:[%s7540_s24 + $0x70] sm:$0xff]  }
  0x6e   : > { %9293 = vst [vmem:[#allocation50_spill] sm:$0xff] %v8084_v15  ;;  %6730 = vmatpush3.bf16.msra.mxu0 %v7865_v47  ;;  %6685 = vmatprep.mubr.bf16.mxu0 %v3207_v39  ;;  %v8100_v3 = vsel %vm314_vm0, %v8084_v15, 0.0  ;;  %v825_v14 = vmax.f32 %v823_v10, 0.0  ;;  %v5670_v37 = vunpack.c.h.bf16 %v5774_v43  ;;  %v8106_v2 = vrot.slane %v786_v48, 7  ;;  %v7366_v39 = vld [vmem:[%s9115_s1 + $0x190] sm:$0xff]  }
  0x6f   : > { %9294 = vst [vmem:[#allocation51_spill] sm:$0xff] %v8089_v62  ;;  %v1244_v26 = vrot.slane %v1242_v28, 1  ;;  %6731 = vmatprep.subr.bf16.mxu0 %v7364_v18  ;;  %v8104_v23 = vpack.c.bf16 %v8100_v3, %v8096_v33  ;;  %v8110_v47 = vsel %vm314_vm0, 0.0, %v8089_v62  ;;  %v3211_v43 = vsel %vm1890_vm2, %v3208_v17, %v9297_v38 }
  0x70   : > { %9296 = vst [vmem:[#allocation53_spill] sm:$0xff] %v8106_v2  ;;  %v8118_v28 = vrot.slane %v825_v14, 7  ;;  %v822_v29 = vmul.f32 %v8015_v21, %v5670_v37  ;;  %v5673_v10 = vunpack.c.l.bf16 %v5775_v24  ;;  %v8128_v15 = vsel %vm314_vm0, %v8089_v62, %v8106_v2 }
  0x71   : > { %9295 = vst [vmem:[#allocation52_spill] sm:$0xff] %v8104_v23  ;;  %v8122_v48 = vsel %vm1113_vm1, %v1240_v5, %v1244_v26  ;;  %v1248_v54 = vor.u32 %v1246_v20, %v1244_v26  ;;  %v1250_v63 = vshll.u32 %v8104_v23, 16  ;;  %9300 = vst [vmem:[#allocation56_spill] sm:$0xff] %v8128_v15  ;;  %v8133_v17 = vpack.c.bf16 %v8128_v15, %v8110_v47 }
  0x72   : > { %9298 = vst [vmem:[#allocation54_spill] sm:$0xff] %v8118_v28  ;;  %9299 = vst [vmem:[#allocation55_spill] sm:$0xff] %v8122_v48  ;;  %6390 = vmatmul.mubr.bf16.gmra.mrb[28].mxu1 %v8122_v48  ;;  %6732 = vmatpush3.bf16.msra.mxu0 %v7364_v18  ;;  %v1254_v14 = vshrl.u32 %v8104_v23, 16  ;;  %v8138_v20 = vsel %vm314_vm0, %v8106_v2, 0.0  ;;  %v8142_v5 = vsel %vm314_vm0, 0.0, %v8118_v28  ;;  %v3212_v26 = vrot.slane %v7808_v19, 1 }
  0x73   : > { %9301 = vst [vmem:[#allocation57_spill] sm:$0xff] %v8133_v17  ;;  %v1252_v37 = vrot.slane %v1250_v63, 1  ;;  %v8147_v18 = vpack.c.bf16 %v8142_v5, %v8138_v20  ;;  %v824_v38 = vadd.f32 %v8035_v11, %v822_v29  ;;  %6733 = vmatprep.subr.bf16.mxu0 %v7366_v39  ;;  %v1258_v48 = vshll.u32 %v8133_v17, 16  ;;  %v7368_v63 = vld [vmem:[%s9115_s1 + $0x198] sm:$0xff]  }
  0x74   : > { %v1262_v23 = vshrl.u32 %v8133_v17, 16  ;;  %v5674_v2 = vunpack.c.h.bf16 %v5775_v24  ;;  %v861_v62 = vmul.f32 %v8015_v21, %v5673_v10  ;;  %v3214_v24 = vrot.slane %v7823_v31, 1  ;;  %v7370_v31 = vld [vmem:[%s9115_s1 + $0x1a0] sm:$0xff]  }
  0x75   : > { %9302 = vst [vmem:[#allocation58_spill] sm:$0xff] %v8147_v18  ;;  %6686 = vmatmul.mubr.bf16.gmra.mrb[4].mxu0 %v3209_v46  ;;  %v8158_v19 = vsel %vm1113_vm1, %v1248_v54, %v1252_v37  ;;  %v1256_v34 = vor.u32 %v1254_v14, %v1252_v37  ;;  %v1266_v29 = vshll.u32 %v8147_v18, 16  ;;  %v826_v8 = vmax.f32 %v824_v38, 0.0 }
  0x76   : > { %9303 = vst [vmem:[#allocation59_spill] sm:$0xff] %v8158_v19  ;;  %6393 = vmatprep.mubr.bf16.mxu1 %v8158_v19  ;;  %6689 = vmatprep.mubr.bf16.mxu0 %v3211_v43  ;;  %v1260_v17 = vrot.slane %v1258_v48, 1  ;;  %v862_v10 = vmul.f32 %v8015_v21, %v5674_v2  ;;  %v863_v22 = vadd.f32 %v8035_v11, %v861_v62  ;;  %v1270_v46 = vshrl.u32 %v8147_v18, 16 }
  0x77   : > { %v1268_v42 = vrot.slane %v1266_v29, 1  ;;  %v8165_v30 = vrot.slane %v826_v8, 7  ;;  %6734 = vmatpush3.bf16.msra.mxu0 %v7366_v39  ;;  %v5677_v54 = vunpack.c.l.bf16 %v5776_v27  ;;  %v9306_v8 = vrot.slane %v7752_v58, 1 }
  0x78   : > { %v8169_v14 = vsel %vm1113_vm1, %v1256_v34, %v1260_v17  ;;  %v1264_v37 = vor.u32 %v1262_v23, %v1260_v17  ;;  %v864_v43 = vadd.f32 %v8035_v11, %v862_v10  ;;  %v865_v48 = vmax.f32 %v863_v22, 0.0  ;;  %6735 = vmatprep.subr.bf16.mxu0 %v7368_v63 }
  0x79   : > { %9304 = vst [vmem:[#allocation60_spill] sm:$0xff] %v8165_v30  ;;  %9305 = vst [vmem:[#allocation61_spill] sm:$0xff] %v8169_v14  ;;  %v3213_v62 = vsel %vm1890_vm2, %v9306_v8, %v3212_v26  ;;  %v8181_v2 = vsel %vm314_vm0, %v8118_v28, %v8165_v30  ;;  %v8185_v34 = vsel %vm314_vm0, %v8165_v30, 0.0  ;;  %v3215_v17 = vsel %vm1890_vm2, %v3212_v26, %v3214_v24  ;;  %v8201_v8 = vld [vmem:[%s7540_s24 + $0x78] sm:$0xff]  }
  0x7a   : > { %9307 = vst [vmem:[#allocation62_spill] sm:$0xff] %v8181_v2  ;;  %6394 = vmatmul.mubr.bf16.gmra.mrb[32].mxu1 %v8169_v14  ;;  %v8189_v22 = vsel %vm1113_vm1, %v1264_v37, %v1268_v42  ;;  %v8193_v23 = vpack.c.bf16 %v8185_v34, %v8181_v2  ;;  %v866_v58 = vmax.f32 %v864_v43, 0.0  ;;  %v8195_v39 = vrot.slane %v865_v48, 7 }
  0x7b   : > { %9308 = vst [vmem:[#allocation63_spill] sm:$0xff] %v8189_v22  ;;  %6397 = vmatprep.mubr.bf16.mxu1 %v8189_v22  ;;  %v1272_v38 = vor.u32 %v1270_v46, %v1268_v42  ;;  %v901_v29 = vmul.f32 %v8015_v21, %v5677_v54  ;;  %6736 = vmatpush3.bf16.msra.mxu0 %v7368_v63  ;;  %v5678_v10 = vunpack.c.h.bf16 %v5776_v27  ;;  %v7372_v42 = vld [vmem:[%s9115_s1 + $0x1a8] sm:$0xff]   ;;  %v3216_v46 = vrot.slane %v7850_v32, 1 }
  0x7c   : > { %9309 = vst [vmem:[#allocation64_spill] sm:$0xff] %v8193_v23  ;;  %9310 = vst [vmem:[#allocation65_spill] sm:$0xff] %v8195_v39  ;;  %v1274_v37 = vshll.u32 %v8193_v23, 16  ;;  %v8204_v14 = vrot.slane %v866_v58, 7  ;;  %v8208_v43 = vsel %vm314_vm0, 0.0, %v8195_v39  ;;  %v1278_v48 = vshrl.u32 %v8193_v23, 16  ;;  %6737 = vmatprep.subr.bf16.mxu0 %v7370_v31 }
  0x7d   : > { %6690 = vmatmul.mubr.bf16.gmra.mrb[8].mxu0 %v3213_v62  ;;  %v903_v27 = vadd.f32 %v8035_v11, %v901_v29  ;;  %v902_v26 = vmul.f32 %v8015_v21, %v5678_v10  ;;  %v5681_v58 = vunpack.c.l.bf16 %v8201_v8  ;;  %v3218_v62 = vrot.slane %v7900_v9, 1  ;;  %v7374_v23 = vld [vmem:[%s9115_s1 + $0x1b0] sm:$0xff]  }
  0x7e   : > { %9311 = vst [vmem:[#allocation66_spill] sm:$0xff] %v8204_v14  ;;  %6693 = vmatprep.mubr.bf16.mxu0 %v3215_v17  ;;  %v1276_v63 = vrot.slane %v1274_v37, 1  ;;  %v8220_v54 = vsel %vm314_vm0, %v8195_v39, %v8204_v14  ;;  %v8234_v37 = vsel %vm314_vm0, %v8204_v14, 0.0 }
  0x7f   : > { %9312 = vst [vmem:[#allocation67_spill] sm:$0xff] %v8220_v54  ;;  %v8225_v22 = vpack.c.bf16 %v8220_v54, %v8208_v43  ;;  %v905_v29 = vmax.f32 %v903_v27, 0.0  ;;  %v904_v10 = vadd.f32 %v8035_v11, %v902_v26  ;;  %6738 = vmatpush3.bf16.msra.mxu0 %v7370_v31  ;;  %v941_v19 = vmul.f32 %v8015_v21, %v5681_v58 }
  0x80   : > { %v8230_v17 = vsel %vm1113_vm1, %v1272_v38, %v1276_v63  ;;  %v1280_v32 = vor.u32 %v1278_v48, %v1276_v63  ;;  %6739 = vmatprep.subr.bf16.mxu0 %v7372_v42  ;;  %v3217_v48 = vsel %vm1890_vm2, %v3214_v24, %v3216_v46  ;;  %v3219_v58 = vsel %vm1890_vm2, %v3216_v46, %v3218_v62 }
  0x81   : > { %9313 = vst [vmem:[#allocation68_spill] sm:$0xff] %v8225_v22  ;;  %9314 = vst [vmem:[#allocation69_spill] sm:$0xff] %v8230_v17  ;;  %v1282_v9 = vshll.u32 %v8225_v22, 16  ;;  %v8241_v27 = vrot.slane %v905_v29, 7  ;;  %v1286_v31 = vshrl.u32 %v8225_v22, 16  ;;  %v906_v38 = vmax.f32 %v904_v10, 0.0 }
  0x82   : > { %6398 = vmatmul.mubr.bf16.gmra.mrb[36].mxu1 %v8230_v17  ;;  %v943_v26 = vadd.f32 %v8035_v11, %v941_v19  ;;  %v3220_v10 = vrot.slane %v7946_v4, 1  ;;  %v7376_v19 = vld [vmem:[%s9115_s1 + $0x1b8] sm:$0xff]   ;;  %v8293_v22 = vld [vmem:[%s9115_s1 + $0x1c0] sm:$0xff]  }
  0x83   : > { %9315 = vst [vmem:[#allocation70_spill] sm:$0xff] %v8241_v27  ;;  %v1284_v63 = vrot.slane %v1282_v9, 1  ;;  %v8250_v18 = vsel %vm314_vm0, 0.0, %v8241_v27  ;;  %v8252_v14 = vrot.slane %v906_v38, 7  ;;  %6740 = vmatpush3.bf16.msra.mxu0 %v7372_v42 }
  0x84   : > { %v8256_v29 = vpack.c.bf16 %v8250_v18, %v8234_v37  ;;  %v945_v17 = vmax.f32 %v943_v26, 0.0  ;;  %6741 = vmatprep.subr.bf16.mxu0 %v7374_v23 }
  0x85   : > { %9316 = vst [vmem:[#allocation71_spill] sm:$0xff] %v8252_v14  ;;  %6694 = vmatmul.mubr.bf16.gmra.mrb[12].mxu0 %v3217_v48  ;;  %v8263_v24 = vsel %vm1113_vm1, %v1280_v32, %v1284_v63  ;;  %v1288_v46 = vor.u32 %v1286_v31, %v1284_v63  ;;  %v8268_v42 = vsel %vm314_vm0, %v8241_v27, %v8252_v14  ;;  %v8272_v9 = vsel %vm314_vm0, %v8252_v14, 0.0 }
  0x86   : > { %9317 = vst [vmem:[#allocation72_spill] sm:$0xff] %v8256_v29  ;;  %9318 = vst [vmem:[#allocation73_spill] sm:$0xff] %v8263_v24  ;;  %6401 = vmatprep.mubr.bf16.mxu1 %v8263_v24  ;;  %6697 = vmatprep.mubr.bf16.mxu0 %v3219_v58  ;;  %v1290_v4 = vshll.u32 %v8256_v29, 16  ;;  %v8278_v38 = vpack.c.bf16 %v8272_v9, %v8268_v42  ;;  %v1294_v32 = vshrl.u32 %v8256_v29, 16  ;;  %v8281_v31 = vrot.slane %v945_v17, 7 }
  0x87   : > { %v3222_v48 = vrot.slane %v7949_v1, 1  ;;  %6742 = vmatpush3.bf16.msra.mxu0 %v7374_v23  ;;  %v3221_v23 = vsel %vm1890_vm2, %v3218_v62, %v3220_v10  ;;  %v8308_v27 = vpack.c.bf16 %v8030_v51, %v7976_v57 }
  0x88   : > { %9319 = vst [vmem:[#allocation74_spill] sm:$0xff] %v8278_v38  ;;  %v1292_v26 = vrot.slane %v1290_v4, 1  ;;  %v1298_v63 = vshll.u32 %v8278_v38, 16  ;;  %v8287_v24 = vsel %vm314_vm0, 0.0, %v8281_v31  ;;  %v1302_v58 = vshrl.u32 %v8278_v38, 16  ;;  %6743 = vmatprep.subr.bf16.mxu0 %v7376_v19 }
  0x89   : > { %v8297_v17 = vpack.c.bf16 %v8287_v24, %v8287_v24  ;;  %v3223_v38 = vsel %vm1890_vm2, %v3220_v10, %v3222_v48  ;;  %9320 = vst [vmem:[#allocation75_spill] sm:$0xff] %v8308_v27  ;;  %v3224_v10 = vrot.slane %v7985_v52, 1  ;;  %v3226_v57 = vrot.slane %v8308_v27, 1  ;;  %v9348_v27 = vld [vmem:[#allocation32_spill] sm:$0xff] }
  0x8a   : > { %v8300_v1 = vsel %vm1113_vm1, %v1288_v46, %v1292_v26  ;;  %v1296_v4 = vor.u32 %v1294_v32, %v1292_v26  ;;  %v1300_v29 = vrot.slane %v1298_v63, 1  ;;  %v8345_v63 = vpack.c.bf16 %v8096_v33, %v8068_v16 }
  0x8b   : > { %6402 = vmatmul.mubr.bf16.gmra.mrb[40].mxu1 %v8300_v1  ;;  %v1306_v14 = vshll.u32 %v8297_v17, 16  ;;  %6744 = vmatpush3.bf16.msra.mxu0 %v7376_v19  ;;  %v3225_v19 = vsel %vm1890_vm2, %v3222_v48, %v3224_v10  ;;  %v3227_v26 = vsel %vm1890_vm2, %v3224_v10, %v3226_v57  ;;  %v5799_v48 = vpack.c.bf16 %v7593_v55, %v7509_v7 }
  0x8c   : > { %v8311_v39 = vsel %vm1113_vm1, %v1296_v4, %v1300_v29  ;;  %v8313_v46 = vor.u32 %v1302_v58, %v1300_v29  ;;  %6793 = vmatprep.subr.bf16.mxu0 %v8293_v22  ;;  %v8328_v29 = vpack.c.bf16 %v7509_v7, %v7509_v7  ;;  %9326 = vst [vmem:[#allocation77_spill] sm:$0xff] %v8345_v63 }
  0x8d   : > { %6698 = vmatmul.mubr.bf16.gmra.mrb[16].mxu0 %v3221_v23  ;;  %6405 = vmatprep.mubr.bf16.mxu1 %v8311_v39  ;;  %v1308_v62 = vrot.slane %v1306_v14, 1  ;;  %v5802_v16 = vpack.c.bf16 %v7595_v56, %v7614_v0  ;;  %v8375_v32 = vpack.c.bf16 %v8110_v47, %v8100_v3  ;;  %v7373_v3 = vld [vmem:[%s9115_s1 + $0x90] sm:$0xff]  }
  0x8e   : > { %6701 = vmatprep.mubr.bf16.mxu0 %v3223_v38  ;;  %v8340_v38 = vpack.c.bf16 %v8054_v13, %v8043_v6  ;;  %v3230_v13 = vrot.slane %v8345_v63, 1 }
  0x8f   : > { %v1309_v51 = vsel %vm1113_vm1, %v8313_v46, %v1308_v62  ;;  %v7371_v62 = vld [vmem:[%s9115_s1 + $0x88] sm:$0xff]   ;;  %9331 = vst [vmem:[#allocation78_spill] sm:$0xff] %v8375_v32  ;;  %v3232_v47 = vrot.slane %v8375_v32, 1 }
  0x90   : > { %9325 = vst [vmem:[#allocation76_spill] sm:$0xff] %v8340_v38  ;;  %v3228_v58 = vrot.slane %v8340_v38, 1 }
  0x92   : > { %v3229_v10 = vsel %vm1890_vm2, %v3226_v57, %v3228_v58  ;;  %v5682_v57 = vunpack.c.h.bf16 %v8201_v8 }
  0x93   : > { %6406 = vmatmul.mubr.bf16.gmra.mrb[44].mxu1 %v1309_v51  ;;  %v3231_v51 = vsel %vm1890_vm2, %v3228_v58, %v3230_v13  ;;  %v7375_v58 = vld [vmem:[%s9115_s1 + $0x98] sm:$0xff]   ;;  %v9437_v23 = vld [vmem:[#allocation77_spill] sm:$0xff] }
  0x94   : > { %6425 = vmatprep.mubr.msk.bf16.mxu1 %vm8333_vm5, %v8328_v29  ;;  %v942_v8 = vmul.f32 %v8015_v21, %v5682_v57  ;;  %v8416_v21 = vpack.c.bf16 %v8208_v43, %v8185_v34  ;;  %v8428_v34 = vpack.c.bf16 %v7667_v44, %v7680_v50  ;;  %v7379_v57 = vld [vmem:[%s9115_s1 + $0xa8] sm:$0xff]  }
  0x95   : > { %6702 = vmatmul.mubr.bf16.gmra.mrb[20].mxu0 %v3225_v19  ;;  %v8382_v19 = vpack.c.bf16 %v8138_v20, %v8128_v15  ;;  %v8394_v20 = vpack.c.bf16 %v7637_v12, %v7599_v59 }
  0x96   : > { %6705 = vmatprep.mubr.bf16.mxu0 %v3227_v26  ;;  %v8399_v26 = vpack.c.bf16 %v7659_v35, %v7601_v60  ;;  %9334 = vst [vmem:[#allocation81_spill] sm:$0xff] %v8416_v21  ;;  %v3238_v43 = vrot.slane %v8416_v21, 1 }
  0x97   : > { %9332 = vst [vmem:[#allocation79_spill] sm:$0xff] %v8382_v19 }
  0x9b   : > { %6426 = vmatmul.mubr.msk.bf16.vlgmr.msra.gmra.mrb[0].mxu1 %vm8357_vm6, %v5799_v48  ;;  %v3233_v48 = vsel %vm1890_vm2, %v3230_v13, %v3232_v47  ;;  %v944_v13 = vadd.f32 %v8035_v11, %v942_v8 }
  0x9c   : > { %6474 = vmatpush3.bf16.msra.mxu1 %v7870_v40  ;;  %6429 = vmatprep.mubr.msk.bf16.mxu1 %vm8365_vm7, %v5802_v16  ;;  %v3234_v40 = vrot.slane %v8382_v19, 1  ;;  %v8408_v16 = vpack.c.bf16 %v8181_v2, %v8142_v5  ;;  %v7377_v5 = vld [vmem:[%s9115_s1 + $0xa0] sm:$0xff]   ;;  %v9342_v19 = vld [vmem:[#allocation22_spill] sm:$0xff] }
  0x9d   : > { %6706 = vmatmul.mubr.bf16.gmra.mrb[24].mxu0 %v3229_v10  ;;  %6475 = vmatprep.subr.bf16.mxu1 %v7371_v62  ;;  %v946_v11 = vmax.f32 %v944_v13, 0.0  ;;  %v8465_v13 = vpack.c.bf16 %v7782_v53, %v7795_v45 }
  0x9e   : > { %6709 = vmatprep.mubr.bf16.mxu0 %v3231_v51  ;;  %9333 = vst [vmem:[#allocation80_spill] sm:$0xff] %v8408_v16  ;;  %v3236_v10 = vrot.slane %v8408_v16, 1  ;;  %v8433_v51 = vpack.c.bf16 %v7743_v49, %v7710_v61  ;;  %v9341_v16 = vld [vmem:[#allocation17_spill] sm:$0xff] }
  0x9f   : > { %v5832_v32 = vpack.c.bf16 %v9342_v19, %v9341_v16 }
  0xa0   : > { %6476 = vmatpush3.bf16.msra.mxu1 %v7371_v62  ;;  %v3235_v62 = vsel %vm1890_vm2, %v3232_v47, %v3234_v40  ;;  %v8441_v47 = vpack.c.bf16 %v8234_v37, %v8220_v54  ;;  %v3239_v8 = vsel %vm1890_vm2, %v3236_v10, %v3238_v43  ;;  %v7381_v37 = vld [vmem:[%s9115_s1 + $0xb0] sm:$0xff]  }
  0xa1   : > { %6477 = vmatprep.subr.bf16.mxu1 %v7373_v3 }
  0xa2   : > { %9335 = vst [vmem:[#allocation82_spill] sm:$0xff] %v8441_v47 }
  0xa3   : > { %6430 = vmatmul.mubr.msk.bf16.gmra.mrb[4].mxu1 %vm8333_vm5, %v8394_v20 }
  0xa4   : > { %6433 = vmatprep.mubr.msk.bf16.mxu1 %vm8357_vm6, %v8399_v26  ;;  %6478 = vmatpush3.bf16.msra.mxu1 %v7373_v3  ;;  %v3237_v3 = vsel %vm1890_vm2, %v3234_v40, %v3236_v10  ;;  %v3240_v40 = vrot.slane %v8441_v47, 1 }
  0xa5   : > { %6710 = vmatmul.mubr.bf16.gmra.mrb[28].mxu0 %v3233_v48  ;;  %6479 = vmatprep.subr.bf16.mxu1 %v7375_v58  ;;  %v8454_v48 = vrot.slane %v946_v11, 7  ;;  %v7383_v11 = vld [vmem:[%s9115_s1 + $0xb8] sm:$0xff]  }
  0xa6   : > { %6713 = vmatprep.mubr.bf16.mxu0 %v3235_v62 }
  0xa7   : > { %9337 = vst [vmem:[#allocation84_spill] sm:$0xff] %v8454_v48  ;;  %v8474_v10 = vsel %vm314_vm0, %v8454_v48, 0.0 }
  0xa8   : > { %6480 = vmatpush3.bf16.msra.mxu1 %v7375_v58  ;;  %v8449_v58 = vpack.c.bf16 %v8268_v42, %v8250_v18  ;;  %v5821_v18 = vpack.c.bf16 %v7770_v36, %v7726_v41 }
  0xa9   : > { %6481 = vmatprep.subr.bf16.mxu1 %v7377_v5 }
  0xaa   : > { %9336 = vst [vmem:[#allocation83_spill] sm:$0xff] %v8449_v58  ;;  %v3242_v62 = vrot.slane %v8449_v58, 1 }
  0xab   : > { %6434 = vmatmul.mubr.msk.bf16.gmra.mrb[8].mxu1 %vm8365_vm7, %v8428_v34 }
  0xac   : > { %6437 = vmatprep.mubr.msk.bf16.mxu1 %vm8333_vm5, %v8433_v51  ;;  %6482 = vmatpush3.bf16.msra.mxu1 %v7377_v5  ;;  %v8470_v5 = vsel %vm314_vm0, %v8281_v31, %v8454_v48  ;;  %v3243_v58 = vsel %vm1890_vm2, %v3240_v40, %v3242_v62 }
  0xad   : > { %6714 = vmatmul.mubr.bf16.gmra.mrb[32].mxu0 %v3237_v3  ;;  %6483 = vmatprep.subr.bf16.mxu1 %v7379_v57  ;;  %v3241_v3 = vsel %vm1890_vm2, %v3238_v43, %v3240_v40  ;;  %v8489_v47 = vpack.c.bf16 %v8474_v10, %v8470_v5 }
  0xae   : > { %6717 = vmatprep.mubr.bf16.mxu0 %v3239_v8  ;;  %v8482_v8 = vpack.c.bf16 %v8287_v24, %v8272_v9  ;;  %v8497_v9 = vld [vmem:[%s9115_s1 + $0xc0] sm:$0xff]  }
  0xaf   : > { %9339 = vst [vmem:[#allocation86_spill] sm:$0xff] %v8489_v47  ;;  %v3246_v21 = vrot.slane %v8489_v47, 1  ;;  %v9345_v47 = vld [vmem:[#allocation25_spill] sm:$0xff] }
  0xb0   : > { %6484 = vmatpush3.bf16.msra.mxu1 %v7379_v57  ;;  %9338 = vst [vmem:[#allocation85_spill] sm:$0xff] %v8482_v8  ;;  %v3244_v43 = vrot.slane %v8482_v8, 1  ;;  %v9340_v57 = vld [vmem:[#allocation19_spill] sm:$0xff] }
  0xb1   : > { %6485 = vmatprep.subr.bf16.mxu1 %v7381_v37  ;;  %v5828_v40 = vpack.c.bf16 %v9340_v57, %v7811_v25  ;;  %v9346_v8 = vld [vmem:[#allocation23_spill] sm:$0xff] }
  0xb2   : > { %v5835_v38 = vpack.c.bf16 %v9346_v8, %v9345_v47  ;;  %v9352_v8 = vld [vmem:[#allocation35_spill] sm:$0xff] }
  0xb3   : > { %6438 = vmatmul.mubr.msk.bf16.gmra.mrb[12].mxu1 %vm8357_vm6, %v5821_v18 }
  0xb4   : > { %6441 = vmatprep.mubr.msk.bf16.mxu1 %vm8365_vm7, %v8465_v13  ;;  %6486 = vmatpush3.bf16.msra.mxu1 %v7381_v37  ;;  %v3245_v37 = vsel %vm1890_vm2, %v3242_v62, %v3244_v43  ;;  %v9347_v62 = vld [vmem:[#allocation29_spill] sm:$0xff] }
  0xb5   : > { %6718 = vmatmul.mubr.bf16.gmra.mrb[36].mxu0 %v3241_v3  ;;  %6487 = vmatprep.subr.bf16.mxu1 %v7383_v11  ;;  %v9343_v3 = vld [vmem:[#allocation3_spill] sm:$0xff]  ;;  %v5839_v52 = vpack.c.bf16 %v9348_v27, %v9347_v62 }
  0xb6   : > { %6721 = vmatprep.mubr.bf16.mxu0 %v3243_v58  ;;  %v8509_v63 = vpack.c.bf16 %v9343_v3, %v9343_v3  ;;  %v3247_v58 = vsel %vm1890_vm2, %v3244_v43, %v3246_v21  ;;  %v9349_v43 = vld [vmem:[#allocation31_spill] sm:$0xff] }
  0xb8   : > { %6488 = vmatpush3.bf16.msra.mxu1 %v7383_v11  ;;  %9344 = vst [vmem:[#allocation19_spill] sm:$0xff] %v8509_v63  ;;  %v3248_v11 = vrot.slane %v8509_v63, 1  ;;  %v9351_v63 = vld [vmem:[#allocation37_spill] sm:$0xff] }
  0xb9   : > { %6537 = vmatprep.subr.bf16.mxu1 %v8497_v9  ;;  %v5846_v47 = vpack.c.bf16 %v9352_v8, %v9351_v63  ;;  %v9354_v8 = vld [vmem:[#allocation45_spill] sm:$0xff]  ;;  %v9355_v63 = vld [vmem:[#allocation47_spill] sm:$0xff] }
  0xba   : > { %v3249_v19 = vsel %vm1890_vm2, %v3246_v21, %v3248_v11  ;;  %v7380_v21 = vld [vmem:[%s9115_s1 + $0x1c8] sm:$0xff]   ;;  %v7382_v11 = vld [vmem:[%s9115_s1 + $0x1d0] sm:$0xff]  }
  0xbb   : > { %6442 = vmatmul.mubr.msk.bf16.gmra.mrb[16].mxu1 %vm8333_vm5, %v5828_v40 }
  0xbc   : > { %6445 = vmatprep.mubr.msk.bf16.mxu1 %vm8357_vm6, %v5832_v32 }
  0xbd   : > { %6722 = vmatmul.mubr.bf16.gmra.mrb[40].mxu0 %v3245_v37  ;;  %v9350_v37 = vld [vmem:[#allocation34_spill] sm:$0xff] }
  0xbe   : > { %6725 = vmatprep.mubr.bf16.mxu0 %v3247_v58  ;;  %v5843_v58 = vpack.c.bf16 %v9350_v37, %v9349_v43  ;;  %v5854_v37 = vpack.c.bf16 %v9355_v63, %v9354_v8  ;;  %v9357_v63 = vld [vmem:[#allocation51_spill] sm:$0xff] }
  0xbf   : > { %v5861_v8 = vpack.c.bf16 %v8128_v15, %v9357_v63  ;;  %v8592_v15 = vpack.c.bf16 %v8165_v30, %v8181_v2  ;;  %v9360_v30 = vld [vmem:[#allocation66_spill] sm:$0xff] }
  0xc0   : > { %v9361_v2 = vld [vmem:[#allocation70_spill] sm:$0xff] }
  0xc3   : > { %6446 = vmatmul.mubr.msk.bf16.gmra.mrb[20].mxu1 %vm8365_vm7, %v5835_v38 }
  0xc4   : > { %6449 = vmatprep.mubr.msk.bf16.mxu1 %vm8333_vm5, %v5839_v52 }
  0xc5   : > { %6726 = vmatmul.mubr.bf16.gmra.mrb[44].mxu0 %v3249_v19  ;;  %v9353_v19 = vld [vmem:[#allocation43_spill] sm:$0xff] }
  0xc6   : > { %6745 = vmatprep.mubr.msk.bf16.mxu0 %vm8333_vm5, %v8394_v20  ;;  %v5850_v20 = vpack.c.bf16 %v8043_v6, %v9353_v19 }
  0xcb   : > { %6450 = vmatmul.mubr.msk.bf16.gmra.mrb[24].mxu1 %vm8357_vm6, %v5843_v58 }
  0xcc   : > { %6453 = vmatprep.mubr.msk.bf16.mxu1 %vm8365_vm7, %v5846_v47 }
  0xcd   : > { %6746 = vmatmul.mubr.msk.bf16.vlgmr.msra.gmra.mrb[0].mxu0 %vm8357_vm6, %v8399_v26  ;;  %v9356_v26 = vld [vmem:[#allocation50_spill] sm:$0xff] }
  0xce   : > { %6794 = vmatpush3.bf16.msra.mxu0 %v8293_v22  ;;  %6749 = vmatprep.mubr.msk.bf16.mxu0 %vm8365_vm7, %v8428_v34  ;;  %v7384_v22 = vld [vmem:[%s9115_s1 + $0x1d8] sm:$0xff]   ;;  %v5857_v34 = vpack.c.bf16 %v9356_v26, %v8096_v33 }
  0xcf   : > { %6795 = vmatprep.subr.bf16.mxu0 %v7380_v21 }
  0xd2   : > { %6796 = vmatpush3.bf16.msra.mxu0 %v7380_v21  ;;  %v7386_v21 = vld [vmem:[%s9115_s1 + $0x1e0] sm:$0xff]  }
  0xd3   : > { %6454 = vmatmul.mubr.msk.bf16.gmra.mrb[28].mxu1 %vm8333_vm5, %v5850_v20  ;;  %6797 = vmatprep.subr.bf16.mxu0 %v7382_v11 }
  0xd4   : > { %6457 = vmatprep.mubr.msk.bf16.mxu1 %vm8357_vm6, %v5854_v37 }
  0xd5   : > { %6750 = vmatmul.mubr.msk.bf16.gmra.mrb[4].mxu0 %vm8333_vm5, %v8433_v51  ;;  %v7388_v51 = vld [vmem:[%s9115_s1 + $0x1e8] sm:$0xff]  }
  0xd6   : > { %6753 = vmatprep.mubr.msk.bf16.mxu0 %vm8357_vm6, %v5821_v18  ;;  %6798 = vmatpush3.bf16.msra.mxu0 %v7382_v11  ;;  %v9358_v18 = vld [vmem:[#allocation53_spill] sm:$0xff] }
  0xd7   : > { %6799 = vmatprep.subr.bf16.mxu0 %v7384_v22  ;;  %v5865_v11 = vpack.c.bf16 %v8118_v28, %v9358_v18  ;;  %v8615_v28 = vpack.c.bf16 %v9361_v2, %v9360_v30 }
  0xda   : > { %6800 = vmatpush3.bf16.msra.mxu0 %v7384_v22  ;;  %v7390_v22 = vld [vmem:[%s9115_s1 + $0x1f0] sm:$0xff]  }
  0xdb   : > { %6458 = vmatmul.mubr.msk.bf16.gmra.mrb[32].mxu1 %vm8365_vm7, %v5857_v34  ;;  %6801 = vmatprep.subr.bf16.mxu0 %v7386_v21 }
  0xdc   : > { %6461 = vmatprep.mubr.msk.bf16.mxu1 %vm8333_vm5, %v5861_v8 }
  0xdd   : > { %6754 = vmatmul.mubr.msk.bf16.gmra.mrb[8].mxu0 %vm8365_vm7, %v8465_v13  ;;  %v7392_v13 = vld [vmem:[%s9115_s1 + $0x1f8] sm:$0xff]  }
  0xde   : > { %6757 = vmatprep.mubr.msk.bf16.mxu0 %vm8333_vm5, %v5828_v40  ;;  %6802 = vmatpush3.bf16.msra.mxu0 %v7386_v21  ;;  %v9359_v40 = vld [vmem:[#allocation65_spill] sm:$0xff] }
  0xdf   : > { %6803 = vmatprep.subr.bf16.mxu0 %v7388_v51  ;;  %v5872_v21 = vpack.c.bf16 %v8220_v54, %v9359_v40  ;;  %v9365_v40 = vld [vmem:[#allocation7_spill] sm:$0xff] }
  0xe0   : > { %v1894_v18 = vrot.slane %v9365_v40, 1 }
  0xe2   : > { %6804 = vmatpush3.bf16.msra.mxu0 %v7388_v51  ;;  %v8611_v51 = vld [vmem:[%s9115_s1 + $0x200] sm:$0xff]  }
  0xe3   : > { %6462 = vmatmul.mubr.msk.bf16.gmra.mrb[36].mxu1 %vm8357_vm6, %v5865_v11  ;;  %6805 = vmatprep.subr.bf16.mxu0 %v7390_v22 }
  0xe4   : > { %6465 = vmatprep.mubr.msk.bf16.mxu1 %vm8365_vm7, %v8592_v15 }
  0xe5   : > { %6758 = vmatmul.mubr.msk.bf16.gmra.mrb[12].mxu0 %vm8357_vm6, %v5832_v32 }
  0xe6   : > { %6761 = vmatprep.mubr.msk.bf16.mxu0 %vm8365_vm7, %v5835_v38  ;;  %6806 = vmatpush3.bf16.msra.mxu0 %v7390_v22  ;;  %v9362_v38 = vld [vmem:[#allocation4_spill] sm:$0xff]  ;;  %v9363_v22 = vld [vmem:[#allocation6_spill] sm:$0xff] }
  0xe7   : > { %6807 = vmatprep.subr.bf16.mxu0 %v7392_v13  ;;  %v1891_v32 = vrot.slane %v9362_v38, 1  ;;  %v1892_v54 = vrot.slane %v9363_v22, 1 }
  0xe9   : > { %v1893_v30 = vsel %vm1890_vm2, %v1891_v32, %v1892_v54  ;;  %v7387_v32 = vld [vmem:[%s9115_s1 + $0xc8] sm:$0xff]  }
  0xea   : > { %6808 = vmatpush3.bf16.msra.mxu0 %v7392_v13  ;;  %v9364_v13 = vld [vmem:[#allocation71_spill] sm:$0xff] }
  0xeb   : > { %6466 = vmatmul.mubr.msk.bf16.gmra.mrb[40].mxu1 %vm8333_vm5, %v5872_v21  ;;  %6857 = vmatprep.subr.bf16.mxu0 %v8611_v51  ;;  %v5879_v2 = vpack.c.bf16 %v9364_v13, %v8268_v42 }
  0xec   : > { %6469 = vmatprep.mubr.msk.bf16.mxu1 %vm8357_vm6, %v8615_v28 }
  0xed   : > { %6762 = vmatmul.mubr.msk.bf16.gmra.mrb[16].mxu0 %vm8333_vm5, %v5839_v52  ;;  %v9366_v52 = vld [vmem:[#allocation8_spill] sm:$0xff] }
  0xee   : > { %6765 = vmatprep.mubr.msk.bf16.mxu0 %vm8357_vm6, %v5843_v58  ;;  %v1896_v38 = vrot.slane %v9366_v52, 1  ;;  %v1895_v58 = vsel %vm1890_vm2, %v1892_v54, %v1894_v18  ;;  %v7389_v54 = vld [vmem:[%s9115_s1 + $0xd0] sm:$0xff]  }
  0xef   : > { %v9369_v52 = vld [vmem:[#allocation13_spill] sm:$0xff] }
  0xf0   : > { %v1897_v22 = vsel %vm1890_vm2, %v1894_v18, %v1896_v38 }
  0xf3   : > { %6470 = vmatmul.mubr.msk.bf16.gmra.mrb[44].mxu1 %vm8365_vm7, %v5879_v2 }
  0xf4   : > { %6489 = vmatprep.mubr.bf16.mxu1 %v1893_v30  ;;  %v9367_v30 = vld [vmem:[#allocation9_spill] sm:$0xff] }
  0xf5   : > { %6766 = vmatmul.mubr.msk.bf16.gmra.mrb[20].mxu0 %vm8365_vm7, %v5846_v47  ;;  %v1898_v40 = vrot.slane %v9367_v30, 1  ;;  %v9368_v47 = vld [vmem:[#allocation10_spill] sm:$0xff] }
  0xf6   : > { %6769 = vmatprep.mubr.msk.bf16.mxu0 %vm8333_vm5, %v5850_v20  ;;  %v1900_v20 = vrot.slane %v9368_v47, 1 }
  0xf7   : > { %v8656_v18 = vsel %vm1890_vm2, %v1896_v38, %v1898_v40 }
  0xfb   : > { %6490 = vmatmul.mubr.bf16.vlgmr.msra.gmra.mrb[0].mxu1 %v1895_v58  ;;  %v1902_v58 = vrot.slane %v9369_v52, 1 }
  0xfc   : > { %6538 = vmatpush3.bf16.msra.mxu1 %v8497_v9  ;;  %6493 = vmatprep.mubr.bf16.mxu1 %v1897_v22  ;;  %v8659_v9 = vsel %vm1890_vm2, %v1898_v40, %v1900_v20  ;;  %v7393_v22 = vld [vmem:[%s9115_s1 + $0xe0] sm:$0xff]   ;;  %v9371_v40 = vld [vmem:[#allocation16_spill] sm:$0xff] }
  0xfd   : > { %6770 = vmatmul.mubr.msk.bf16.gmra.mrb[24].mxu0 %vm8357_vm6, %v5854_v37  ;;  %6539 = vmatprep.subr.bf16.mxu1 %v7387_v32  ;;  %v7391_v37 = vld [vmem:[%s9115_s1 + $0xd8] sm:$0xff]   ;;  %v1906_v47 = vrot.slane %v9371_v40, 1 }
  0xfe   : > { %6773 = vmatprep.mubr.msk.bf16.mxu0 %vm8365_vm7, %v5857_v34  ;;  %v9370_v34 = vld [vmem:[#allocation15_spill] sm:$0xff] }
  0xff   : > { %v1904_v38 = vrot.slane %v9370_v34, 1 }
 0x100   : > { %6540 = vmatpush3.bf16.msra.mxu1 %v7387_v32  ;;  %v8676_v32 = vsel %vm1890_vm2, %v1900_v20, %v1902_v58 }
 0x101   : > { %6541 = vmatprep.subr.bf16.mxu1 %v7389_v54  ;;  %v8679_v30 = vsel %vm1890_vm2, %v1902_v58, %v1904_v38  ;;  %v9373_v58 = vld [vmem:[#allocation24_spill] sm:$0xff] }
 0x102   : > { %v1910_v34 = vrot.slane %v9373_v58, 1 }
 0x103   : > { %6494 = vmatmul.mubr.bf16.gmra.mrb[4].mxu1 %v8656_v18 }
 0x104   : > { %6497 = vmatprep.mubr.bf16.mxu1 %v8659_v9  ;;  %6542 = vmatpush3.bf16.msra.mxu1 %v7389_v54  ;;  %v7397_v54 = vld [vmem:[%s9115_s1 + $0xf0] sm:$0xff]  }
 0x105   : > { %6774 = vmatmul.mubr.msk.bf16.gmra.mrb[28].mxu0 %vm8333_vm5, %v5861_v8  ;;  %6543 = vmatprep.subr.bf16.mxu1 %v7391_v37  ;;  %v7395_v8 = vld [vmem:[%s9115_s1 + $0xe8] sm:$0xff]  }
 0x106   : > { %6777 = vmatprep.mubr.msk.bf16.mxu0 %vm8357_vm6, %v5865_v11  ;;  %v9372_v11 = vld [vmem:[#allocation21_spill] sm:$0xff] }
 0x107   : > { %v1908_v20 = vrot.slane %v9372_v11, 1 }
 0x108   : > { %6544 = vmatpush3.bf16.msra.mxu1 %v7391_v37  ;;  %v8697_v37 = vsel %vm1890_vm2, %v1904_v38, %v1906_v47 }
 0x109   : > { %6545 = vmatprep.subr.bf16.mxu1 %v7393_v22  ;;  %v8700_v52 = vsel %vm1890_vm2, %v1906_v47, %v1908_v20  ;;  %v9375_v47 = vld [vmem:[#allocation33_spill] sm:$0xff] }
 0x10a   : > { %v1914_v11 = vrot.slane %v9375_v47, 1 }
 0x10b   : > { %6498 = vmatmul.mubr.bf16.gmra.mrb[8].mxu1 %v8676_v32 }
 0x10c   : > { %6501 = vmatprep.mubr.bf16.mxu1 %v8679_v30  ;;  %6546 = vmatpush3.bf16.msra.mxu1 %v7393_v22  ;;  %v8715_v22 = vsel %vm1890_vm2, %v1908_v20, %v1910_v34  ;;  %v9376_v20 = vld [vmem:[#allocation36_spill] sm:$0xff] }
 0x10d   : > { %6778 = vmatmul.mubr.msk.bf16.gmra.mrb[32].mxu0 %vm8365_vm7, %v8592_v15  ;;  %6547 = vmatprep.subr.bf16.mxu1 %v7395_v8  ;;  %v7399_v15 = vld [vmem:[%s9115_s1 + $0xf8] sm:$0xff]  }
 0x10e   : > { %6781 = vmatprep.mubr.msk.bf16.mxu0 %vm8333_vm5, %v5872_v21  ;;  %v9374_v21 = vld [vmem:[#allocation27_spill] sm:$0xff] }
 0x10f   : > { %v1912_v38 = vrot.slane %v9374_v21, 1 }
 0x110   : > { %6548 = vmatpush3.bf16.msra.mxu1 %v7395_v8  ;;  %v6048_v8 = vpack.c.bf16 %v8470_v5, %v8281_v31 }
 0x111   : > { %6549 = vmatprep.subr.bf16.mxu1 %v7397_v54  ;;  %v8720_v40 = vsel %vm1890_vm2, %v1910_v34, %v1912_v38  ;;  %v9378_v34 = vld [vmem:[#allocation40_spill] sm:$0xff] }
 0x112   : > { %v1918_v21 = vrot.slane %v9378_v34, 1  ;;  %v9383_v34 = vld [vmem:[#allocation48_spill] sm:$0xff] }
 0x113   : > { %6502 = vmatmul.mubr.bf16.gmra.mrb[12].mxu1 %v8697_v37 }
 0x114   : > { %6505 = vmatprep.mubr.bf16.mxu1 %v8700_v52  ;;  %6550 = vmatpush3.bf16.msra.mxu1 %v7397_v54  ;;  %v1916_v54 = vrot.slane %v9376_v20, 1  ;;  %v9380_v20 = vld [vmem:[#allocation11_spill] sm:$0xff] }
 0x115   : > { %6782 = vmatmul.mubr.msk.bf16.gmra.mrb[36].mxu0 %vm8357_vm6, %v8615_v28  ;;  %6551 = vmatprep.subr.bf16.mxu1 %v7399_v15  ;;  %v8725_v28 = vld [vmem:[%s9115_s1 + $0x100] sm:$0xff]  }
 0x116   : > { %6785 = vmatprep.mubr.msk.bf16.mxu0 %vm8365_vm7, %v5879_v2  ;;  %v6052_v2 = vpack.c.bf16 %v7509_v7, %v8454_v48  ;;  %v8742_v58 = vsel %vm1890_vm2, %v1914_v11, %v1916_v54  ;;  %v9384_v48 = vld [vmem:[#allocation12_spill] sm:$0xff] }
 0x117   : > { %9377 = vst [vmem:[#allocation17_spill] sm:$0xff] %v8742_v58 }
 0x118   : > { %6552 = vmatpush3.bf16.msra.mxu1 %v7399_v15  ;;  %v8739_v15 = vsel %vm1890_vm2, %v1912_v38, %v1914_v11  ;;  %v8753_v38 = vsel %vm1890_vm2, %v1916_v54, %v1918_v21  ;;  %v7396_v11 = vld [vmem:[%s9115_s1 + $0x208] sm:$0xff]   ;;  %v9386_v54 = vld [vmem:[#allocation14_spill] sm:$0xff] }
 0x119   : > { %6921 = vmatprep.subr.bf16.mxu1 %v8725_v28  ;;  %9381 = vst [vmem:[#allocation3_spill] sm:$0xff] %v8753_v38 }
 0x11b   : > { %6506 = vmatmul.mubr.bf16.gmra.mrb[16].mxu1 %v8715_v22 }
 0x11c   : > { %6509 = vmatprep.mubr.bf16.mxu1 %v8720_v40 }
 0x11d   : > { %6786 = vmatmul.mubr.msk.bf16.gmra.mrb[40].mxu0 %vm8333_vm5, %v6048_v8  ;;  %v9379_v8 = vld [vmem:[#allocation46_spill] sm:$0xff] }
 0x11e   : > { %6789 = vmatprep.mubr.msk.bf16.mxu0 %vm8357_vm6, %v6052_v2  ;;  %v1920_v47 = vrot.slane %v9379_v8, 1  ;;  %v9385_v8 = vld [vmem:[#allocation52_spill] sm:$0xff] }
 0x120   : > { %v8756_v2 = vsel %vm1890_vm2, %v1918_v21, %v1920_v47  ;;  %v7398_v21 = vld [vmem:[%s9115_s1 + $0x210] sm:$0xff]  }
 0x121   : > { %9382 = vst [vmem:[#allocation29_spill] sm:$0xff] %v8756_v2 }
 0x123   : > { %6510 = vmatmul.mubr.bf16.gmra.mrb[20].mxu1 %v8739_v15 }
 0x124   : > { %6513 = vmatprep.mubr.bf16.mxu1 %v8742_v58  ;;  %v9392_v58 = vld [vmem:[#allocation20_spill] sm:$0xff] }
 0x125   : > { %6790 = vmatmul.mubr.msk.bf16.gmra.mrb[44].mxu0 %vm8365_vm7, %v8328_v29  ;;  %v1922_v29 = vrot.slane %v9383_v34, 1 }
 0x126   : > { %6809 = vmatprep.mubr.bf16.mxu0 %v9380_v20  ;;  %v1924_v20 = vrot.slane %v9385_v8, 1  ;;  %v9390_v8 = vld [vmem:[#allocation18_spill] sm:$0xff] }
 0x12b   : > { %6514 = vmatmul.mubr.bf16.gmra.mrb[24].mxu1 %v8753_v38  ;;  %v8772_v38 = vsel %vm1890_vm2, %v1920_v47, %v1922_v29 }
 0x12c   : > { %6517 = vmatprep.mubr.bf16.mxu1 %v8756_v2  ;;  %9387 = vst [vmem:[#allocation32_spill] sm:$0xff] %v8772_v38  ;;  %v8775_v2 = vsel %vm1890_vm2, %v1922_v29, %v1924_v20 }
 0x12d   : > { %6810 = vmatmul.mubr.bf16.vlgmr.msra.gmra.mrb[0].mxu0 %v9384_v48  ;;  %9388 = vst [vmem:[#allocation31_spill] sm:$0xff] %v8775_v2  ;;  %v7400_v48 = vld [vmem:[%s9115_s1 + $0x218] sm:$0xff]  }
 0x12e   : > { %6858 = vmatpush3.bf16.msra.mxu0 %v8611_v51  ;;  %6813 = vmatprep.mubr.bf16.mxu0 %v9386_v54  ;;  %v9389_v51 = vld [vmem:[#allocation57_spill] sm:$0xff]  ;;  %v9391_v54 = vld [vmem:[#allocation58_spill] sm:$0xff] }
 0x12f   : > { %6859 = vmatprep.subr.bf16.mxu0 %v7396_v11  ;;  %v1926_v34 = vrot.slane %v9389_v51, 1  ;;  %v1928_v47 = vrot.slane %v9391_v54, 1  ;;  %v9397_v54 = vld [vmem:[#allocation68_spill] sm:$0xff] }
 0x131   : > { %v8790_v29 = vsel %vm1890_vm2, %v1924_v20, %v1926_v34  ;;  %v1932_v20 = vrot.slane %v9397_v54, 1  ;;  %v9401_v54 = vld [vmem:[#allocation74_spill] sm:$0xff] }
 0x132   : > { %6860 = vmatpush3.bf16.msra.mxu0 %v7396_v11  ;;  %v7401_v11 = vld [vmem:[%s9115_s1 + $0x220] sm:$0xff]   ;;  %9393 = vst [vmem:[#allocation43_spill] sm:$0xff] %v8790_v29 }
 0x133   : > { %6518 = vmatmul.mubr.bf16.gmra.mrb[28].mxu1 %v8772_v38  ;;  %6861 = vmatprep.subr.bf16.mxu0 %v7398_v21  ;;  %v8793_v38 = vsel %vm1890_vm2, %v1926_v34, %v1928_v47 }
 0x134   : > { %6521 = vmatprep.mubr.bf16.mxu1 %v8775_v2  ;;  %9394 = vst [vmem:[#allocation50_spill] sm:$0xff] %v8793_v38  ;;  %v9398_v2 = vld [vmem:[#allocation28_spill] sm:$0xff] }
 0x135   : > { %6814 = vmatmul.mubr.bf16.gmra.mrb[4].mxu0 %v9390_v8  ;;  %v9396_v8 = vld [vmem:[#allocation26_spill] sm:$0xff] }
 0x136   : > { %6817 = vmatprep.mubr.bf16.mxu0 %v9392_v58  ;;  %6862 = vmatpush3.bf16.msra.mxu0 %v7398_v21  ;;  %v7402_v58 = vld [vmem:[%s9115_s1 + $0x228] sm:$0xff]  }
 0x137   : > { %6863 = vmatprep.subr.bf16.mxu0 %v7400_v48  ;;  %v9395_v21 = vld [vmem:[#allocation64_spill] sm:$0xff] }
 0x138   : > { %v1930_v51 = vrot.slane %v9395_v21, 1 }
 0x13a   : > { %6864 = vmatpush3.bf16.msra.mxu0 %v7400_v48  ;;  %v7403_v48 = vld [vmem:[%s9115_s1 + $0x230] sm:$0xff]   ;;  %v8808_v34 = vsel %vm1890_vm2, %v1928_v47, %v1930_v51  ;;  %v8821_v47 = vrot.slane %v9401_v54, 1  ;;  %v9404_v54 = vld [vmem:[#allocation44_spill] sm:$0xff] }
 0x13b   : > { %6522 = vmatmul.mubr.bf16.gmra.mrb[32].mxu1 %v8790_v29  ;;  %6865 = vmatprep.subr.bf16.mxu0 %v7401_v11  ;;  %v8811_v29 = vsel %vm1890_vm2, %v1930_v51, %v1932_v20 }
 0x13c   : > { %6525 = vmatprep.mubr.bf16.mxu1 %v8793_v38  ;;  %v9402_v38 = vld [vmem:[#allocation38_spill] sm:$0xff] }
 0x13d   : > { %6818 = vmatmul.mubr.bf16.gmra.mrb[8].mxu0 %v9396_v8  ;;  %v9400_v8 = vld [vmem:[#allocation30_spill] sm:$0xff] }
 0x13e   : > { %6821 = vmatprep.mubr.bf16.mxu0 %v9398_v2  ;;  %6866 = vmatpush3.bf16.msra.mxu0 %v7401_v11  ;;  %v7404_v2 = vld [vmem:[%s9115_s1 + $0x238] sm:$0xff]   ;;  %v9399_v11 = vld [vmem:[#allocation72_spill] sm:$0xff] }
 0x13f   : > { %6867 = vmatprep.subr.bf16.mxu0 %v7402_v58  ;;  %v1934_v21 = vrot.slane %v9399_v11, 1  ;;  %v1938_v11 = vrot.slane %v8297_v17, 1  ;;  %v5887_v17 = vpack.c.bf16 %v7599_v59, %v7595_v56  ;;  %v5894_v56 = vpack.c.bf16 %v7680_v50, %v7659_v35  ;;  %v7410_v35 = vld [vmem:[%s9115_s1 + $0x118] sm:$0xff]  }
 0x140   : > { %v5898_v59 = vpack.c.bf16 %v7710_v61, %v7667_v44  ;;  %v9410_v44 = vld [vmem:[#allocation69_spill] sm:$0xff]  ;;  %v5901_v50 = vpack.c.bf16 %v7726_v41, %v7743_v49  ;;  %v8878_v61 = vpack.c.bf16 %v8470_v5, %v8287_v24  ;;  %v8893_v49 = vpack.c.bf16 %v9343_v3, %v8474_v10 }
 0x141   : > { %v8829_v51 = vsel %vm1890_vm2, %v1934_v21, %v8821_v47  ;;  %v9411_v41 = vld [vmem:[#allocation73_spill] sm:$0xff] }
 0x142   : > { %6868 = vmatpush3.bf16.msra.mxu0 %v7402_v58  ;;  %v8825_v58 = vsel %vm1890_vm2, %v1932_v20, %v1934_v21  ;;  %v5883_v20 = vpack.c.bf16 %v7614_v0, %v7593_v55  ;;  %v5890_v21 = vpack.c.bf16 %v7601_v60, %v7637_v12  ;;  %v9407_v55 = vld [vmem:[#allocation59_spill] sm:$0xff]  ;;  %v7408_v0 = vld [vmem:[%s9115_s1 + $0x108] sm:$0xff]   ;;  %v7409_v60 = vld [vmem:[%s9115_s1 + $0x110] sm:$0xff]   ;;  %v4136_v10 = vshll.u32 %v8893_v49, 16 }
 0x143   : > { %6526 = vmatmul.mubr.bf16.gmra.mrb[36].mxu1 %v8808_v34  ;;  %6869 = vmatprep.subr.bf16.mxu0 %v7403_v48  ;;  %v9409_v12 = vld [vmem:[#allocation63_spill] sm:$0xff]  ;;  %v7413_v3 = vld [vmem:[%s9115_s1 + $0x130] sm:$0xff]  }
 0x144   : > { %6529 = vmatprep.mubr.bf16.mxu1 %v8811_v29 }
 0x145   : > { %6822 = vmatmul.mubr.bf16.gmra.mrb[12].mxu0 %v9400_v8  ;;  %v9403_v8 = vld [vmem:[#allocation42_spill] sm:$0xff] }
 0x146   : > { %6825 = vmatprep.mubr.bf16.mxu0 %v9402_v38  ;;  %6870 = vmatpush3.bf16.msra.mxu0 %v7403_v48  ;;  %v1939_v38 = vsel %vm1890_vm2, %v8821_v47, %v1938_v11  ;;  %v9405_v48 = vld [vmem:[#allocation49_spill] sm:$0xff] }
 0x147   : > { %6871 = vmatprep.subr.bf16.mxu0 %v7404_v2  ;;  %v9408_v11 = vld [vmem:[#allocation61_spill] sm:$0xff] }
 0x14a   : > { %6872 = vmatpush3.bf16.msra.mxu0 %v7404_v2  ;;  %v9406_v2 = vld [vmem:[#allocation55_spill] sm:$0xff] }
 0x14b   : > { %6530 = vmatmul.mubr.bf16.gmra.mrb[40].mxu1 %v8825_v58 }
 0x14c   : > { %6533 = vmatprep.mubr.bf16.mxu1 %v8829_v51 }
 0x14d   : > { %6826 = vmatmul.mubr.bf16.gmra.mrb[16].mxu0 %v9403_v8  ;;  %v7411_v8 = vld [vmem:[%s9115_s1 + $0x120] sm:$0xff]  }
 0x14e   : > { %6829 = vmatprep.mubr.bf16.mxu0 %v9404_v54  ;;  %v4128_v54 = vshll.u32 %v8878_v61, 16 }
 0x150   : > { %v4130_v24 = vrot.slane %v4128_v54, 1 }
 0x153   : > { %6534 = vmatmul.mubr.bf16.gmra.mrb[44].mxu1 %v1939_v38  ;;  %v9412_v38 = vld [vmem:[#allocation5_spill] sm:$0xff] }
 0x154   : > { %6553 = vmatprep.mubr.msk.bf16.mxu1 %vm8333_vm5, %v5883_v20  ;;  %v8903_v20 = vpack.c.bf16 %v9412_v38, %v7509_v7  ;;  %v4131_v7 = vsel %vm1113_vm1, %v8313_v46, %v4130_v24  ;;  %v9414_v46 = vld [vmem:[#allocation25_spill] sm:$0xff]  ;;  %v9424_v38 = vld [vmem:[#allocation62_spill] sm:$0xff] }
 0x155   : > { %6830 = vmatmul.mubr.bf16.gmra.mrb[20].mxu0 %v9405_v48  ;;  %v5912_v48 = vpack.c.bf16 %v9341_v16, %v9340_v57  ;;  %v4138_v16 = vrot.slane %v4136_v10, 1  ;;  %v7414_v57 = vld [vmem:[%s9115_s1 + $0x138] sm:$0xff]  }
 0x156   : > { %6833 = vmatprep.mubr.bf16.mxu0 %v9406_v2 }
 0x15b   : > { %6554 = vmatmul.mubr.msk.bf16.vlgmr.msra.gmra.mrb[0].mxu1 %vm8357_vm6, %v5887_v17  ;;  %v9413_v17 = vld [vmem:[#allocation22_spill] sm:$0xff] }
 0x15c   : > { %6929 = vmatpush3.bf16.msra.mxu1 %v8725_v28  ;;  %6557 = vmatprep.mubr.msk.bf16.mxu1 %vm8365_vm7, %v5890_v21  ;;  %v5905_v28 = vpack.c.bf16 %v7795_v45, %v7770_v36  ;;  %v7412_v36 = vld [vmem:[%s9115_s1 + $0x128] sm:$0xff]   ;;  %v5909_v45 = vpack.c.bf16 %v7811_v25, %v7782_v53  ;;  %v4140_v53 = vshrl.u32 %v8893_v49, 16  ;;  %v4144_v25 = vshll.u32 %v8903_v20, 16 }
 0x15d   : > { %6834 = vmatmul.mubr.bf16.gmra.mrb[24].mxu0 %v9407_v55  ;;  %6922 = vmatprep.subr.bf16.mxu1 %v7408_v0  ;;  %v5916_v21 = vpack.c.bf16 %v9414_v46, %v9413_v17 }
 0x15e   : > { %6837 = vmatprep.mubr.bf16.mxu0 %v9408_v11  ;;  %v4142_v55 = vor.u32 %v4140_v53, %v4138_v16  ;;  %v9415_v11 = vld [vmem:[#allocation23_spill] sm:$0xff] }
 0x15f   : > { %v9431_v53 = vld [vmem:[#allocation75_spill] sm:$0xff] }
 0x160   : > { %6930 = vmatpush3.bf16.msra.mxu1 %v7408_v0  ;;  %v4146_v0 = vrot.slane %v4144_v25, 1  ;;  %v2754_v25 = vshll.u32 %v9431_v53, 16  ;;  %v2758_v46 = vshrl.u32 %v9431_v53, 16 }
 0x161   : > { %6923 = vmatprep.subr.bf16.mxu1 %v7409_v60 }
 0x163   : > { %6558 = vmatmul.mubr.msk.bf16.gmra.mrb[4].mxu1 %vm8333_vm5, %v5894_v56  ;;  %v5920_v56 = vpack.c.bf16 %v9347_v62, %v9415_v11  ;;  %v5923_v62 = vpack.c.bf16 %v9349_v43, %v9348_v27  ;;  %v9420_v43 = vld [vmem:[#allocation47_spill] sm:$0xff] }
 0x164   : > { %6561 = vmatprep.mubr.msk.bf16.mxu1 %vm8357_vm6, %v5898_v59  ;;  %6931 = vmatpush3.bf16.msra.mxu1 %v7409_v60  ;;  %v4147_v60 = vsel %vm1113_vm1, %v4142_v55, %v4146_v0  ;;  %v2770_v55 = vshll.u32 %v9437_v23, 16 }
 0x165   : > { %6838 = vmatmul.mubr.bf16.gmra.mrb[28].mxu0 %v9409_v12  ;;  %6924 = vmatprep.subr.bf16.mxu1 %v7410_v35 }
 0x166   : > { %6841 = vmatprep.mubr.bf16.mxu0 %v9410_v44 }
 0x168   : > { %6932 = vmatpush3.bf16.msra.mxu1 %v7410_v35  ;;  %v7441_v35 = vmov 0  }
 0x169   : > { %6925 = vmatprep.subr.bf16.mxu1 %v7411_v8  ;;  %v4154_v44 = vrot.slane %v7441_v35, 1 }
 0x16b   : > { %6562 = vmatmul.mubr.msk.bf16.gmra.mrb[8].mxu1 %vm8365_vm7, %v5901_v50  ;;  %v9416_v50 = vld [vmem:[#allocation34_spill] sm:$0xff] }
 0x16c   : > { %6565 = vmatprep.mubr.msk.bf16.mxu1 %vm8333_vm5, %v5905_v28  ;;  %6933 = vmatpush3.bf16.msra.mxu1 %v7411_v8  ;;  %v9417_v28 = vld [vmem:[#allocation37_spill] sm:$0xff] }
 0x16d   : > { %6842 = vmatmul.mubr.bf16.gmra.mrb[32].mxu0 %v9411_v41  ;;  %6926 = vmatprep.subr.bf16.mxu1 %v7412_v36  ;;  %v5927_v8 = vpack.c.bf16 %v9417_v28, %v9416_v50  ;;  %v9418_v41 = vld [vmem:[#allocation35_spill] sm:$0xff] }
 0x16e   : > { %6845 = vmatprep.mubr.bf16.mxu0 %v8300_v1  ;;  %v4132_v1 = vshrl.u32 %v8878_v61, 16  ;;  %v9441_v50 = vld [vmem:[#allocation79_spill] sm:$0xff] }
 0x16f   : > { %v2786_v28 = vshll.u32 %v9441_v50, 16 }
 0x170   : > { %6934 = vmatpush3.bf16.msra.mxu1 %v7412_v36  ;;  %v4134_v2 = vor.u32 %v4132_v1, %v4130_v24  ;;  %v5931_v36 = vpack.c.bf16 %v9353_v19, %v9418_v41  ;;  %v5938_v24 = vpack.c.bf16 %v8096_v33, %v9420_v43  ;;  %v9422_v19 = vld [vmem:[#allocation53_spill] sm:$0xff]  ;;  %v9425_v33 = vld [vmem:[#allocation60_spill] sm:$0xff]  ;;  %v9430_v1 = vld [vmem:[#allocation39_spill] sm:$0xff] }
 0x171   : > { %6927 = vmatprep.subr.bf16.mxu1 %v7413_v3  ;;  %v9442_v41 = vld [vmem:[#allocation31_spill] sm:$0xff]  ;;  %v9444_v43 = vld [vmem:[#allocation80_spill] sm:$0xff] }
 0x172   : > { %v4139_v59 = vsel %vm1113_vm1, %v4134_v2, %v4138_v16  ;;  %v9432_v16 = vld [vmem:[#allocation17_spill] sm:$0xff]  ;;  %v9434_v2 = vld [vmem:[#allocation3_spill] sm:$0xff] }
 0x173   : > { %6566 = vmatmul.mubr.msk.bf16.gmra.mrb[12].mxu1 %vm8357_vm6, %v5909_v45  ;;  %v9419_v45 = vld [vmem:[#allocation45_spill] sm:$0xff] }
 0x174   : > { %6569 = vmatprep.mubr.msk.bf16.mxu1 %vm8365_vm7, %v5912_v48  ;;  %6935 = vmatpush3.bf16.msra.mxu1 %v7413_v3  ;;  %v5934_v27 = vpack.c.bf16 %v9419_v45, %v8043_v6  ;;  %v9421_v6 = vld [vmem:[#allocation56_spill] sm:$0xff]  ;;  %v9429_v3 = vld [vmem:[#allocation70_spill] sm:$0xff]  ;;  %v2788_v45 = vrot.slane %v2786_v28, 1 }
 0x175   : > { %6846 = vmatmul.mubr.bf16.gmra.mrb[36].mxu0 %v8311_v39  ;;  %6928 = vmatprep.subr.bf16.mxu1 %v7414_v57  ;;  %v4148_v39 = vshrl.u32 %v8903_v20, 16 }
 0x176   : > { %6849 = vmatprep.mubr.bf16.mxu0 %v4131_v7  ;;  %v2750_v7 = vshrl.u32 %v9430_v1, 16 }
 0x177   : > { %v4150_v12 = vor.u32 %v4148_v39, %v4146_v0  ;;  %v9439_v39 = vld [vmem:[#allocation32_spill] sm:$0xff] }
 0x178   : > { %6936 = vmatpush3.bf16.msra.mxu1 %v7414_v57  ;;  %v2756_v57 = vrot.slane %v2754_v25, 1 }
 0x179   : > { %v4155_v54 = vsel %vm1113_vm1, %v4150_v12, %v4154_v44  ;;  %v2774_v44 = vshrl.u32 %v9437_v23, 16 }
 0x17a   : > { %v2760_v11 = vor.u32 %v2758_v46, %v2756_v57  ;;  %v9450_v46 = vld [vmem:[#allocation86_spill] sm:$0xff] }
 0x17b   : > { %6570 = vmatmul.mubr.msk.bf16.gmra.mrb[16].mxu1 %vm8333_vm5, %v5916_v21 }
 0x17c   : > { %6573 = vmatprep.mubr.msk.bf16.mxu1 %vm8357_vm6, %v5920_v56  ;;  %v9438_v56 = vld [vmem:[#allocation29_spill] sm:$0xff] }
 0x17d   : > { %6850 = vmatmul.mubr.bf16.gmra.mrb[40].mxu0 %v4139_v59 }
 0x17e   : > { %6853 = vmatprep.mubr.bf16.mxu0 %v4147_v60  ;;  %v9440_v60 = vld [vmem:[#allocation78_spill] sm:$0xff] }
 0x17f   : > { %v2778_v12 = vshll.u32 %v9440_v60, 16  ;;  %v2782_v4 = vshrl.u32 %v9440_v60, 16 }
 0x183   : > { %6574 = vmatmul.mubr.msk.bf16.gmra.mrb[20].mxu1 %vm8365_vm7, %v5923_v62 }
 0x184   : > { %6577 = vmatprep.mubr.msk.bf16.mxu1 %vm8333_vm5, %v5927_v8  ;;  %v2780_v8 = vrot.slane %v2778_v12, 1 }
 0x185   : > { %6854 = vmatmul.mubr.bf16.gmra.mrb[44].mxu0 %v4155_v54 }
 0x186   : > { %6873 = vmatprep.mubr.bf16.mxu0 %v8656_v18  ;;  %v5942_v18 = vpack.c.bf16 %v9357_v63, %v9356_v26  ;;  %v9426_v63 = vld [vmem:[#allocation65_spill] sm:$0xff] }
 0x187   : > { %v5953_v26 = vpack.c.bf16 %v9426_v63, %v9425_v33  ;;  %v9446_v63 = vld [vmem:[#allocation50_spill] sm:$0xff] }
 0x18b   : > { %6578 = vmatmul.mubr.msk.bf16.gmra.mrb[24].mxu1 %vm8357_vm6, %v5931_v36  ;;  %v2784_v36 = vor.u32 %v2782_v4, %v2780_v8 }
 0x18c   : > { %6581 = vmatprep.mubr.msk.bf16.mxu1 %vm8365_vm7, %v5934_v27  ;;  %v9443_v27 = vld [vmem:[#allocation43_spill] sm:$0xff] }
 0x18d   : > { %6874 = vmatmul.mubr.bf16.vlgmr.msra.gmra.mrb[0].mxu0 %v8659_v9  ;;  %v5945_v9 = vpack.c.bf16 %v9422_v19, %v9421_v6  ;;  %v2790_v6 = vshrl.u32 %v9441_v50, 16  ;;  %v2789_v19 = vsel %vm1113_vm1, %v2784_v36, %v2788_v45 }
 0x18e   : > { %6877 = vmatprep.mubr.bf16.mxu0 %v8676_v32  ;;  %v9423_v32 = vld [vmem:[#allocation54_spill] sm:$0xff] }
 0x18f   : > { %v5949_v48 = vpack.c.bf16 %v9424_v38, %v9423_v32  ;;  %v9445_v32 = vld [vmem:[#allocation81_spill] sm:$0xff]  ;;  %v2792_v33 = vor.u32 %v2790_v6, %v2788_v45 }
 0x190   : > { %v2802_v38 = vshll.u32 %v9445_v32, 16 }
 0x193   : > { %6582 = vmatmul.mubr.msk.bf16.gmra.mrb[28].mxu1 %vm8333_vm5, %v5938_v24  ;;  %v2794_v24 = vshll.u32 %v9444_v43, 16 }
 0x194   : > { %6585 = vmatprep.mubr.msk.bf16.mxu1 %vm8357_vm6, %v5942_v18 }
 0x195   : > { %6878 = vmatmul.mubr.bf16.gmra.mrb[4].mxu0 %v8679_v30  ;;  %v9427_v30 = vld [vmem:[#allocation67_spill] sm:$0xff] }
 0x196   : > { %6881 = vmatprep.mubr.bf16.mxu0 %v8697_v37  ;;  %v9428_v37 = vld [vmem:[#allocation66_spill] sm:$0xff] }
 0x197   : > { %v5956_v10 = vpack.c.bf16 %v9428_v37, %v9427_v30  ;;  %v2804_v30 = vrot.slane %v2802_v38, 1  ;;  %v9447_v37 = vld [vmem:[#allocation82_spill] sm:$0xff] }
 0x198   : > { %v2814_v1 = vshrl.u32 %v9447_v37, 16 }
 0x19b   : > { %6586 = vmatmul.mubr.msk.bf16.gmra.mrb[32].mxu1 %vm8365_vm7, %v5945_v9  ;;  %v2798_v9 = vshrl.u32 %v9444_v43, 16 }
 0x19c   : > { %6589 = vmatprep.mubr.msk.bf16.mxu1 %vm8333_vm5, %v5949_v48  ;;  %v2796_v48 = vrot.slane %v2794_v24, 1 }
 0x19d   : > { %6882 = vmatmul.mubr.bf16.gmra.mrb[8].mxu0 %v8700_v52  ;;  %v5960_v52 = vpack.c.bf16 %v8268_v42, %v9429_v3  ;;  %v9435_v42 = vld [vmem:[#allocation84_spill] sm:$0xff] }
 0x19e   : > { %6885 = vmatprep.mubr.bf16.mxu0 %v8715_v22  ;;  %v5964_v22 = vpack.c.bf16 %v8281_v31, %v9364_v13  ;;  %v5967_v31 = vpack.c.bf16 %v9435_v42, %v8470_v5  ;;  %v9436_v13 = vld [vmem:[#allocation76_spill] sm:$0xff]  ;;  %v2772_v5 = vrot.slane %v2770_v55, 1  ;;  %v2797_v3 = vsel %vm1113_vm1, %v2792_v33, %v2796_v48 }
 0x19f   : > { %v2762_v17 = vshll.u32 %v9436_v13, 16  ;;  %v2766_v21 = vshrl.u32 %v9436_v13, 16  ;;  %v4554_v55 = vrot.slane %v8893_v49, 1  ;;  %v7442_v49 = vmov 0.0|0.0  }
 0x1a0   : > { %v2776_v54 = vor.u32 %v2774_v44, %v2772_v5 }
 0x1a1   : > { %v2764_v0 = vrot.slane %v2762_v17, 1 }
 0x1a2   : > { %v2781_v18 = vsel %vm1113_vm1, %v2776_v54, %v2780_v8 }
 0x1a3   : > { %6590 = vmatmul.mubr.msk.bf16.gmra.mrb[36].mxu1 %vm8357_vm6, %v5953_v26  ;;  %v2768_v59 = vor.u32 %v2766_v21, %v2764_v0  ;;  %v2765_v35 = vsel %vm1113_vm1, %v2760_v11, %v2764_v0  ;;  %v2800_v26 = vor.u32 %v2798_v9, %v2796_v48  ;;  %v4556_v0 = vrot.slane %v8903_v20, 1 }
 0x1a4   : > { %6593 = vmatprep.mubr.msk.bf16.mxu1 %vm8365_vm7, %v5956_v10  ;;  %v2810_v10 = vshll.u32 %v9447_v37, 16  ;;  %v4558_v20 = vrot.slane %v7442_v49, 1 }
 0x1a5   : > { %6886 = vmatmul.mubr.bf16.gmra.mrb[12].mxu0 %v8720_v40  ;;  %v9433_v40 = vld [vmem:[#allocation41_spill] sm:$0xff]  ;;  %v2773_v62 = vsel %vm1113_vm1, %v2768_v59, %v2772_v5  ;;  %v9451_v59 = vld [vmem:[#allocation19_spill] sm:$0xff] }
 0x1a6   : > { %6889 = vmatprep.mubr.bf16.mxu0 %v8739_v15  ;;  %v2752_v15 = vor.u32 %v2750_v7, %v9433_v40  ;;  %v9448_v7 = vld [vmem:[#allocation83_spill] sm:$0xff]  ;;  %v2812_v25 = vrot.slane %v2810_v10, 1  ;;  %v2842_v5 = vshll.u32 %v9451_v59, 16  ;;  %v4559_v44 = vsel %vm1890_vm2, %v4556_v0, %v4558_v20 }
 0x1a7   : > { %v2818_v53 = vshll.u32 %v9448_v7, 16 }
 0x1a8   : > { %v2757_v14 = vsel %vm1113_vm1, %v2752_v15, %v2756_v57  ;;  %v2816_v40 = vor.u32 %v2814_v1, %v2812_v25  ;;  %v4552_v15 = vrot.slane %v8878_v61, 1  ;;  %v9449_v57 = vld [vmem:[#allocation85_spill] sm:$0xff]  ;;  %v2844_v12 = vrot.slane %v2842_v5, 1 }
 0x1a9   : > { %v2830_v17 = vshrl.u32 %v9449_v57, 16 }
 0x1ab   : > { %6594 = vmatmul.mubr.msk.bf16.gmra.mrb[40].mxu1 %vm8333_vm5, %v5960_v52  ;;  %v2806_v52 = vshrl.u32 %v9445_v32, 16 }
 0x1ac   : > { %6597 = vmatprep.mubr.msk.bf16.mxu1 %vm8357_vm6, %v5964_v22  ;;  %v2805_v22 = vsel %vm1113_vm1, %v2800_v26, %v2804_v30 }
 0x1ad   : > { %6890 = vmatmul.mubr.bf16.gmra.mrb[16].mxu0 %v9432_v16  ;;  %v2808_v16 = vor.u32 %v2806_v52, %v2804_v30 }
 0x1ae   : > { %6893 = vmatprep.mubr.bf16.mxu0 %v9434_v2  ;;  %v2826_v2 = vshll.u32 %v9449_v57, 16 }
 0x1af   : > { %v2813_v42 = vsel %vm1113_vm1, %v2808_v16, %v2812_v25 }
 0x1b0   : > { %v2828_v21 = vrot.slane %v2826_v2, 1 }
 0x1b2   : > { %v2832_v61 = vor.u32 %v2830_v17, %v2828_v21 }
 0x1b3   : > { %6598 = vmatmul.mubr.msk.bf16.gmra.mrb[44].mxu1 %vm8365_vm7, %v5967_v31  ;;  %v2822_v31 = vshrl.u32 %v9448_v7, 16 }
 0x1b4   : > { %6641 = vmatprep.mubr.bf16.mxu1 %v2757_v14  ;;  %v2834_v14 = vshll.u32 %v9450_v46, 16 }
 0x1b5   : > { %6894 = vmatmul.mubr.bf16.gmra.mrb[20].mxu0 %v9438_v56  ;;  %v2838_v56 = vshrl.u32 %v9450_v46, 16 }
 0x1b6   : > { %6897 = vmatprep.mubr.bf16.mxu0 %v9439_v39  ;;  %v2836_v23 = vrot.slane %v2834_v14, 1  ;;  %v4555_v39 = vsel %vm1890_vm2, %v4552_v15, %v4554_v55 }
 0x1b8   : > { %v2840_v60 = vor.u32 %v2838_v56, %v2836_v23 }
 0x1bb   : > { %6642 = vmatmul.mubr.bf16.vlgmr.msra.gmra.mrb[24].mxu1 %v2765_v35  ;;  %v2845_v35 = vsel %vm1113_vm1, %v2840_v60, %v2844_v12 }
 0x1bc   : > { %6645 = vmatprep.mubr.bf16.mxu1 %v2773_v62 }
 0x1bd   : > { %6898 = vmatmul.mubr.bf16.gmra.mrb[24].mxu0 %v9442_v41 }
 0x1be   : > { %6901 = vmatprep.mubr.bf16.mxu0 %v9443_v27 }
 0x1c3   : > { %6646 = vmatmul.mubr.bf16.gmra.mrb[28].mxu1 %v2781_v18 }
 0x1c4   : > { %6649 = vmatprep.mubr.bf16.mxu1 %v2789_v19 }
 0x1c5   : > { %6902 = vmatmul.mubr.bf16.gmra.mrb[28].mxu0 %v9446_v63 }
 0x1c6   : > { %6905 = vmatprep.mubr.bf16.mxu0 %v8808_v34  ;;  %v2820_v34 = vrot.slane %v2818_v53, 1 }
 0x1c8   : > { %v2821_v13 = vsel %vm1113_vm1, %v2816_v40, %v2820_v34 }
 0x1cb   : > { %6650 = vmatmul.mubr.bf16.gmra.mrb[32].mxu1 %v2797_v3 }
 0x1cc   : > { %6653 = vmatprep.mubr.bf16.mxu1 %v2805_v22 }
 0x1cd   : > { %6906 = vmatmul.mubr.bf16.gmra.mrb[32].mxu0 %v8811_v29  ;;  %v4553_v29 = vsel %vm1890_vm2, %v8821_v47, %v4552_v15  ;;  %v2837_v47 = vsel %vm1113_vm1, %v2832_v61, %v2836_v23 }
 0x1ce   : > { %6909 = vmatprep.mubr.bf16.mxu0 %v8825_v58  ;;  %v2824_v58 = vor.u32 %v2822_v31, %v2820_v34 }
 0x1d0   : > { %v2829_v11 = vsel %vm1113_vm1, %v2824_v58, %v2828_v21 }
 0x1d3   : > { %6654 = vmatmul.mubr.bf16.gmra.mrb[36].mxu1 %v2813_v42 }
 0x1d4   : > { %6657 = vmatprep.mubr.bf16.mxu1 %v2821_v13 }
 0x1d5   : > { %6910 = vmatmul.mubr.bf16.gmra.mrb[36].mxu0 %v8829_v51  ;;  %v4557_v51 = vsel %vm1890_vm2, %v4554_v55, %v4556_v0 }
 0x1d6   : > { %6913 = vmatprep.mubr.bf16.mxu0 %v4553_v29 }
 0x1db   : > { %6658 = vmatmul.mubr.bf16.gmra.mrb[40].mxu1 %v2829_v11 }
 0x1dc   : > { %6661 = vmatprep.mubr.bf16.mxu1 %v2837_v47 }
 0x1dd   : > { %6914 = vmatmul.mubr.bf16.gmra.mrb[40].mxu0 %v4555_v39 }
 0x1de   : > { %6917 = vmatprep.mubr.bf16.mxu0 %v4557_v51 }
 0x1e3   : > { %6662 = vmatmul.mubr.bf16.gmra.mrb[44].mxu1 %v2845_v35 }
 0x1e5   : > { %6918 = vmatmul.mubr.bf16.gmra.mrb[44].mxu0 %v4559_v44 }
 0x22e   : > { %v6555_v62 = vpop.f32.mrb[0].mxu1 }
 0x22f   : > { %v2425_v4 = vpop.f32.mrb[1].mxu1 }
 0x230   : > { %v6556_v50 = vpop.f32.mrb[2].mxu1 }
 0x231   : > { %v2428_v28 = vpop.f32.mrb[3].mxu1 }
 0x236   : > { %v6559_v8 = vpop.f32.mrb[4].mxu1 }
 0x237   : > { %v2440_v54 = vpop.f32.mrb[5].mxu1 }
 0x238   : > { %v6560_v41 = vpop.f32.mrb[6].mxu1 }
 0x239   : > { %v2443_v36 = vpop.f32.mrb[7].mxu1 }
 0x23e   : > { %v6563_v45 = vpop.f32.mrb[8].mxu1 }
 0x23f   : > { %v2455_v27 = vpop.f32.mrb[9].mxu1 }
 0x240   : > { %v6564_v43 = vpop.f32.mrb[10].mxu1 }
 0x241   : > { %v2457_v24 = vpop.f32.mrb[11].mxu1 }
 0x246   : > { %v6567_v18 = vpop.f32.mrb[12].mxu1 }
 0x247   : > { %v9053_v6 = vpop.f32.mrb[13].mxu1 }
 0x248   : > { %v9055_v19 = vpop.f32.mrb[14].mxu1 }
 0x249   : > { %v9057_v9 = vpop.f32.mrb[15].mxu1 }
 0x24e   : > { %v9059_v32 = vpop.f32.mrb[16].mxu1 }
 0x24f   : > { %v9061_v38 = vpop.f32.mrb[17].mxu1 }
 0x250   : > { %v9063_v48 = vpop.f32.mrb[18].mxu1 }
 0x251   : > { %v2487_v33 = vpop.f32.mrb[19].mxu1 }
 0x256   : > { %v9065_v63 = vpop.f32.mrb[20].mxu1 }
 0x257   : > { %v2499_v26 = vpop.f32.mrb[21].mxu1 }
 0x258   : > { %v6576_v30 = vpop.f32.mrb[22].mxu1 }
 0x259   : > { %v9067_v37 = vpop.f32.mrb[23].mxu1 }
 0x260   : > { %v6875_v10 = vpop.f32.mrb[0].mxu0 }
 0x261   : > { %v4666_v3 = vpop.f32.mrb[1].mxu0 }
 0x262   : > { %v6937_v52 = vadd.f32 %v4666_v3, %v2425_v4  ;;  %v6876_v22 = vpop.f32.mrb[2].mxu0 }
 0x263   : > { %v6938_v1 = vadd.f32 %v6876_v22, %v6556_v50  ;;  %v4669_v7 = vpop.f32.mrb[3].mxu0 }
 0x264   : > { %v6939_v53 = vadd.f32 %v4669_v7, %v2428_v28  ;;  %v5070_v25 = vmul.f32 %v6937_v52, %v6937_v52 }
 0x265   : > { %v5072_v15 = vmul.f32 %v6938_v1, %v6938_v1 }
 0x266   : > { %v5686_v16 = vpack.c.bf16 %v6939_v53, %v6937_v52  ;;  %v5033_v40 = vadd.f32 %v6939_v53, %v6937_v52  ;;  %v5071_v34 = vmul.f32 %v6939_v53, %v6939_v53 }
 0x268   : > { %5687 = vst [vmem:[%s9074_s12] sm:$0xff] %v5686_v16   ;;  %v5102_v57 = vadd.f32 %v5071_v34, %v5070_v25  ;;  %v6879_v2 = vpop.f32.mrb[4].mxu0  ;;  %v5034_v42 = vadd.f32 %v6938_v1, %v5033_v40 }
 0x269   : > { %v6940_v31 = vadd.f32 %v6879_v2, %v6559_v8  ;;  %v4681_v13 = vpop.f32.mrb[5].mxu0 }
 0x26a   : > { %v6941_v17 = vadd.f32 %v4681_v13, %v2440_v54  ;;  %v5103_v46 = vadd.f32 %v5102_v57, %v5072_v15  ;;  %v6880_v14 = vpop.f32.mrb[6].mxu0 }
 0x26b   : > { %v6942_v29 = vadd.f32 %v6880_v14, %v6560_v41  ;;  %v4684_v21 = vpop.f32.mrb[7].mxu0  ;;  %v5074_v0 = vmul.f32 %v6940_v31, %v6940_v31 }
 0x26c   : > { %v5691_v58 = vpack.c.bf16 %v6941_v17, %v6938_v1  ;;  %v5035_v61 = vadd.f32 %v6941_v17, %v5034_v42  ;;  %v5073_v23 = vmul.f32 %v6941_v17, %v6941_v17 }
 0x26d   : > { %v5696_v55 = vpack.c.bf16 %v6942_v29, %v6940_v31  ;;  %v5075_v5 = vmul.f32 %v6942_v29, %v6942_v29 }
 0x26e   : > { %5778 = vst [vmem:[%s9074_s12 + $0x8] sm:$0xff] %v5691_v58   ;;  %v5104_v11 = vadd.f32 %v5103_v46, %v5073_v23  ;;  %v5036_v56 = vadd.f32 %v6940_v31, %v5035_v61 }
 0x26f   : > { %5779 = vst [vmem:[%s9074_s12 + $0x10] sm:$0xff] %v5696_v55  }
 0x270   : > { %v5037_v59 = vadd.f32 %v6942_v29, %v5036_v56  ;;  %v5105_v47 = vadd.f32 %v5104_v11, %v5074_v0  ;;  %v6883_v39 = vpop.f32.mrb[8].mxu0 }
 0x271   : > { %v6943_v51 = vadd.f32 %v6883_v39, %v6563_v45  ;;  %v4696_v60 = vpop.f32.mrb[9].mxu0 }
 0x272   : > { %v5106_v12 = vadd.f32 %v5105_v47, %v5075_v5  ;;  %v6884_v49 = vpop.f32.mrb[10].mxu0 }
 0x273   : > { %v4698_v20 = vpop.f32.mrb[11].mxu0  ;;  %v5077_v50 = vmul.f32 %v6943_v51, %v6943_v51 }
 0x274   : > { %v6944_v35 = vadd.f32 %v4698_v20, %v2457_v24 }
 0x276   : > { %v5701_v44 = vpack.c.bf16 %v6943_v51, %v6944_v35  ;;  %v5038_v62 = vadd.f32 %v6944_v35, %v5037_v59  ;;  %v5076_v4 = vmul.f32 %v6944_v35, %v6944_v35 }
 0x278   : > { %5780 = vst [vmem:[%s9074_s12 + $0x18] sm:$0xff] %v5701_v44   ;;  %v5107_v28 = vadd.f32 %v5106_v12, %v5076_v4  ;;  %v6887_v8 = vpop.f32.mrb[12].mxu0  ;;  %v5039_v54 = vadd.f32 %v6943_v51, %v5038_v62 }
 0x279   : > { %v4710_v41 = vpop.f32.mrb[13].mxu0 }
 0x27a   : > { %v6945_v36 = vadd.f32 %v4710_v41, %v9053_v6  ;;  %v5108_v27 = vadd.f32 %v5107_v28, %v5077_v50  ;;  %v6888_v43 = vpop.f32.mrb[14].mxu0 }
 0x27b   : > { %v6946_v45 = vadd.f32 %v6888_v43, %v9055_v19  ;;  %v4713_v18 = vpop.f32.mrb[15].mxu0 }
 0x27c   : > { %v5040_v33 = vadd.f32 %v6945_v36, %v5039_v54  ;;  %v5078_v26 = vmul.f32 %v6945_v36, %v6945_v36  ;;  %v6947_v24 = vadd.f32 %v4713_v18, %v9057_v9 }
 0x27d   : > { %v5080_v22 = vmul.f32 %v6946_v45, %v6946_v45 }
 0x27e   : > { %v5109_v30 = vadd.f32 %v5108_v27, %v5078_v26  ;;  %v5706_v10 = vpack.c.bf16 %v6947_v24, %v6945_v36  ;;  %v5041_v3 = vadd.f32 %v6947_v24, %v5040_v33  ;;  %v5079_v52 = vmul.f32 %v6947_v24, %v6947_v24 }
 0x280   : > { %5781 = vst [vmem:[%s9074_s12 + $0x20] sm:$0xff] %v5706_v10   ;;  %v5110_v1 = vadd.f32 %v5109_v30, %v5079_v52  ;;  %v6891_v7 = vpop.f32.mrb[16].mxu0  ;;  %v5042_v53 = vadd.f32 %v6946_v45, %v5041_v3 }
 0x281   : > { %v6948_v6 = vadd.f32 %v6891_v7, %v9059_v32  ;;  %v4725_v25 = vpop.f32.mrb[17].mxu0 }
 0x282   : > { %v6949_v19 = vadd.f32 %v4725_v25, %v9061_v38  ;;  %v5111_v16 = vadd.f32 %v5110_v1, %v5080_v22  ;;  %v6892_v40 = vpop.f32.mrb[18].mxu0 }
 0x283   : > { %v6950_v9 = vadd.f32 %v6892_v40, %v9063_v48  ;;  %v4728_v34 = vpop.f32.mrb[19].mxu0  ;;  %v5082_v31 = vmul.f32 %v6948_v6, %v6948_v6 }
 0x284   : > { %v5711_v15 = vpack.c.bf16 %v6949_v19, %v6946_v45  ;;  %v5043_v57 = vadd.f32 %v6949_v19, %v5042_v53  ;;  %v5081_v2 = vmul.f32 %v6949_v19, %v6949_v19 }
 0x285   : > { %v5716_v42 = vpack.c.bf16 %v6950_v9, %v6948_v6  ;;  %v5083_v32 = vmul.f32 %v6950_v9, %v6950_v9 }
 0x286   : > { %5782 = vst [vmem:[%s9074_s12 + $0x28] sm:$0xff] %v5711_v15   ;;  %v5112_v13 = vadd.f32 %v5111_v16, %v5081_v2  ;;  %v5044_v17 = vadd.f32 %v6948_v6, %v5043_v57 }
 0x287   : > { %5783 = vst [vmem:[%s9074_s12 + $0x30] sm:$0xff] %v5716_v42  }
 0x288   : > { %v5045_v46 = vadd.f32 %v6950_v9, %v5044_v17  ;;  %v5113_v14 = vadd.f32 %v5112_v13, %v5082_v31  ;;  %v6895_v29 = vpop.f32.mrb[20].mxu0 }
 0x289   : > { %v6951_v38 = vadd.f32 %v6895_v29, %v9065_v63  ;;  %v4740_v21 = vpop.f32.mrb[21].mxu0 }
 0x28a   : > { %v5114_v58 = vadd.f32 %v5113_v14, %v5083_v32  ;;  %v6896_v48 = vpop.f32.mrb[22].mxu0 }
 0x28b   : > { %v4742_v61 = vpop.f32.mrb[23].mxu0  ;;  %v5085_v5 = vmul.f32 %v6951_v38, %v6951_v38 }
 0x28c   : > { %v6952_v23 = vadd.f32 %v4742_v61, %v9067_v37 }
 0x28e   : > { %v5721_v55 = vpack.c.bf16 %v6951_v38, %v6952_v23  ;;  %v5046_v0 = vadd.f32 %v6952_v23, %v5045_v46  ;;  %v5084_v11 = vmul.f32 %v6952_v23, %v6952_v23  ;;  %v6643_v56 = vpop.f32.mrb[24].mxu1 }
 0x28f   : > { %v3040_v59 = vpop.f32.mrb[25].mxu1 }
 0x290   : > { %5784 = vst [vmem:[%s9074_s12 + $0x38] sm:$0xff] %v5721_v55   ;;  %v5115_v47 = vadd.f32 %v5114_v58, %v5084_v11  ;;  %v6899_v39 = vpop.f32.mrb[24].mxu0  ;;  %v5047_v51 = vadd.f32 %v6951_v38, %v5046_v0  ;;  %v6644_v60 = vpop.f32.mrb[26].mxu1 }
 0x291   : > { %v4754_v12 = vpop.f32.mrb[25].mxu0  ;;  %v3043_v49 = vpop.f32.mrb[27].mxu1 }
 0x292   : > { %v6953_v63 = vadd.f32 %v4754_v12, %v3040_v59  ;;  %v5116_v20 = vadd.f32 %v5115_v47, %v5085_v5  ;;  %v6900_v35 = vpop.f32.mrb[26].mxu0 }
 0x293   : > { %v6954_v44 = vadd.f32 %v6900_v35, %v6644_v60  ;;  %v4757_v62 = vpop.f32.mrb[27].mxu0 }
 0x294   : > { %v5048_v37 = vadd.f32 %v6953_v63, %v5047_v51  ;;  %v5086_v4 = vmul.f32 %v6953_v63, %v6953_v63  ;;  %v6955_v50 = vadd.f32 %v4757_v62, %v3043_v49 }
 0x295   : > { %v5088_v43 = vmul.f32 %v6954_v44, %v6954_v44 }
 0x296   : > { %v5117_v28 = vadd.f32 %v5116_v20, %v5086_v4  ;;  %v5726_v8 = vpack.c.bf16 %v6955_v50, %v6953_v63  ;;  %v5049_v54 = vadd.f32 %v6955_v50, %v5048_v37  ;;  %v5087_v41 = vmul.f32 %v6955_v50, %v6955_v50  ;;  %v6647_v36 = vpop.f32.mrb[28].mxu1 }
 0x297   : > { %v3055_v27 = vpop.f32.mrb[29].mxu1 }
 0x298   : > { %5785 = vst [vmem:[%s9074_s12 + $0x40] sm:$0xff] %v5726_v8   ;;  %v5118_v45 = vadd.f32 %v5117_v28, %v5087_v41  ;;  %v6903_v18 = vpop.f32.mrb[28].mxu0  ;;  %v5050_v33 = vadd.f32 %v6954_v44, %v5049_v54  ;;  %v6648_v26 = vpop.f32.mrb[30].mxu1 }
 0x299   : > { %v6956_v24 = vadd.f32 %v6903_v18, %v6647_v36  ;;  %v4769_v30 = vpop.f32.mrb[29].mxu0  ;;  %v3058_v10 = vpop.f32.mrb[31].mxu1 }
 0x29a   : > { %v6957_v3 = vadd.f32 %v4769_v30, %v3055_v27  ;;  %v5119_v52 = vadd.f32 %v5118_v45, %v5088_v43  ;;  %v6904_v22 = vpop.f32.mrb[30].mxu0 }
 0x29b   : > { %v6958_v1 = vadd.f32 %v6904_v22, %v6648_v26  ;;  %v4772_v7 = vpop.f32.mrb[31].mxu0  ;;  %v5090_v16 = vmul.f32 %v6956_v24, %v6956_v24 }
 0x29c   : > { %v5731_v53 = vpack.c.bf16 %v6957_v3, %v6954_v44  ;;  %v5051_v6 = vadd.f32 %v6957_v3, %v5050_v33  ;;  %v5089_v25 = vmul.f32 %v6957_v3, %v6957_v3 }
 0x29d   : > { %v5736_v19 = vpack.c.bf16 %v6958_v1, %v6956_v24  ;;  %v5091_v2 = vmul.f32 %v6958_v1, %v6958_v1 }
 0x29e   : > { %5786 = vst [vmem:[%s9074_s12 + $0x48] sm:$0xff] %v5731_v53   ;;  %v5120_v40 = vadd.f32 %v5119_v52, %v5089_v25  ;;  %v5052_v9 = vadd.f32 %v6956_v24, %v5051_v6  ;;  %v6651_v34 = vpop.f32.mrb[32].mxu1 }
 0x29f   : > { %5787 = vst [vmem:[%s9074_s12 + $0x50] sm:$0xff] %v5736_v19   ;;  %v3070_v15 = vpop.f32.mrb[33].mxu1 }
 0x2a0   : > { %v5053_v57 = vadd.f32 %v6958_v1, %v5052_v9  ;;  %v5121_v42 = vadd.f32 %v5120_v40, %v5090_v16  ;;  %v6907_v31 = vpop.f32.mrb[32].mxu0  ;;  %v6652_v13 = vpop.f32.mrb[34].mxu1 }
 0x2a1   : > { %v6959_v17 = vadd.f32 %v6907_v31, %v6651_v34  ;;  %v4784_v46 = vpop.f32.mrb[33].mxu0  ;;  %v3072_v32 = vpop.f32.mrb[35].mxu1 }
 0x2a2   : > { %v5122_v14 = vadd.f32 %v5121_v42, %v5091_v2  ;;  %v6908_v29 = vpop.f32.mrb[34].mxu0 }
 0x2a3   : > { %v4786_v38 = vpop.f32.mrb[35].mxu0  ;;  %v5093_v0 = vmul.f32 %v6959_v17, %v6959_v17 }
 0x2a4   : > { %v6960_v21 = vadd.f32 %v4786_v38, %v3072_v32 }
 0x2a6   : > { %v5741_v58 = vpack.c.bf16 %v6959_v17, %v6960_v21  ;;  %v5054_v48 = vadd.f32 %v6960_v21, %v5053_v57  ;;  %v5092_v61 = vmul.f32 %v6960_v21, %v6960_v21  ;;  %v6655_v23 = vpop.f32.mrb[36].mxu1 }
 0x2a7   : > { %v3084_v55 = vpop.f32.mrb[37].mxu1 }
 0x2a8   : > { %5788 = vst [vmem:[%s9074_s12 + $0x58] sm:$0xff] %v5741_v58   ;;  %v5123_v11 = vadd.f32 %v5122_v14, %v5092_v61  ;;  %v6911_v56 = vpop.f32.mrb[36].mxu0  ;;  %v5055_v59 = vadd.f32 %v6959_v17, %v5054_v48  ;;  %v6656_v5 = vpop.f32.mrb[38].mxu1 }
 0x2a9   : > { %v4798_v47 = vpop.f32.mrb[37].mxu0  ;;  %v3087_v39 = vpop.f32.mrb[39].mxu1 }
 0x2aa   : > { %v6961_v51 = vadd.f32 %v4798_v47, %v3084_v55  ;;  %v5124_v60 = vadd.f32 %v5123_v11, %v5093_v0  ;;  %v6912_v12 = vpop.f32.mrb[38].mxu0 }
 0x2ab   : > { %v6962_v49 = vadd.f32 %v6912_v12, %v6656_v5  ;;  %v4801_v63 = vpop.f32.mrb[39].mxu0 }
 0x2ac   : > { %v5056_v20 = vadd.f32 %v6961_v51, %v5055_v59  ;;  %v5094_v35 = vmul.f32 %v6961_v51, %v6961_v51  ;;  %v6963_v44 = vadd.f32 %v4801_v63, %v3087_v39 }
 0x2ad   : > { %v5096_v54 = vmul.f32 %v6962_v49, %v6962_v49 }
 0x2ae   : > { %v5125_v62 = vadd.f32 %v5124_v60, %v5094_v35  ;;  %v5746_v37 = vpack.c.bf16 %v6963_v44, %v6961_v51  ;;  %v5057_v4 = vadd.f32 %v6963_v44, %v5056_v20  ;;  %v5095_v50 = vmul.f32 %v6963_v44, %v6963_v44  ;;  %v6659_v28 = vpop.f32.mrb[40].mxu1 }
 0x2af   : > { %v3099_v8 = vpop.f32.mrb[41].mxu1 }
 0x2b0   : > { %5789 = vst [vmem:[%s9074_s12 + $0x60] sm:$0xff] %v5746_v37   ;;  %v5126_v41 = vadd.f32 %v5125_v62, %v5095_v50  ;;  %v6915_v36 = vpop.f32.mrb[40].mxu0  ;;  %v5058_v27 = vadd.f32 %v6962_v49, %v5057_v4  ;;  %v6660_v43 = vpop.f32.mrb[42].mxu1 }
 0x2b1   : > { %v6964_v45 = vadd.f32 %v6915_v36, %v6659_v28  ;;  %v4813_v18 = vpop.f32.mrb[41].mxu0  ;;  %v3102_v33 = vpop.f32.mrb[43].mxu1 }
 0x2b2   : > { %v6965_v26 = vadd.f32 %v4813_v18, %v3099_v8  ;;  %v5127_v24 = vadd.f32 %v5126_v41, %v5096_v54  ;;  %v6916_v30 = vpop.f32.mrb[42].mxu0 }
 0x2b3   : > { %v6966_v10 = vadd.f32 %v6916_v30, %v6660_v43  ;;  %v4816_v3 = vpop.f32.mrb[43].mxu0  ;;  %v5098_v53 = vmul.f32 %v6964_v45, %v6964_v45 }
 0x2b4   : > { %v5751_v52 = vpack.c.bf16 %v6965_v26, %v6962_v49  ;;  %v5059_v22 = vadd.f32 %v6965_v26, %v5058_v27  ;;  %v5097_v1 = vmul.f32 %v6965_v26, %v6965_v26 }
 0x2b5   : > { %v5756_v7 = vpack.c.bf16 %v6966_v10, %v6964_v45  ;;  %v5099_v9 = vmul.f32 %v6966_v10, %v6966_v10 }
 0x2b6   : > { %5790 = vst [vmem:[%s9074_s12 + $0x68] sm:$0xff] %v5751_v52   ;;  %v5128_v6 = vadd.f32 %v5127_v24, %v5097_v1  ;;  %v5060_v25 = vadd.f32 %v6964_v45, %v5059_v22  ;;  %v6663_v19 = vpop.f32.mrb[44].mxu1 }
 0x2b7   : > { %5791 = vst [vmem:[%s9074_s12 + $0x70] sm:$0xff] %v5756_v7   ;;  %v3114_v16 = vpop.f32.mrb[45].mxu1 }
 0x2b8   : > { %v5061_v40 = vadd.f32 %v6966_v10, %v5060_v25  ;;  %v5129_v34 = vadd.f32 %v5128_v6, %v5098_v53  ;;  %v6919_v15 = vpop.f32.mrb[44].mxu0  ;;  %v6664_v57 = vpop.f32.mrb[46].mxu1 }
 0x2b9   : > { %v6967_v2 = vadd.f32 %v6919_v15, %v6663_v19  ;;  %v4828_v42 = vpop.f32.mrb[45].mxu0  ;;  %v3116_v31 = vpop.f32.mrb[47].mxu1 }
 0x2ba   : > { %v5130_v13 = vadd.f32 %v5129_v34, %v5099_v9  ;;  %v6920_v17 = vpop.f32.mrb[46].mxu0 }
 0x2bb   : > { %v4830_v46 = vpop.f32.mrb[47].mxu0  ;;  %v5101_v21 = vmul.f32 %v6967_v2, %v6967_v2 }
 0x2bc   : > { %v6968_v32 = vadd.f32 %v4830_v46, %v3116_v31 }
 0x2be   : > { %v5761_v14 = vpack.c.bf16 %v6967_v2, %v6968_v32  ;;  %v5062_v29 = vadd.f32 %v6968_v32, %v5061_v40  ;;  %v5100_v38 = vmul.f32 %v6968_v32, %v6968_v32 }
 0x2c0   : > { %5792 = vst [vmem:[%s9074_s12 + $0x78] sm:$0xff] %v5761_v14   ;;  %v5063_v58 = vadd.f32 %v6967_v2, %v5062_v29  ;;  %v5131_v48 = vadd.f32 %v5130_v13, %v5100_v38 }
 0x2c2   : > { %v5064_v61 = vrot.slane %v5063_v58, 4  ;;  %v5132_v23 = vadd.f32 %v5131_v48, %v5101_v21 }
 0x2c4   : > { %v5065_v55 = vadd.f32 %v5064_v61, %v5063_v58  ;;  %v5133_v0 = vrot.slane %v5132_v23, 4 }
 0x2c6   : > { %v5066_v11 = vrot.slane %v5065_v55, 2  ;;  %v5134_v56 = vadd.f32 %v5133_v0, %v5132_v23 }
 0x2c8   : > { %v5067_v59 = vadd.f32 %v5066_v11, %v5065_v55  ;;  %v5135_v5 = vrot.slane %v5134_v56, 2 }
 0x2ca   : > { %v5068_v47 = vrot.slane %v5067_v59, 1  ;;  %v5136_v39 = vadd.f32 %v5135_v5, %v5134_v56 }
 0x2cc   : > { %v5137_v51 = vrot.slane %v5136_v39, 1  ;;  %v5069_v60 = vadd.f32 %v5068_v47, %v5067_v59 }
 0x2ce   : > { %v5138_v12 = vadd.f32 %v5137_v51, %v5136_v39 }
 0x2d0   : > { %v5139_v49 = vsel %vm314_vm0, %v5069_v60, %v5138_v12 }
 0x2d1   : > { %v5141_v63 = vsel %vm5140_vm8, %v5139_v49, 0.0 }
 0x2d2   : > { %5142 = vst [vmem:[%s268_s16] sm:$0xff] %v5141_v63 }
 0x2d3 PF: > { %s16_s20 = sadd.s32 1, %s7437_s20   ;;  %s9452_s18 = smov %s7433_s19 }
 0x2d4   : > { %p13_p5 = scmp.ge.s32.totalorder %s16_s20, 4   ;;  %s9453_s19 = smov %s9455_s21 }
 0x2d6   :  { %15 = sbr.rel (!%p13_p5) target bundleno = 2 (0x2), region = 104 }

</bundles_post_ra>
